<compile_context>
chip_gen: v7x
topology: tpu7x:2x2x1
jax: 0.10.0
libtpu: 0.0.40
codegen_flags: <defaults>
</compile_context>

<pallas_src>
import numpy as np
import jax
import jax.numpy as jnp
from jax.experimental import pallas as pl
from jax.experimental.pallas import tpu as pltpu  # noqa: F401  (kept for TPU-specific params if needed)

# ----------------------------- config (synthetic cfg) -----------------------------
B = 2                 # batch
T = 8                 # num_frames (poses)
P = 64                # pose dimension per frame
CODE_DIM = 32         # cfg.POSE2POSE.AUTOENCODER.CODE_DIM
HIDDEN = 128          # autoencoder hidden width
LAMBDA_REG = 1.0      # cfg.POSE2POSE.LAMBDA_REG
LAMBDA_KL = 0.01      # cfg.POSE2POSE.LAMBDA_KL

SR = 16000
AUDIO_LEN = 3200
WIN_LENGTH = 400
HOP_LENGTH = 160
N_FFT = 512
N_FREQS = N_FFT // 2 + 1   # 257
N_MELS = 80
F_MIN, F_MAX = 55.0, 7500.0

# padded / lane-aligned sizes
BP = 8                               # batch rows padded to sublane multiple
CODE_PAD = 128                       # code dim padded to one lane group
MEL_PAD = 128                        # n_mels padded to one lane group
FREQ_PAD = 384                       # n_freqs (257) padded to multiple of 128
N_TIME = 1 + AUDIO_LEN // HOP_LENGTH  # 21 STFT frames per clip (center=True)
R_ROWS = B * N_TIME                  # 42 total frames
R_PAD = 128                          # frame rows padded (keeps every matmul dim x8/x128)


# ----------------------------- fused forward kernel -----------------------------
def _fused_kernel(frames_ref, dft_ref, fb_ref, pool_ref, poses_ref, eps_ref,
                  w_enc1_ref, b_enc1_ref, w_mu_ref, b_mu_ref, w_lv_ref, b_lv_ref,
                  w_aud_ref, b_aud_ref, w_dec1z_ref, w_dec1a_ref, b_dec1_ref,
                  w_dec2_ref, b_dec2_ref,
                  pred_ref, mu_ref, lv_ref, l1_ref, kl_ref):
    # ---- mel spectrogram: windowed DFT (cos|-sin fused) -> power -> mel fb -> time pool ----
    s = jnp.dot(frames_ref[...], dft_ref[...],
                preferred_element_type=jnp.float32)                 # [R_PAD, 2*FREQ_PAD]
    re = s[:, :FREQ_PAD]
    im = s[:, FREQ_PAD:]
    power = re * re + im * im                                       # |STFT|^2 (power=2.0)
    mel = jnp.dot(power, fb_ref[...],
                  preferred_element_type=jnp.float32)               # [R_PAD, MEL_PAD]
    mel_feat = jnp.dot(pool_ref[...], mel,
                       preferred_element_type=jnp.float32)          # [BP, MEL_PAD] time-mean

    # ---- encoder ----
    x = poses_ref[...]                                              # [BP, T*P]
    h = jnp.maximum(
        jnp.dot(x, w_enc1_ref[...], preferred_element_type=jnp.float32) + b_enc1_ref[...],
        0.0)                                                        # [BP, HIDDEN]
    mu = jnp.dot(h, w_mu_ref[...], preferred_element_type=jnp.float32) + b_mu_ref[...]
    lv = jnp.dot(h, w_lv_ref[...], preferred_element_type=jnp.float32) + b_lv_ref[...]

    # ---- audio conditioning + reparameterization ----
    a = jnp.maximum(
        jnp.dot(mel_feat, w_aud_ref[...], preferred_element_type=jnp.float32) + b_aud_ref[...],
        0.0)                                                        # [BP, HIDDEN]
    z = mu + jnp.exp(0.5 * lv) * eps_ref[...]                       # padded lanes stay 0

    # ---- decoder (split-weight form of concat([z, a], -1) @ W_dec1) ----
    h2 = (jnp.dot(z, w_dec1z_ref[...], preferred_element_type=jnp.float32)
          + jnp.dot(a, w_dec1a_ref[...], preferred_element_type=jnp.float32)
          + b_dec1_ref[...])
    h2 = jnp.maximum(h2, 0.0)
    pred = jnp.dot(h2, w_dec2_ref[...], preferred_element_type=jnp.float32) + b_dec2_ref[...]

    pred_ref[...] = pred
    mu_ref[...] = mu
    lv_ref[...] = lv

    # ---- fused loss reductions (mask padded batch rows; padded lanes contribute 0) ----
    rmask_out = (jax.lax.broadcasted_iota(jnp.int32, pred.shape, 0) < B).astype(jnp.float32)
    rmask_code = (jax.lax.broadcasted_iota(jnp.int32, mu.shape, 0) < B).astype(jnp.float32)
    l1_sum = jnp.sum(jnp.abs(pred - x) * rmask_out)
    kl_sum = jnp.sum((-lv + mu * mu + jnp.exp(lv) - 1.0) * rmask_code)
    l1_ref[...] = jnp.zeros_like(l1_ref) + l1_sum
    kl_ref[...] = jnp.zeros_like(kl_ref) + kl_sum


def fused_forward(frames_p, consts, poses_p, eps_p, params):
    return pl.pallas_call(
        _fused_kernel,
        out_shape=(
            jax.ShapeDtypeStruct((BP, T * P), jnp.float32),      # poses_pred (padded)
            jax.ShapeDtypeStruct((BP, CODE_PAD), jnp.float32),   # mu (padded)
            jax.ShapeDtypeStruct((BP, CODE_PAD), jnp.float32),   # logvar (padded)
            jax.ShapeDtypeStruct((1, 1), jnp.float32),           # sum |pred - gt|
            jax.ShapeDtypeStruct((1, 1), jnp.float32),           # sum KL integrand
        ),
        # no grid / specs: single invocation, every operand is one full resident VMEM block
    )(frames_p, consts["dft"], consts["fb"], consts["pool"], poses_p, eps_p,
      params["w_enc1"], params["b_enc1"], params["w_mu"], params["b_mu"],
      params["w_lv"], params["b_lv"], params["w_aud"], params["b_aud"],
      params["w_dec1z"], params["w_dec1a"], params["b_dec1"],
      params["w_dec2"], params["b_dec2"])


# ----------------------------- mel constants (torchaudio semantics, pre-padded) -----------------------------
def _hz_to_mel(f):  # HTK scale (torchaudio default mel_scale="htk")
    return 2595.0 * np.log10(1.0 + f / 700.0)


def _mel_to_hz(m):
    return 700.0 * (10.0 ** (m / 2595.0) - 1.0)


def build_constants():
    # zero-padded periodic Hann window (win_length -> n_fft, centered)
    n = np.arange(WIN_LENGTH)
    hann = 0.5 - 0.5 * np.cos(2.0 * np.pi * n / WIN_LENGTH)
    pad_l = (N_FFT - WIN_LENGTH) // 2
    window = np.zeros(N_FFT, np.float64)
    window[pad_l:pad_l + WIN_LENGTH] = hann

    # real DFT matrices, window pre-multiplied, cos / -sin packed side-by-side
    k = np.arange(N_FFT)[:, None]
    f = np.arange(N_FREQS)[None, :]
    ang = 2.0 * np.pi * k * f / N_FFT
    dft = np.zeros((N_FFT, 2 * FREQ_PAD), np.float64)
    dft[:, :N_FREQS] = np.cos(ang)
    dft[:, FREQ_PAD:FREQ_PAD + N_FREQS] = -np.sin(ang)
    dft *= window[:, None]

    # triangular mel filterbank (norm=None), pre-padded [FREQ_PAD, MEL_PAD]
    all_freqs = np.linspace(0.0, SR / 2.0, N_FREQS)
    m_pts = np.linspace(_hz_to_mel(F_MIN), _hz_to_mel(F_MAX), N_MELS + 2)
    f_pts = _mel_to_hz(m_pts)
    f_diff = f_pts[1:] - f_pts[:-1]
    slopes = f_pts[None, :] - all_freqs[:, None]
    down = -slopes[:, :-2] / f_diff[:-1]
    up = slopes[:, 2:] / f_diff[1:]
    fb = np.maximum(0.0, np.minimum(down, up))
    fb_p = np.zeros((FREQ_PAD, MEL_PAD), np.float32)
    fb_p[:N_FREQS, :N_MELS] = fb

    # per-batch time-mean pooling matrix [BP, R_PAD]
    pool = np.zeros((BP, R_PAD), np.float32)
    for b in range(B):
        pool[b, b * N_TIME:(b + 1) * N_TIME] = 1.0 / N_TIME

    return {
        "dft": jnp.asarray(dft, jnp.float32),
        "fb": jnp.asarray(fb_p, jnp.float32),
        "pool": jnp.asarray(pool, jnp.float32),
    }


# ----------------------------- synthetic VAE params (pre-padded, lane-aligned) -----------------------------
def _init_linear(key, fan_in, fan_out):
    kw, kb = jax.random.split(key)
    w = jax.random.normal(kw, (fan_in, fan_out), jnp.float32) / np.sqrt(fan_in)
    b = jax.random.normal(kb, (fan_out,), jnp.float32) * 0.01
    return w, b


def _pad_to(x, rows, cols):
    return jnp.pad(x, ((0, rows - x.shape[0]), (0, cols - x.shape[1])))


def init_params(key):
    keys = jax.random.split(key, 5)
    enc1_w, enc1_b = _init_linear(keys[0], T * P, HIDDEN)                 # [512,128]
    enc2_w, enc2_b = _init_linear(keys[1], HIDDEN, 2 * CODE_DIM)          # [128, 64]
    aud_w, aud_b = _init_linear(keys[2], N_MELS, HIDDEN)                  # [ 80,128]
    dec1_w, dec1_b = _init_linear(keys[3], CODE_DIM + HIDDEN, HIDDEN)     # [160,128]
    dec2_w, dec2_b = _init_linear(keys[4], HIDDEN, T * P)                 # [128,512]

    return {
        "w_enc1": enc1_w,
        "b_enc1": enc1_b.reshape(1, -1),
        # mu / logvar heads as separate lane-aligned weight blocks (no in-kernel slicing)
        "w_mu": _pad_to(enc2_w[:, :CODE_DIM], HIDDEN, CODE_PAD),
        "b_mu": _pad_to(enc2_b[:CODE_DIM].reshape(1, -1), 1, CODE_PAD),
        "w_lv": _pad_to(enc2_w[:, CODE_DIM:], HIDDEN, CODE_PAD),
        "b_lv": _pad_to(enc2_b[CODE_DIM:].reshape(1, -1), 1, CODE_PAD),
        "w_aud": _pad_to(aud_w, MEL_PAD, HIDDEN),
        "b_aud": aud_b.reshape(1, -1),
        # decoder first layer split into z-part and audio-part (replaces concat)
        "w_dec1z": _pad_to(dec1_w[:CODE_DIM, :], CODE_PAD, HIDDEN),
        "w_dec1a": dec1_w[CODE_DIM:, :],
        "b_dec1": dec1_b.reshape(1, -1),
        "w_dec2": dec2_w,
        "b_dec2": dec2_b.reshape(1, -1),
    }


# ----------------------------- XLA glue: STFT framing -----------------------------
def compute_frames(audio):
    """audio:[B, L] -> windowless frame matrix [R_PAD, n_fft] (window folded into DFT matrix)."""
    pad = N_FFT // 2
    padded = jnp.pad(audio.astype(jnp.float32), ((0, 0), (pad, pad)), mode="reflect")
    idx = jnp.arange(N_TIME)[:, None] * HOP_LENGTH + jnp.arange(N_FFT)[None, :]
    frames = padded[:, idx].reshape(R_ROWS, N_FFT)
    return jnp.pad(frames, ((0, R_PAD - R_ROWS), (0, 0)))


# ----------------------------- Pose2Pose forward (return_loss=True branch) -----------------------------
def pose2pose_forward(batch, params, consts, eps):
    audio = batch["audio"]
    poses_gt_batch = batch["poses"]

    frames_p = compute_frames(audio)
    poses_p = jnp.pad(poses_gt_batch.reshape(B, T * P).astype(jnp.float32),
                      ((0, BP - B), (0, 0)))
    eps_p = jnp.pad(eps.astype(jnp.float32),
                    ((0, BP - B), (0, CODE_PAD - CODE_DIM)))

    pred_p, mu_p, lv_p, l1_sum, kl_sum = fused_forward(frames_p, consts, poses_p, eps_p, params)

    poses_pred_batch = pred_p[:B].reshape(B, T, P)
    mu = mu_p[:B, :CODE_DIM]
    logvar = lv_p[:B, :CODE_DIM]

    # reg_loss = mean(L1(pred, gt) * LAMBDA_REG)
    reg_loss = (l1_sum[0, 0] / (B * T * P)) * LAMBDA_REG
    # kl_loss = 0.5 * mean(-logvar + mu^2 + exp(logvar) - 1) * LAMBDA_KL
    kl_loss = 0.5 * (kl_sum[0, 0] / (B * CODE_DIM)) * LAMBDA_KL
    loss = reg_loss + kl_loss

    losses_dict = {"reg_loss": reg_loss, "kl_loss": kl_loss, "loss": loss}
    results_dict = {
        "poses_pred_batch": poses_pred_batch,
        "poses_gt_batch": poses_gt_batch,
        "clip_code_mu": mu,
        "clip_code_logvar": logvar,
    }
    return losses_dict, results_dict


# ----------------------------- main -----------------------------
if __name__ == "__main__":
    key = jax.random.PRNGKey(0)
    k_audio, k_poses, k_eps, k_params = jax.random.split(key, 4)

    batch = {
        "audio": jax.random.normal(k_audio, (B, AUDIO_LEN), jnp.float32) * 0.1,
        "poses": jax.random.normal(k_poses, (B, T, P), jnp.float32),
        "num_frames": jnp.full((B,), T, jnp.int32),
    }
    params = init_params(k_params)
    consts = build_constants()
    eps = jax.random.normal(k_eps, (B, CODE_DIM), jnp.float32)

    forward = jax.jit(pose2pose_forward)
    losses_dict, results_dict = forward(batch, params, consts, eps)
    jax.block_until_ready(losses_dict["loss"])
    jax.block_until_ready(results_dict["poses_pred_batch"])
    print("KERNEL_OK")
</pallas_src>

<mosaic_0001>
module attributes {stable_mosaic.version = 11 : i64} {
  func.func @_fused_kernel(%arg0: memref<128x512xf32, #tpu.memory_space<vmem>>, %arg1: memref<512x768xf32, #tpu.memory_space<vmem>>, %arg2: memref<384x128xf32, #tpu.memory_space<vmem>>, %arg3: memref<8x128xf32, #tpu.memory_space<vmem>>, %arg4: memref<8x512xf32, #tpu.memory_space<vmem>>, %arg5: memref<8x128xf32, #tpu.memory_space<vmem>>, %arg6: memref<512x128xf32, #tpu.memory_space<vmem>>, %arg7: memref<1x128xf32, #tpu.memory_space<vmem>>, %arg8: memref<128x128xf32, #tpu.memory_space<vmem>>, %arg9: memref<1x128xf32, #tpu.memory_space<vmem>>, %arg10: memref<128x128xf32, #tpu.memory_space<vmem>>, %arg11: memref<1x128xf32, #tpu.memory_space<vmem>>, %arg12: memref<128x128xf32, #tpu.memory_space<vmem>>, %arg13: memref<1x128xf32, #tpu.memory_space<vmem>>, %arg14: memref<128x128xf32, #tpu.memory_space<vmem>>, %arg15: memref<128x128xf32, #tpu.memory_space<vmem>>, %arg16: memref<1x128xf32, #tpu.memory_space<vmem>>, %arg17: memref<128x512xf32, #tpu.memory_space<vmem>>, %arg18: memref<1x512xf32, #tpu.memory_space<vmem>>, %arg19: memref<8x512xf32, #tpu.memory_space<vmem>>, %arg20: memref<8x128xf32, #tpu.memory_space<vmem>>, %arg21: memref<8x128xf32, #tpu.memory_space<vmem>>, %arg22: memref<1x1xf32, #tpu.memory_space<vmem>>, %arg23: memref<1x1xf32, #tpu.memory_space<vmem>>) attributes {dimension_semantics = [], scalar_prefetch = 0 : i64, scratch_operands = 0 : i64, tpu.core_type = #tpu.core_type<tc>} {
    %c0 = arith.constant 0 : index
    %c0_0 = arith.constant 0 : index
    %0 = vector.load %arg0[%c0, %c0_0] : memref<128x512xf32, #tpu.memory_space<vmem>>, vector<128x512xf32>
    %c0_1 = arith.constant 0 : index
    %c0_2 = arith.constant 0 : index
    %1 = vector.load %arg1[%c0_1, %c0_2] : memref<512x768xf32, #tpu.memory_space<vmem>>, vector<512x768xf32>
    %cst = arith.constant dense<0.000000e+00> : vector<128x768xf32>
    %2 = tpu.matmul %0, %1, %cst {dimension_numbers = #tpu.dot_dimension_numbers<[1], [0], [0], [1], [0, 0, 1, 1], [], []>} : vector<128x512xf32>, vector<512x768xf32>, vector<128x768xf32> -> vector<128x768xf32>
    %3 = vector.extract_strided_slice %2 {offsets = [0, 0], sizes = [128, 384], strides = [1, 1]} : vector<128x768xf32> to vector<128x384xf32>
    %4 = vector.extract_strided_slice %2 {offsets = [0, 384], sizes = [128, 384], strides = [1, 1]} : vector<128x768xf32> to vector<128x384xf32>
    %5 = arith.mulf %3, %3 : vector<128x384xf32>
    %6 = arith.mulf %4, %4 : vector<128x384xf32>
    %7 = arith.addf %5, %6 : vector<128x384xf32>
    %c0_3 = arith.constant 0 : index
    %c0_4 = arith.constant 0 : index
    %8 = vector.load %arg2[%c0_3, %c0_4] : memref<384x128xf32, #tpu.memory_space<vmem>>, vector<384x128xf32>
    %cst_5 = arith.constant dense<0.000000e+00> : vector<128x128xf32>
    %9 = tpu.matmul %7, %8, %cst_5 {dimension_numbers = #tpu.dot_dimension_numbers<[1], [0], [0], [1], [0, 0, 1, 1], [], []>} : vector<128x384xf32>, vector<384x128xf32>, vector<128x128xf32> -> vector<128x128xf32>
    %c0_6 = arith.constant 0 : index
    %c0_7 = arith.constant 0 : index
    %10 = vector.load %arg3[%c0_6, %c0_7] : memref<8x128xf32, #tpu.memory_space<vmem>>, vector<8x128xf32>
    %cst_8 = arith.constant dense<0.000000e+00> : vector<8x128xf32>
    %11 = tpu.matmul %10, %9, %cst_8 {dimension_numbers = #tpu.dot_dimension_numbers<[1], [0], [0], [1], [0, 0, 1, 1], [], []>} : vector<8x128xf32>, vector<128x128xf32>, vector<8x128xf32> -> vector<8x128xf32>
    %c0_9 = arith.constant 0 : index
    %c0_10 = arith.constant 0 : index
    %12 = vector.load %arg4[%c0_9, %c0_10] : memref<8x512xf32, #tpu.memory_space<vmem>>, vector<8x512xf32>
    %c0_11 = arith.constant 0 : index
    %c0_12 = arith.constant 0 : index
    %13 = vector.load %arg6[%c0_11, %c0_12] : memref<512x128xf32, #tpu.memory_space<vmem>>, vector<512x128xf32>
    %cst_13 = arith.constant dense<0.000000e+00> : vector<8x128xf32>
    %14 = tpu.matmul %12, %13, %cst_13 {dimension_numbers = #tpu.dot_dimension_numbers<[1], [0], [0], [1], [0, 0, 1, 1], [], []>} : vector<8x512xf32>, vector<512x128xf32>, vector<8x128xf32> -> vector<8x128xf32>
    %c0_14 = arith.constant 0 : index
    %c0_15 = arith.constant 0 : index
    %15 = vector.load %arg7[%c0_14, %c0_15] : memref<1x128xf32, #tpu.memory_space<vmem>>, vector<1x128xf32>
    %16 = vector.broadcast %15 : vector<1x128xf32> to vector<8x128xf32>
    %17 = arith.addf %14, %16 : vector<8x128xf32>
    %cst_16 = arith.constant 0.000000e+00 : f32
    %18 = vector.broadcast %cst_16 : f32 to vector<8x128xf32>
    %19 = arith.maximumf %17, %18 : vector<8x128xf32>
    %c0_17 = arith.constant 0 : index
    %c0_18 = arith.constant 0 : index
    %20 = vector.load %arg8[%c0_17, %c0_18] : memref<128x128xf32, #tpu.memory_space<vmem>>, vector<128x128xf32>
    %cst_19 = arith.constant dense<0.000000e+00> : vector<8x128xf32>
    %21 = tpu.matmul %19, %20, %cst_19 {dimension_numbers = #tpu.dot_dimension_numbers<[1], [0], [0], [1], [0, 0, 1, 1], [], []>} : vector<8x128xf32>, vector<128x128xf32>, vector<8x128xf32> -> vector<8x128xf32>
    %c0_20 = arith.constant 0 : index
    %c0_21 = arith.constant 0 : index
    %22 = vector.load %arg9[%c0_20, %c0_21] : memref<1x128xf32, #tpu.memory_space<vmem>>, vector<1x128xf32>
    %23 = vector.broadcast %22 : vector<1x128xf32> to vector<8x128xf32>
    %24 = arith.addf %21, %23 : vector<8x128xf32>
    %c0_22 = arith.constant 0 : index
    %c0_23 = arith.constant 0 : index
    %25 = vector.load %arg10[%c0_22, %c0_23] : memref<128x128xf32, #tpu.memory_space<vmem>>, vector<128x128xf32>
    %cst_24 = arith.constant dense<0.000000e+00> : vector<8x128xf32>
    %26 = tpu.matmul %19, %25, %cst_24 {dimension_numbers = #tpu.dot_dimension_numbers<[1], [0], [0], [1], [0, 0, 1, 1], [], []>} : vector<8x128xf32>, vector<128x128xf32>, vector<8x128xf32> -> vector<8x128xf32>
    %c0_25 = arith.constant 0 : index
    %c0_26 = arith.constant 0 : index
    %27 = vector.load %arg11[%c0_25, %c0_26] : memref<1x128xf32, #tpu.memory_space<vmem>>, vector<1x128xf32>
    %28 = vector.broadcast %27 : vector<1x128xf32> to vector<8x128xf32>
    %29 = arith.addf %26, %28 : vector<8x128xf32>
    %c0_27 = arith.constant 0 : index
    %c0_28 = arith.constant 0 : index
    %30 = vector.load %arg12[%c0_27, %c0_28] : memref<128x128xf32, #tpu.memory_space<vmem>>, vector<128x128xf32>
    %cst_29 = arith.constant dense<0.000000e+00> : vector<8x128xf32>
    %31 = tpu.matmul %11, %30, %cst_29 {dimension_numbers = #tpu.dot_dimension_numbers<[1], [0], [0], [1], [0, 0, 1, 1], [], []>} : vector<8x128xf32>, vector<128x128xf32>, vector<8x128xf32> -> vector<8x128xf32>
    %c0_30 = arith.constant 0 : index
    %c0_31 = arith.constant 0 : index
    %32 = vector.load %arg13[%c0_30, %c0_31] : memref<1x128xf32, #tpu.memory_space<vmem>>, vector<1x128xf32>
    %33 = vector.broadcast %32 : vector<1x128xf32> to vector<8x128xf32>
    %34 = arith.addf %31, %33 : vector<8x128xf32>
    %cst_32 = arith.constant 0.000000e+00 : f32
    %35 = vector.broadcast %cst_32 : f32 to vector<8x128xf32>
    %36 = arith.maximumf %34, %35 : vector<8x128xf32>
    %cst_33 = arith.constant 5.000000e-01 : f32
    %37 = vector.broadcast %cst_33 : f32 to vector<8x128xf32>
    %38 = arith.mulf %37, %29 : vector<8x128xf32>
    %39 = math.exp %38 : vector<8x128xf32>
    %c0_34 = arith.constant 0 : index
    %c0_35 = arith.constant 0 : index
    %40 = vector.load %arg5[%c0_34, %c0_35] : memref<8x128xf32, #tpu.memory_space<vmem>>, vector<8x128xf32>
    %41 = arith.mulf %39, %40 : vector<8x128xf32>
    %42 = arith.addf %24, %41 : vector<8x128xf32>
    %c0_36 = arith.constant 0 : index
    %c0_37 = arith.constant 0 : index
    %43 = vector.load %arg14[%c0_36, %c0_37] : memref<128x128xf32, #tpu.memory_space<vmem>>, vector<128x128xf32>
    %cst_38 = arith.constant dense<0.000000e+00> : vector<8x128xf32>
    %44 = tpu.matmul %42, %43, %cst_38 {dimension_numbers = #tpu.dot_dimension_numbers<[1], [0], [0], [1], [0, 0, 1, 1], [], []>} : vector<8x128xf32>, vector<128x128xf32>, vector<8x128xf32> -> vector<8x128xf32>
    %c0_39 = arith.constant 0 : index
    %c0_40 = arith.constant 0 : index
    %45 = vector.load %arg15[%c0_39, %c0_40] : memref<128x128xf32, #tpu.memory_space<vmem>>, vector<128x128xf32>
    %cst_41 = arith.constant dense<0.000000e+00> : vector<8x128xf32>
    %46 = tpu.matmul %36, %45, %cst_41 {dimension_numbers = #tpu.dot_dimension_numbers<[1], [0], [0], [1], [0, 0, 1, 1], [], []>} : vector<8x128xf32>, vector<128x128xf32>, vector<8x128xf32> -> vector<8x128xf32>
    %47 = arith.addf %44, %46 : vector<8x128xf32>
    %c0_42 = arith.constant 0 : index
    %c0_43 = arith.constant 0 : index
    %48 = vector.load %arg16[%c0_42, %c0_43] : memref<1x128xf32, #tpu.memory_space<vmem>>, vector<1x128xf32>
    %49 = vector.broadcast %48 : vector<1x128xf32> to vector<8x128xf32>
    %50 = arith.addf %47, %49 : vector<8x128xf32>
    %cst_44 = arith.constant 0.000000e+00 : f32
    %51 = vector.broadcast %cst_44 : f32 to vector<8x128xf32>
    %52 = arith.maximumf %50, %51 : vector<8x128xf32>
    %c0_45 = arith.constant 0 : index
    %c0_46 = arith.constant 0 : index
    %53 = vector.load %arg17[%c0_45, %c0_46] : memref<128x512xf32, #tpu.memory_space<vmem>>, vector<128x512xf32>
    %cst_47 = arith.constant dense<0.000000e+00> : vector<8x512xf32>
    %54 = tpu.matmul %52, %53, %cst_47 {dimension_numbers = #tpu.dot_dimension_numbers<[1], [0], [0], [1], [0, 0, 1, 1], [], []>} : vector<8x128xf32>, vector<128x512xf32>, vector<8x512xf32> -> vector<8x512xf32>
    %c0_48 = arith.constant 0 : index
    %c0_49 = arith.constant 0 : index
    %55 = vector.load %arg18[%c0_48, %c0_49] : memref<1x512xf32, #tpu.memory_space<vmem>>, vector<1x512xf32>
    %56 = vector.broadcast %55 : vector<1x512xf32> to vector<8x512xf32>
    %57 = arith.addf %54, %56 : vector<8x512xf32>
    %c0_50 = arith.constant 0 : index
    %c0_51 = arith.constant 0 : index
    %58 = vector.load %arg19[%c0_50, %c0_51] : memref<8x512xf32, #tpu.memory_space<vmem>>, vector<8x512xf32>
    tpu.vector_store %arg19[%c0_50, %c0_51], %57 {strides = array<i32>} : memref<8x512xf32, #tpu.memory_space<vmem>>, vector<8x512xf32>,
    %c0_52 = arith.constant 0 : index
    %c0_53 = arith.constant 0 : index
    %59 = vector.load %arg20[%c0_52, %c0_53] : memref<8x128xf32, #tpu.memory_space<vmem>>, vector<8x128xf32>
    tpu.vector_store %arg20[%c0_52, %c0_53], %24 {strides = array<i32>} : memref<8x128xf32, #tpu.memory_space<vmem>>, vector<8x128xf32>,
    %c0_54 = arith.constant 0 : index
    %c0_55 = arith.constant 0 : index
    %60 = vector.load %arg21[%c0_54, %c0_55] : memref<8x128xf32, #tpu.memory_space<vmem>>, vector<8x128xf32>
    tpu.vector_store %arg21[%c0_54, %c0_55], %29 {strides = array<i32>} : memref<8x128xf32, #tpu.memory_space<vmem>>, vector<8x128xf32>,
    %61 = tpu.iota {dimensions = array<i32: 0>} : vector<8x512xi32>
    %c2_i32 = arith.constant 2 : i32
    %62 = vector.broadcast %c2_i32 : i32 to vector<8x512xi32>
    %63 = arith.cmpi slt, %61, %62 : vector<8x512xi32>
    %64 = arith.extui %63 : vector<8x512xi1> to vector<8x512xi32>
    %65 = arith.sitofp %64 : vector<8x512xi32> to vector<8x512xf32>
    %66 = tpu.iota {dimensions = array<i32: 0>} : vector<8x128xi32>
    %c2_i32_56 = arith.constant 2 : i32
    %67 = vector.broadcast %c2_i32_56 : i32 to vector<8x128xi32>
    %68 = arith.cmpi slt, %66, %67 : vector<8x128xi32>
    %69 = arith.extui %68 : vector<8x128xi1> to vector<8x128xi32>
    %70 = arith.sitofp %69 : vector<8x128xi32> to vector<8x128xf32>
    %71 = arith.subf %57, %12 : vector<8x512xf32>
    %72 = math.absf %71 : vector<8x512xf32>
    %73 = arith.mulf %72, %65 : vector<8x512xf32>
    %74 = vector.shape_cast %73 : vector<8x512xf32> to vector<1x8x512xf32>
    %cst_57 = arith.constant dense<0.000000e+00> : vector<1xf32>
    %75 = vector.multi_reduction <add>, %74, %cst_57 [1, 2] : vector<1x8x512xf32> to vector<1xf32>
    %76 = vector.shape_cast %75 : vector<1xf32> to vector<1x1x1xf32>
    %77 = vector.extract %76[0, 0, 0] : f32 from vector<1x1x1xf32>
    %cst_58 = arith.constant 0.000000e+00 : f32
    %78 = vector.broadcast %cst_58 : f32 to vector<8x128xf32>
    %79 = arith.subf %78, %29 : vector<8x128xf32>
    %80 = arith.mulf %24, %24 : vector<8x128xf32>
    %81 = arith.addf %79, %80 : vector<8x128xf32>
    %82 = math.exp %29 : vector<8x128xf32>
    %83 = arith.addf %81, %82 : vector<8x128xf32>
    %cst_59 = arith.constant 1.000000e+00 : f32
    %84 = vector.broadcast %cst_59 : f32 to vector<8x128xf32>
    %85 = arith.subf %83, %84 : vector<8x128xf32>
    %86 = arith.mulf %85, %70 : vector<8x128xf32>
    %87 = vector.shape_cast %86 : vector<8x128xf32> to vector<1x8x128xf32>
    %cst_60 = arith.constant dense<0.000000e+00> : vector<1xf32>
    %88 = vector.multi_reduction <add>, %87, %cst_60 [1, 2] : vector<1x8x128xf32> to vector<1xf32>
    %89 = vector.shape_cast %88 : vector<1xf32> to vector<1x1x1xf32>
    %90 = vector.extract %89[0, 0, 0] : f32 from vector<1x1x1xf32>
    %cst_61 = arith.constant 0.000000e+00 : f32
    %91 = vector.broadcast %cst_61 : f32 to vector<1x1xf32>
    %92 = vector.broadcast %77 : f32 to vector<1x1xf32>
    %93 = arith.addf %91, %92 : vector<1x1xf32>
    %c0_62 = arith.constant 0 : index
    %c0_63 = arith.constant 0 : index
    %94 = vector.load %arg22[%c0_62, %c0_63] : memref<1x1xf32, #tpu.memory_space<vmem>>, vector<1x1xf32>
    tpu.vector_store %arg22[%c0_62, %c0_63], %93 {strides = array<i32>} : memref<1x1xf32, #tpu.memory_space<vmem>>, vector<1x1xf32>,
    %cst_64 = arith.constant 0.000000e+00 : f32
    %95 = vector.broadcast %cst_64 : f32 to vector<1x1xf32>
    %96 = vector.broadcast %90 : f32 to vector<1x1xf32>
    %97 = arith.addf %95, %96 : vector<1x1xf32>
    %c0_65 = arith.constant 0 : index
    %c0_66 = arith.constant 0 : index
    %98 = vector.load %arg23[%c0_65, %c0_66] : memref<1x1xf32, #tpu.memory_space<vmem>>, vector<1x1xf32>
    tpu.vector_store %arg23[%c0_65, %c0_66], %97 {strides = array<i32>} : memref<1x1xf32, #tpu.memory_space<vmem>>, vector<1x1xf32>,
    return
  }
}

</mosaic_0001>

<bundles_post_ra>
// kernel: pose2pose_forward.1
= control target key start
LH: loop header
LB: loop body
LE: loop exit
PB: predicated region body
PF: predicated region fallthrough
CT: control target
= control target key end

     0   :  { %s7397_s0 = inlined_call_operand.vmem [shape: f32[128,512], index: 0, kind: input, shape index: {}]   ;;  %s7398_s1 = inlined_call_operand.vmem [shape: f32[512,768], index: 1, kind: input, shape index: {}]   ;;  %s7399_s2 = inlined_call_operand.vmem [shape: f32[384,128], index: 2, kind: input, shape index: {}]   ;;  %s7400_s3 = inlined_call_operand.vmem [shape: f32[8,128], index: 3, kind: input, shape index: {}]   ;;  %s7401_s4 = inlined_call_operand.vmem [shape: f32[8,512], index: 4, kind: input, shape index: {}]   ;;  %s7402_s5 = inlined_call_operand.vmem [shape: f32[8,128], index: 5, kind: input, shape index: {}]   ;;  %s7403_s6 = inlined_call_operand.vmem [shape: f32[512,128], index: 6, kind: input, shape index: {}]   ;;  %s7404_s7 = inlined_call_operand.vmem [shape: f32[1,128], index: 7, kind: input, shape index: {}]   ;;  %s7405_s8 = inlined_call_operand.vmem [shape: f32[128,128], index: 8, kind: input, shape index: {}]   ;;  %s7406_s9 = inlined_call_operand.vmem [shape: f32[1,128], index: 9, kind: input, shape index: {}]   ;;  %s7407_s10 = inlined_call_operand.vmem [shape: f32[128,128], index: 10, kind: input, shape index: {}]   ;;  %s7408_s11 = inlined_call_operand.vmem [shape: f32[1,128], index: 11, kind: input, shape index: {}]   ;;  %s7409_s12 = inlined_call_operand.vmem [shape: f32[128,128], index: 12, kind: input, shape index: {}]   ;;  %s7410_s13 = inlined_call_operand.vmem [shape: f32[1,128], index: 13, kind: input, shape index: {}]   ;;  %s7411_s14 = inlined_call_operand.vmem [shape: f32[128,128], index: 14, kind: input, shape index: {}]   ;;  %s7412_s15 = inlined_call_operand.vmem [shape: f32[128,128], index: 15, kind: input, shape index: {}]   ;;  %s7413_s16 = inlined_call_operand.vmem [shape: f32[1,128], index: 16, kind: input, shape index: {}]   ;;  %s7414_s17 = inlined_call_operand.vmem [shape: f32[128,512], index: 17, kind: input, shape index: {}]   ;;  %s7415_s18 = inlined_call_operand.vmem [shape: f32[1,512], index: 18, kind: input, shape index: {}]   ;;  %s7416_s19 = inlined_call_operand.vmem [shape: f32[8,512], index: 19, kind: output, shape index: {0}]   ;;  %s7417_s20 = inlined_call_operand.vmem [shape: f32[8,128], index: 20, kind: output, shape index: {1}]   ;;  %s7418_s21 = inlined_call_operand.vmem [shape: f32[8,128], index: 21, kind: output, shape index: {2}]   ;;  %s7419_s22 = inlined_call_operand.hbm [shape: f32[1,1], index: 22, kind: output, shape index: {3}]   ;;  %s7420_s23 = inlined_call_operand.hbm [shape: f32[1,1], index: 23, kind: output, shape index: {4}]  }
   0x1   :  { %7426 = sst [smem:[#allocation8_spill]] %s7397_s0 }
   0x2   :  { %7427 = sst [smem:[#allocation9_spill]] %s7398_s1 }
   0x3   :  { %7428 = sst [smem:[#allocation10_spill]] %s7399_s2 }
   0x4   :  { %7429 = sst [smem:[#allocation11_spill]] %s7400_s3 }
   0x5   :  { %7430 = sst [smem:[#allocation12_spill]] %s7401_s4 }
   0x6   :  { %7431 = sst [smem:[#allocation13_spill]] %s7402_s5 }
   0x7   :  { %7432 = sst [smem:[#allocation14_spill]] %s7403_s6 }
   0x8   :  { %7433 = sst [smem:[#allocation15_spill]] %s7404_s7 }
   0x9   :  { %29 = vsyncpa [#allocation3], 0  ;;  %s7434_s24 = sld [smem:[#allocation9_spill]]  ;;  %s7435_s25 = sld [smem:[#allocation8_spill]] }
   0xf   :  { %v134_v0 = vld [vmem:[%s7434_s24 + $0x8] sm:$0xff]  ;;  %v140_v1 = vld [vmem:[%s7434_s24 + $0x38] sm:$0xff]  ;;  %v133_v5 = vld [vmem:[%s7434_s24] sm:$0xff] }
  0x10   :  { %v136_v2 = vld [vmem:[%s7434_s24 + $0x18] sm:$0xff]  ;;  %v3603_v3 = vpack.c.bf16 %v140_v1, %v134_v0  ;;  %v142_v4 = vld [vmem:[%s7434_s24 + $0x48] sm:$0xff]  ;;  %v139_v6 = vld [vmem:[%s7434_s24 + $0x30] sm:$0xff] }
  0x11   :  { %v3731_v7 = vpack.c.bf16 %v142_v4, %v136_v2  ;;  %v3605_v8 = vpack.c.bf16 %v139_v6, %v133_v5  ;;  %v135_v9 = vld [vmem:[%s7434_s24 + $0x10] sm:$0xff]  ;;  %v141_v10 = vld [vmem:[%s7434_s24 + $0x40] sm:$0xff]  ;;  %v146_v11 = vld [vmem:[%s7434_s24 + $0x68] sm:$0xff] }
  0x12   :  { %3604 = vmatprep.subr.bf16.mxu0 %v3603_v3  ;;  %v3733_v12 = vpack.c.bf16 %v141_v10, %v135_v9  ;;  %v152_v13 = vld [vmem:[%s7434_s24 + $0x98] sm:$0xff]  ;;  %v154_v15 = vld [vmem:[%s7434_s24 + $0xa8] sm:$0xff]  ;;  %v145_v18 = vld [vmem:[%s7434_s24 + $0x60] sm:$0xff] }
  0x13   :  { %v148_v14 = vld [vmem:[%s7434_s24 + $0x78] sm:$0xff]  ;;  %3732 = vmatprep.subr.bf16.mxu1 %v3731_v7  ;;  %3606 = vmatpush1.bf16.msra.mxu0 %v3605_v8  ;;  %v3607_v16 = vpack.c.bf16 %v152_v13, %v146_v11  ;;  %v151_v19 = vld [vmem:[%s7434_s24 + $0x90] sm:$0xff]  ;;  %v153_v22 = vld [vmem:[%s7434_s24 + $0xa0] sm:$0xff] }
  0x14   :  { %v3735_v17 = vpack.c.bf16 %v154_v15, %v148_v14  ;;  %v147_v20 = vld [vmem:[%s7434_s24 + $0x70] sm:$0xff]  ;;  %3734 = vmatpush1.bf16.msra.mxu1 %v3733_v12  ;;  %v3609_v21 = vpack.c.bf16 %v151_v19, %v145_v18  ;;  %v158_v23 = vld [vmem:[%s7434_s24 + $0xc8] sm:$0xff]  ;;  %v164_v24 = vld [vmem:[%s7434_s24 + $0xf8] sm:$0xff] }
  0x15   :  { %3608 = vmatprep.subr.bf16.mxu0 %v3607_v16  ;;  %v3737_v25 = vpack.c.bf16 %v153_v22, %v147_v20  ;;  %v3611_v26 = vpack.c.bf16 %v164_v24, %v158_v23  ;;  %v160_v27 = vld [vmem:[%s7434_s24 + $0xd8] sm:$0xff]  ;;  %v166_v28 = vld [vmem:[%s7434_s24 + $0x108] sm:$0xff]  ;;  %v157_v29 = vld [vmem:[%s7434_s24 + $0xc0] sm:$0xff] }
  0x16   :  { %3736 = vmatprep.subr.bf16.mxu1 %v3735_v17  ;;  %v3739_v30 = vpack.c.bf16 %v166_v28, %v160_v27  ;;  %v163_v31 = vld [vmem:[%s7434_s24 + $0xf0] sm:$0xff]  ;;  %v165_v33 = vld [vmem:[%s7434_s24 + $0x100] sm:$0xff]  ;;  %v170_v35 = vld [vmem:[%s7434_s24 + $0x128] sm:$0xff] }
  0x17   :  { %v159_v32 = vld [vmem:[%s7434_s24 + $0xd0] sm:$0xff]  ;;  %3610 = vmatpush1.bf16.msra.mxu0 %v3609_v21  ;;  %v3613_v34 = vpack.c.bf16 %v163_v31, %v157_v29  ;;  %v176_v36 = vld [vmem:[%s7434_s24 + $0x158] sm:$0xff]  ;;  %v178_v40 = vld [vmem:[%s7434_s24 + $0x168] sm:$0xff] }
  0x18   :  { %v172_v37 = vld [vmem:[%s7434_s24 + $0x138] sm:$0xff]  ;;  %3738 = vmatpush1.bf16.msra.mxu1 %v3737_v25  ;;  %3612 = vmatprep.subr.bf16.mxu0 %v3611_v26  ;;  %v3741_v38 = vpack.c.bf16 %v165_v33, %v159_v32  ;;  %v3615_v39 = vpack.c.bf16 %v176_v36, %v170_v35  ;;  %v169_v41 = vld [vmem:[%s7434_s24 + $0x120] sm:$0xff]  ;;  %v175_v42 = vld [vmem:[%s7434_s24 + $0x150] sm:$0xff] }
  0x19   :  { %3740 = vmatprep.subr.bf16.mxu1 %v3739_v30  ;;  %v3743_v43 = vpack.c.bf16 %v178_v40, %v172_v37  ;;  %v171_v44 = vld [vmem:[%s7434_s24 + $0x130] sm:$0xff]  ;;  %v177_v45 = vld [vmem:[%s7434_s24 + $0x160] sm:$0xff]  ;;  %v182_v46 = vld [vmem:[%s7434_s24 + $0x188] sm:$0xff]  ;;  %v3617_v50 = vpack.c.bf16 %v175_v42, %v169_v41 }
  0x1a   :  { %v188_v47 = vld [vmem:[%s7434_s24 + $0x1b8] sm:$0xff]  ;;  %v190_v49 = vld [vmem:[%s7434_s24 + $0x1c8] sm:$0xff]  ;;  %v3745_v51 = vpack.c.bf16 %v177_v45, %v171_v44  ;;  %v181_v53 = vld [vmem:[%s7434_s24 + $0x180] sm:$0xff] }
  0x1b   :  { %v184_v48 = vld [vmem:[%s7434_s24 + $0x198] sm:$0xff]  ;;  %3614 = vmatpush1.bf16.msra.mxu0 %v3613_v34  ;;  %v3619_v52 = vpack.c.bf16 %v188_v47, %v182_v46  ;;  %v187_v54 = vld [vmem:[%s7434_s24 + $0x1b0] sm:$0xff]  ;;  %v189_v57 = vld [vmem:[%s7434_s24 + $0x1c0] sm:$0xff] }
  0x1c   :  { %3742 = vmatpush1.bf16.msra.mxu1 %v3741_v38  ;;  %3616 = vmatprep.subr.bf16.mxu0 %v3615_v39  ;;  %v183_v55 = vld [vmem:[%s7434_s24 + $0x190] sm:$0xff]  ;;  %v3747_v56 = vpack.c.bf16 %v190_v49, %v184_v48  ;;  %v194_v58 = vld [vmem:[%s7434_s24 + $0x1e8] sm:$0xff]  ;;  %v200_v59 = vld [vmem:[%s7434_s24 + $0x218] sm:$0xff]  ;;  %v3621_v62 = vpack.c.bf16 %v187_v54, %v181_v53 }
  0x1d   :  { %3744 = vmatprep.subr.bf16.mxu1 %v3743_v43  ;;  %v196_v60 = vld [vmem:[%s7434_s24 + $0x1f8] sm:$0xff]  ;;  %v202_v61 = vld [vmem:[%s7434_s24 + $0x228] sm:$0xff]  ;;  %v3749_v63 = vpack.c.bf16 %v189_v57, %v183_v55  ;;  %v3623_v0 = vpack.c.bf16 %v200_v59, %v194_v58  ;;  %v193_v1 = vld [vmem:[%s7434_s24 + $0x1e0] sm:$0xff] }
  0x1e   :  { %v199_v2 = vld [vmem:[%s7434_s24 + $0x210] sm:$0xff]  ;;  %v3751_v4 = vpack.c.bf16 %v202_v61, %v196_v60  ;;  %v201_v5 = vld [vmem:[%s7434_s24 + $0x220] sm:$0xff]  ;;  %v206_v6 = vld [vmem:[%s7434_s24 + $0x248] sm:$0xff] }
  0x1f   :  { %3618 = vmatpush1.bf16.msra.mxu0 %v3617_v50  ;;  %v195_v3 = vld [vmem:[%s7434_s24 + $0x1f0] sm:$0xff]  ;;  %v212_v7 = vld [vmem:[%s7434_s24 + $0x278] sm:$0xff]  ;;  %v214_v9 = vld [vmem:[%s7434_s24 + $0x288] sm:$0xff]  ;;  %v3625_v10 = vpack.c.bf16 %v199_v2, %v193_v1 }
  0x20   :  { %3746 = vmatpush1.bf16.msra.mxu1 %v3745_v51  ;;  %3620 = vmatprep.subr.bf16.mxu0 %v3619_v52  ;;  %v208_v8 = vld [vmem:[%s7434_s24 + $0x258] sm:$0xff]  ;;  %v3753_v11 = vpack.c.bf16 %v201_v5, %v195_v3  ;;  %v3627_v12 = vpack.c.bf16 %v212_v7, %v206_v6  ;;  %v205_v13 = vld [vmem:[%s7434_s24 + $0x240] sm:$0xff]  ;;  %v211_v14 = vld [vmem:[%s7434_s24 + $0x270] sm:$0xff] }
  0x21   :  { %3748 = vmatprep.subr.bf16.mxu1 %v3747_v56  ;;  %v207_v15 = vld [vmem:[%s7434_s24 + $0x250] sm:$0xff]  ;;  %v3755_v16 = vpack.c.bf16 %v214_v9, %v208_v8  ;;  %v213_v17 = vld [vmem:[%s7434_s24 + $0x280] sm:$0xff]  ;;  %v218_v18 = vld [vmem:[%s7434_s24 + $0x2a8] sm:$0xff]  ;;  %v3629_v22 = vpack.c.bf16 %v211_v14, %v205_v13 }
  0x22   :  { %v224_v19 = vld [vmem:[%s7434_s24 + $0x2d8] sm:$0xff]  ;;  %v226_v21 = vld [vmem:[%s7434_s24 + $0x2e8] sm:$0xff]  ;;  %v3757_v23 = vpack.c.bf16 %v213_v17, %v207_v15  ;;  %v217_v25 = vld [vmem:[%s7434_s24 + $0x2a0] sm:$0xff] }
  0x23   :  { %3622 = vmatpush1.bf16.msra.mxu0 %v3621_v62  ;;  %v220_v20 = vld [vmem:[%s7434_s24 + $0x2b8] sm:$0xff]  ;;  %v3631_v24 = vpack.c.bf16 %v224_v19, %v218_v18  ;;  %v223_v26 = vld [vmem:[%s7434_s24 + $0x2d0] sm:$0xff]  ;;  %v225_v29 = vld [vmem:[%s7434_s24 + $0x2e0] sm:$0xff] }
  0x24   :  { %3750 = vmatpush1.bf16.msra.mxu1 %v3749_v63  ;;  %3624 = vmatprep.subr.bf16.mxu0 %v3623_v0  ;;  %v219_v27 = vld [vmem:[%s7434_s24 + $0x2b0] sm:$0xff]  ;;  %v3759_v28 = vpack.c.bf16 %v226_v21, %v220_v20  ;;  %v230_v30 = vld [vmem:[%s7434_s24 + $0x308] sm:$0xff]  ;;  %v236_v31 = vld [vmem:[%s7434_s24 + $0x338] sm:$0xff]  ;;  %v3633_v34 = vpack.c.bf16 %v223_v26, %v217_v25 }
  0x25   :  { %3752 = vmatprep.subr.bf16.mxu1 %v3751_v4  ;;  %v232_v32 = vld [vmem:[%s7434_s24 + $0x318] sm:$0xff]  ;;  %v238_v33 = vld [vmem:[%s7434_s24 + $0x348] sm:$0xff]  ;;  %v3761_v35 = vpack.c.bf16 %v225_v29, %v219_v27  ;;  %v3635_v36 = vpack.c.bf16 %v236_v31, %v230_v30  ;;  %v229_v37 = vld [vmem:[%s7434_s24 + $0x300] sm:$0xff] }
  0x26   :  { %v235_v38 = vld [vmem:[%s7434_s24 + $0x330] sm:$0xff]  ;;  %v3763_v40 = vpack.c.bf16 %v238_v33, %v232_v32  ;;  %v237_v41 = vld [vmem:[%s7434_s24 + $0x340] sm:$0xff]  ;;  %v242_v42 = vld [vmem:[%s7434_s24 + $0x368] sm:$0xff] }
  0x27   :  { %3626 = vmatpush1.bf16.msra.mxu0 %v3625_v10  ;;  %v231_v39 = vld [vmem:[%s7434_s24 + $0x310] sm:$0xff]  ;;  %v248_v43 = vld [vmem:[%s7434_s24 + $0x398] sm:$0xff]  ;;  %v250_v45 = vld [vmem:[%s7434_s24 + $0x3a8] sm:$0xff]  ;;  %v3637_v46 = vpack.c.bf16 %v235_v38, %v229_v37 }
  0x28   :  { %3754 = vmatpush1.bf16.msra.mxu1 %v3753_v11  ;;  %3628 = vmatprep.subr.bf16.mxu0 %v3627_v12  ;;  %v244_v44 = vld [vmem:[%s7434_s24 + $0x378] sm:$0xff]  ;;  %v3765_v47 = vpack.c.bf16 %v237_v41, %v231_v39  ;;  %v3639_v48 = vpack.c.bf16 %v248_v43, %v242_v42  ;;  %v241_v49 = vld [vmem:[%s7434_s24 + $0x360] sm:$0xff]  ;;  %v247_v50 = vld [vmem:[%s7434_s24 + $0x390] sm:$0xff] }
  0x29   :  { %3756 = vmatprep.subr.bf16.mxu1 %v3755_v16  ;;  %v243_v51 = vld [vmem:[%s7434_s24 + $0x370] sm:$0xff]  ;;  %v3767_v52 = vpack.c.bf16 %v250_v45, %v244_v44  ;;  %v249_v53 = vld [vmem:[%s7434_s24 + $0x3a0] sm:$0xff]  ;;  %v254_v54 = vld [vmem:[%s7434_s24 + $0x3c8] sm:$0xff]  ;;  %v3641_v58 = vpack.c.bf16 %v247_v50, %v241_v49 }
  0x2a   :  { %v260_v55 = vld [vmem:[%s7434_s24 + $0x3f8] sm:$0xff]  ;;  %v262_v57 = vld [vmem:[%s7434_s24 + $0x408] sm:$0xff]  ;;  %v3769_v59 = vpack.c.bf16 %v249_v53, %v243_v51  ;;  %v253_v61 = vld [vmem:[%s7434_s24 + $0x3c0] sm:$0xff] }
  0x2b   :  { %3630 = vmatpush1.bf16.msra.mxu0 %v3629_v22  ;;  %v256_v56 = vld [vmem:[%s7434_s24 + $0x3d8] sm:$0xff]  ;;  %v3643_v60 = vpack.c.bf16 %v260_v55, %v254_v54  ;;  %v259_v62 = vld [vmem:[%s7434_s24 + $0x3f0] sm:$0xff]  ;;  %v261_v1 = vld [vmem:[%s7434_s24 + $0x400] sm:$0xff] }
  0x2c   :  { %3758 = vmatpush1.bf16.msra.mxu1 %v3757_v23  ;;  %3632 = vmatprep.subr.bf16.mxu0 %v3631_v24  ;;  %v255_v63 = vld [vmem:[%s7434_s24 + $0x3d0] sm:$0xff]  ;;  %v3771_v0 = vpack.c.bf16 %v262_v57, %v256_v56  ;;  %v266_v2 = vld [vmem:[%s7434_s24 + $0x428] sm:$0xff]  ;;  %v272_v3 = vld [vmem:[%s7434_s24 + $0x458] sm:$0xff]  ;;  %v3645_v6 = vpack.c.bf16 %v259_v62, %v253_v61 }
  0x2d   :  { %3760 = vmatprep.subr.bf16.mxu1 %v3759_v28  ;;  %v268_v4 = vld [vmem:[%s7434_s24 + $0x438] sm:$0xff]  ;;  %v274_v5 = vld [vmem:[%s7434_s24 + $0x468] sm:$0xff]  ;;  %v265_v7 = vld [vmem:[%s7434_s24 + $0x420] sm:$0xff]  ;;  %v3773_v8 = vpack.c.bf16 %v261_v1, %v255_v63  ;;  %v3647_v9 = vpack.c.bf16 %v272_v3, %v266_v2 }
  0x2e   :  { %v271_v10 = vld [vmem:[%s7434_s24 + $0x450] sm:$0xff]  ;;  %v273_v12 = vld [vmem:[%s7434_s24 + $0x460] sm:$0xff]  ;;  %v3775_v13 = vpack.c.bf16 %v274_v5, %v268_v4  ;;  %v278_v14 = vld [vmem:[%s7434_s24 + $0x488] sm:$0xff] }
  0x2f   :  { %3634 = vmatpush1.bf16.msra.mxu0 %v3633_v34  ;;  %v267_v11 = vld [vmem:[%s7434_s24 + $0x430] sm:$0xff]  ;;  %v284_v15 = vld [vmem:[%s7434_s24 + $0x4b8] sm:$0xff]  ;;  %v70_v16 = vld [vmem:[%s7435_s25 + $0x8] sm:$0xff]  ;;  %v3649_v19 = vpack.c.bf16 %v271_v10, %v265_v7 }
  0x30   :  { %3762 = vmatpush1.bf16.msra.mxu1 %v3761_v35  ;;  %3636 = vmatprep.subr.bf16.mxu0 %v3635_v36  ;;  %v280_v17 = vld [vmem:[%s7434_s24 + $0x498] sm:$0xff]  ;;  %v286_v18 = vld [vmem:[%s7434_s24 + $0x4c8] sm:$0xff]  ;;  %v3777_v20 = vpack.c.bf16 %v273_v12, %v267_v11  ;;  %v3651_v21 = vpack.c.bf16 %v284_v15, %v278_v14  ;;  %v277_v22 = vld [vmem:[%s7434_s24 + $0x480] sm:$0xff] }
  0x31   :  { %3764 = vmatprep.subr.bf16.mxu1 %v3763_v40  ;;  %581 = vmatprep.mubr.f32.mxu0 %v70_v16  ;;  %v283_v23 = vld [vmem:[%s7434_s24 + $0x4b0] sm:$0xff]  ;;  %v3779_v25 = vpack.c.bf16 %v286_v18, %v280_v17  ;;  %v285_v26 = vld [vmem:[%s7434_s24 + $0x4c0] sm:$0xff]  ;;  %v290_v27 = vld [vmem:[%s7434_s24 + $0x4e8] sm:$0xff] }
  0x32   :  { %903 = vmatprep.mubr.f32.mxu1 %v70_v16  ;;  %v279_v24 = vld [vmem:[%s7434_s24 + $0x490] sm:$0xff]  ;;  %v296_v28 = vld [vmem:[%s7434_s24 + $0x518] sm:$0xff]  ;;  %v298_v30 = vld [vmem:[%s7434_s24 + $0x528] sm:$0xff]  ;;  %v3653_v31 = vpack.c.bf16 %v283_v23, %v277_v22 }
  0x33   :  { %3638 = vmatpush1.bf16.msra.mxu0 %v3637_v46  ;;  %v292_v29 = vld [vmem:[%s7434_s24 + $0x4f8] sm:$0xff]  ;;  %v3781_v32 = vpack.c.bf16 %v285_v26, %v279_v24  ;;  %v3655_v33 = vpack.c.bf16 %v296_v28, %v290_v27  ;;  %v289_v34 = vld [vmem:[%s7434_s24 + $0x4e0] sm:$0xff]  ;;  %v295_v35 = vld [vmem:[%s7434_s24 + $0x510] sm:$0xff] }
  0x34   :  { %3766 = vmatpush1.bf16.msra.mxu1 %v3765_v47  ;;  %3640 = vmatprep.subr.bf16.mxu0 %v3639_v48  ;;  %v291_v36 = vld [vmem:[%s7434_s24 + $0x4f0] sm:$0xff]  ;;  %v3783_v37 = vpack.c.bf16 %v298_v30, %v292_v29  ;;  %v297_v38 = vld [vmem:[%s7434_s24 + $0x520] sm:$0xff]  ;;  %v302_v39 = vld [vmem:[%s7434_s24 + $0x548] sm:$0xff]  ;;  %v3657_v43 = vpack.c.bf16 %v295_v35, %v289_v34 }
  0x35   :  { %3768 = vmatprep.subr.bf16.mxu1 %v3767_v52  ;;  %v308_v40 = vld [vmem:[%s7434_s24 + $0x578] sm:$0xff]  ;;  %v310_v42 = vld [vmem:[%s7434_s24 + $0x588] sm:$0xff]  ;;  %v3785_v44 = vpack.c.bf16 %v297_v38, %v291_v36  ;;  %v301_v46 = vld [vmem:[%s7434_s24 + $0x540] sm:$0xff] }
  0x36   :  { %v304_v41 = vld [vmem:[%s7434_s24 + $0x558] sm:$0xff]  ;;  %v3659_v45 = vpack.c.bf16 %v308_v40, %v302_v39  ;;  %v307_v47 = vld [vmem:[%s7434_s24 + $0x570] sm:$0xff]  ;;  %v309_v50 = vld [vmem:[%s7434_s24 + $0x580] sm:$0xff] }
  0x37   :  { %3642 = vmatpush1.bf16.msra.mxu0 %v3641_v58  ;;  %v303_v48 = vld [vmem:[%s7434_s24 + $0x550] sm:$0xff]  ;;  %v3787_v49 = vpack.c.bf16 %v310_v42, %v304_v41  ;;  %v314_v51 = vld [vmem:[%s7434_s24 + $0x5a8] sm:$0xff]  ;;  %v320_v52 = vld [vmem:[%s7434_s24 + $0x5d8] sm:$0xff]  ;;  %v3661_v55 = vpack.c.bf16 %v307_v47, %v301_v46 }
  0x38   :  { %3770 = vmatpush1.bf16.msra.mxu1 %v3769_v59  ;;  %3644 = vmatprep.subr.bf16.mxu0 %v3643_v60  ;;  %v316_v53 = vld [vmem:[%s7434_s24 + $0x5b8] sm:$0xff]  ;;  %v322_v54 = vld [vmem:[%s7434_s24 + $0x5e8] sm:$0xff]  ;;  %v3789_v56 = vpack.c.bf16 %v309_v50, %v303_v48  ;;  %v3663_v57 = vpack.c.bf16 %v320_v52, %v314_v51  ;;  %v313_v58 = vld [vmem:[%s7434_s24 + $0x5a0] sm:$0xff] }
  0x39   :  { %3772 = vmatprep.subr.bf16.mxu1 %v3771_v0  ;;  %v319_v59 = vld [vmem:[%s7434_s24 + $0x5d0] sm:$0xff]  ;;  %v3791_v61 = vpack.c.bf16 %v322_v54, %v316_v53  ;;  %v321_v62 = vld [vmem:[%s7434_s24 + $0x5e0] sm:$0xff]  ;;  %v326_v63 = vld [vmem:[%s7434_s24 + $0x608] sm:$0xff] }
  0x3a   :  { %v315_v60 = vld [vmem:[%s7434_s24 + $0x5b0] sm:$0xff]  ;;  %v332_v0 = vld [vmem:[%s7434_s24 + $0x638] sm:$0xff]  ;;  %v334_v2 = vld [vmem:[%s7434_s24 + $0x648] sm:$0xff]  ;;  %v3665_v3 = vpack.c.bf16 %v319_v59, %v313_v58 }
  0x3b   :  { %3646 = vmatpush1.bf16.msra.mxu0 %v3645_v6  ;;  %v328_v1 = vld [vmem:[%s7434_s24 + $0x618] sm:$0xff]  ;;  %v3793_v4 = vpack.c.bf16 %v321_v62, %v315_v60  ;;  %v3667_v5 = vpack.c.bf16 %v332_v0, %v326_v63  ;;  %v325_v6 = vld [vmem:[%s7434_s24 + $0x600] sm:$0xff]  ;;  %v331_v7 = vld [vmem:[%s7434_s24 + $0x630] sm:$0xff] }
  0x3c   :  { %3774 = vmatpush1.bf16.msra.mxu1 %v3773_v8  ;;  %3648 = vmatprep.subr.bf16.mxu0 %v3647_v9  ;;  %v3795_v8 = vpack.c.bf16 %v334_v2, %v328_v1  ;;  %v327_v9 = vld [vmem:[%s7434_s24 + $0x610] sm:$0xff]  ;;  %v333_v10 = vld [vmem:[%s7434_s24 + $0x640] sm:$0xff]  ;;  %v338_v11 = vld [vmem:[%s7434_s24 + $0x668] sm:$0xff]  ;;  %v3669_v14 = vpack.c.bf16 %v331_v7, %v325_v6 }
  0x3d   :  { %3776 = vmatprep.subr.bf16.mxu1 %v3775_v13  ;;  %v344_v12 = vld [vmem:[%s7434_s24 + $0x698] sm:$0xff]  ;;  %v69_v13 = vld [vmem:[%s7435_s25] sm:$0xff]  ;;  %v346_v16 = vld [vmem:[%s7434_s24 + $0x6a8] sm:$0xff]  ;;  %v3797_v17 = vpack.c.bf16 %v333_v10, %v327_v9 }
  0x3e   :  { %v340_v15 = vld [vmem:[%s7434_s24 + $0x678] sm:$0xff]  ;;  %v337_v18 = vld [vmem:[%s7434_s24 + $0x660] sm:$0xff]  ;;  %v339_v22 = vld [vmem:[%s7434_s24 + $0x670] sm:$0xff] }
  0x3f   :  { %3650 = vmatpush1.bf16.msra.mxu0 %v3649_v19  ;;  %v343_v19 = vld [vmem:[%s7434_s24 + $0x690] sm:$0xff]  ;;  %v345_v23 = vld [vmem:[%s7434_s24 + $0x6a0] sm:$0xff]  ;;  %v3799_v24 = vpack.c.bf16 %v346_v16, %v340_v15  ;;  %v356_v26 = vld [vmem:[%s7434_s24 + $0x6f8] sm:$0xff] }
  0x40   :  { %3778 = vmatpush1.bf16.msra.mxu1 %v3777_v20  ;;  %3652 = vmatprep.subr.bf16.mxu0 %v3651_v21  ;;  %v74_v20 = vld [vmem:[%s7435_s25 + $0x28] sm:$0xff]  ;;  %v3671_v21 = vpack.c.bf16 %v344_v12, %v338_v11  ;;  %v73_v27 = vld [vmem:[%s7435_s25 + $0x20] sm:$0xff]  ;;  %v3673_v28 = vpack.c.bf16 %v343_v19, %v337_v18  ;;  %v352_v29 = vld [vmem:[%s7434_s24 + $0x6d8] sm:$0xff] }
  0x41   :  { %3780 = vmatprep.subr.bf16.mxu1 %v3779_v25  ;;  %v350_v25 = vld [vmem:[%s7434_s24 + $0x6c8] sm:$0xff]  ;;  %v351_v36 = vld [vmem:[%s7434_s24 + $0x6d0] sm:$0xff]  ;;  %v368_v40 = vld [vmem:[%s7434_s24 + $0x758] sm:$0xff] }
  0x42   :  { %v358_v30 = vld [vmem:[%s7434_s24 + $0x708] sm:$0xff]  ;;  %v3675_v35 = vpack.c.bf16 %v356_v26, %v350_v25  ;;  %v77_v41 = vld [vmem:[%s7435_s25 + $0x40] sm:$0xff]  ;;  %v367_v47 = vld [vmem:[%s7434_s24 + $0x750] sm:$0xff] }
  0x43   :  { %3654 = vmatpush1.bf16.msra.mxu0 %v3653_v31  ;;  %v3801_v31 = vpack.c.bf16 %v345_v23, %v339_v22  ;;  %v78_v34 = vld [vmem:[%s7435_s25 + $0x48] sm:$0xff]  ;;  %v3803_v38 = vpack.c.bf16 %v358_v30, %v352_v29  ;;  %v361_v46 = vld [vmem:[%s7434_s24 + $0x720] sm:$0xff]  ;;  %v363_v50 = vld [vmem:[%s7434_s24 + $0x730] sm:$0xff] }
  0x44   :  { %3782 = vmatpush1.bf16.msra.mxu1 %v3781_v32  ;;  %3656 = vmatprep.subr.bf16.mxu0 %v3655_v33  ;;  %v349_v32 = vld [vmem:[%s7434_s24 + $0x6c0] sm:$0xff]  ;;  %v355_v33 = vld [vmem:[%s7434_s24 + $0x6f0] sm:$0xff]  ;;  %v362_v39 = vld [vmem:[%s7434_s24 + $0x728] sm:$0xff] }
  0x45   :  { %3784 = vmatprep.subr.bf16.mxu1 %v3783_v37  ;;  %v357_v37 = vld [vmem:[%s7434_s24 + $0x700] sm:$0xff]  ;;  %v3677_v42 = vpack.c.bf16 %v355_v33, %v349_v32  ;;  %v82_v48 = vld [vmem:[%s7435_s25 + $0x68] sm:$0xff]  ;;  %v380_v54 = vld [vmem:[%s7434_s24 + $0x7b8] sm:$0xff] }
  0x46   :  { %v369_v51 = vld [vmem:[%s7434_s24 + $0x760] sm:$0xff]  ;;  %v374_v53 = vld [vmem:[%s7434_s24 + $0x788] sm:$0xff]  ;;  %v375_v0 = vld [vmem:[%s7434_s24 + $0x790] sm:$0xff] }
  0x47   :  { %3658 = vmatpush1.bf16.msra.mxu0 %v3657_v43  ;;  %v364_v43 = vld [vmem:[%s7434_s24 + $0x738] sm:$0xff]  ;;  %v382_v58 = vld [vmem:[%s7434_s24 + $0x7c8] sm:$0xff]  ;;  %v3809_v59 = vpack.c.bf16 %v369_v51, %v363_v50  ;;  %v373_v60 = vld [vmem:[%s7434_s24 + $0x780] sm:$0xff]  ;;  %v3683_v63 = vpack.c.bf16 %v380_v54, %v374_v53 }
  0x48   :  { %3786 = vmatpush1.bf16.msra.mxu1 %v3785_v44  ;;  %3660 = vmatprep.subr.bf16.mxu0 %v3659_v45  ;;  %v370_v44 = vld [vmem:[%s7434_s24 + $0x768] sm:$0xff]  ;;  %v3805_v45 = vpack.c.bf16 %v357_v37, %v351_v36  ;;  %v381_v1 = vld [vmem:[%s7434_s24 + $0x7c0] sm:$0xff]  ;;  %v388_v7 = vld [vmem:[%s7434_s24 + $0x7f8] sm:$0xff] }
  0x49   :  { %3788 = vmatprep.subr.bf16.mxu1 %v3787_v49  ;;  %v3679_v49 = vpack.c.bf16 %v368_v40, %v362_v39  ;;  %v3807_v52 = vpack.c.bf16 %v370_v44, %v364_v43  ;;  %v86_v62 = vld [vmem:[%s7435_s25 + $0x88] sm:$0xff]  ;;  %v3813_v9 = vpack.c.bf16 %v381_v1, %v375_v0  ;;  %v385_v10 = vld [vmem:[%s7434_s24 + $0x7e0] sm:$0xff]  ;;  %v391_v11 = vld [vmem:[%s7434_s24 + $0x810] sm:$0xff] }
  0x4a   :  { %v90_v12 = vld [vmem:[%s7435_s25 + $0xa8] sm:$0xff]  ;;  %v393_v15 = vld [vmem:[%s7434_s24 + $0x820] sm:$0xff]  ;;  %v404_v18 = vld [vmem:[%s7434_s24 + $0x878] sm:$0xff] }
  0x4b   :  { %3662 = vmatpush1.bf16.msra.mxu0 %v3661_v55  ;;  %v81_v55 = vld [vmem:[%s7435_s25 + $0x60] sm:$0xff]  ;;  %v406_v22 = vld [vmem:[%s7434_s24 + $0x888] sm:$0xff]  ;;  %v403_v25 = vld [vmem:[%s7434_s24 + $0x870] sm:$0xff] }
  0x4c   :  { %3790 = vmatpush1.bf16.msra.mxu1 %v3789_v56  ;;  %3664 = vmatprep.subr.bf16.mxu0 %v3663_v57  ;;  %v3681_v56 = vpack.c.bf16 %v367_v47, %v361_v46  ;;  %v376_v57 = vld [vmem:[%s7434_s24 + $0x798] sm:$0xff]  ;;  %v89_v19 = vld [vmem:[%s7435_s25 + $0xa0] sm:$0xff]  ;;  %v5204_v26 = vld [vmem:[%s7435_s25 + $0xc8] sm:$0xff] }
  0x4d   :  { %3792 = vmatprep.subr.bf16.mxu1 %v3791_v61  ;;  %v379_v61 = vld [vmem:[%s7434_s24 + $0x7b0] sm:$0xff]  ;;  %v3811_v2 = vpack.c.bf16 %v382_v58, %v376_v57  ;;  %v405_v29 = vld [vmem:[%s7434_s24 + $0x880] sm:$0xff]  ;;  %v416_v32 = vld [vmem:[%s7434_s24 + $0x8d8] sm:$0xff] }
  0x4e   :  { %v3685_v6 = vpack.c.bf16 %v379_v61, %v373_v60  ;;  %v5221_v33 = vld [vmem:[%s7435_s25 + $0xc0] sm:$0xff]  ;;  %v418_v36 = vld [vmem:[%s7434_s24 + $0x8e8] sm:$0xff]  ;;  %v415_v39 = vld [vmem:[%s7434_s24 + $0x8d0] sm:$0xff] }
  0x4f   :  { %3666 = vmatpush1.bf16.msra.mxu0 %v3665_v3  ;;  %v386_v3 = vld [vmem:[%s7434_s24 + $0x7e8] sm:$0xff]  ;;  %v417_v43 = vld [vmem:[%s7434_s24 + $0x8e0] sm:$0xff]  ;;  %v428_v46 = vld [vmem:[%s7434_s24 + $0x938] sm:$0xff] }
  0x50   :  { %3794 = vmatpush1.bf16.msra.mxu1 %v3793_v4  ;;  %3668 = vmatprep.subr.bf16.mxu0 %v3667_v5  ;;  %v392_v4 = vld [vmem:[%s7434_s24 + $0x818] sm:$0xff]  ;;  %v85_v5 = vld [vmem:[%s7435_s25 + $0x80] sm:$0xff]  ;;  %v5240_v40 = vld [vmem:[%s7435_s25 + $0xe8] sm:$0xff] }
  0x51   :  { %3796 = vmatprep.subr.bf16.mxu1 %v3795_v8  ;;  %v394_v8 = vld [vmem:[%s7434_s24 + $0x828] sm:$0xff]  ;;  %v5259_v47 = vld [vmem:[%s7435_s25 + $0xe0] sm:$0xff]  ;;  %v427_v53 = vld [vmem:[%s7434_s24 + $0x930] sm:$0xff] }
  0x52   :  { %582 = vmatmul.mubr.f32.vlgmr.msra.gmra.mrb[0].mxu0 %v69_v13  ;;  %v3815_v16 = vpack.c.bf16 %v394_v8, %v388_v7  ;;  %v430_v50 = vld [vmem:[%s7434_s24 + $0x948] sm:$0xff]  ;;  %v429_v57 = vld [vmem:[%s7434_s24 + $0x940] sm:$0xff]  ;;  %v440_v60 = vld [vmem:[%s7434_s24 + $0x998] sm:$0xff] }
  0x53   :  { %904 = vmatmul.mubr.f32.vlgmr.msra.gmra.mrb[0].mxu1 %v69_v13  ;;  %3670 = vmatpush1.bf16.msra.mxu0 %v3669_v14  ;;  %v3687_v13 = vpack.c.bf16 %v392_v4, %v386_v3  ;;  %v387_v14 = vld [vmem:[%s7434_s24 + $0x7f0] sm:$0xff]  ;;  %v5278_v54 = vld [vmem:[%s7435_s25 + $0x108] sm:$0xff]  ;;  %v5297_v61 = vld [vmem:[%s7435_s25 + $0x100] sm:$0xff] }
  0x54   :  { %3798 = vmatpush1.bf16.msra.mxu1 %v3797_v17  ;;  %587 = vmatprep.mubr.f32.mxu0 %v74_v20  ;;  %v398_v17 = vld [vmem:[%s7434_s24 + $0x848] sm:$0xff]  ;;  %v3817_v23 = vpack.c.bf16 %v393_v15, %v387_v14  ;;  %v439_v3 = vld [vmem:[%s7434_s24 + $0x990] sm:$0xff]  ;;  %v441_v7 = vld [vmem:[%s7434_s24 + $0x9a0] sm:$0xff] }
  0x55   :  { %909 = vmatprep.mubr.f32.mxu1 %v74_v20  ;;  %3672 = vmatprep.subr.bf16.mxu0 %v3671_v21  ;;  %v3689_v20 = vpack.c.bf16 %v391_v11, %v385_v10  ;;  %v400_v21 = vld [vmem:[%s7434_s24 + $0x858] sm:$0xff]  ;;  %v442_v0 = vld [vmem:[%s7434_s24 + $0x9a8] sm:$0xff]  ;;  %v5335_v11 = vld [vmem:[%s7435_s25 + $0x120] sm:$0xff] }
  0x56   :  { %588 = vmatmul.mubr.f32.gmra.mrb[2].mxu0 %v73_v27  ;;  %3800 = vmatprep.subr.bf16.mxu1 %v3799_v24  ;;  %v397_v24 = vld [vmem:[%s7434_s24 + $0x840] sm:$0xff]  ;;  %v3819_v30 = vpack.c.bf16 %v406_v22, %v400_v21  ;;  %v5316_v4 = vld [vmem:[%s7435_s25 + $0x128] sm:$0xff]  ;;  %v452_v10 = vld [vmem:[%s7434_s24 + $0x9f8] sm:$0xff] }
  0x57   :  { %910 = vmatmul.mubr.f32.gmra.mrb[2].mxu1 %v73_v27  ;;  %3674 = vmatpush1.bf16.msra.mxu0 %v3673_v28  ;;  %v3691_v27 = vpack.c.bf16 %v404_v18, %v398_v17  ;;  %v399_v28 = vld [vmem:[%s7434_s24 + $0x850] sm:$0xff]  ;;  %v454_v14 = vld [vmem:[%s7434_s24 + $0xa08] sm:$0xff]  ;;  %v453_v21 = vld [vmem:[%s7434_s24 + $0xa00] sm:$0xff] }
  0x58   :  { %3802 = vmatpush1.bf16.msra.mxu1 %v3801_v31  ;;  %593 = vmatprep.mubr.f32.mxu0 %v78_v34  ;;  %v410_v31 = vld [vmem:[%s7434_s24 + $0x8a8] sm:$0xff]  ;;  %v3821_v37 = vpack.c.bf16 %v405_v29, %v399_v28  ;;  %v451_v17 = vld [vmem:[%s7434_s24 + $0x9f0] sm:$0xff]  ;;  %v460_v28 = vld [vmem:[%s7434_s24 + $0xa38] sm:$0xff] }
  0x59   :  { %915 = vmatprep.mubr.f32.mxu1 %v78_v34  ;;  %3676 = vmatprep.subr.bf16.mxu0 %v3675_v35  ;;  %v3693_v34 = vpack.c.bf16 %v403_v25, %v397_v24  ;;  %v412_v35 = vld [vmem:[%s7434_s24 + $0x8b8] sm:$0xff]  ;;  %v5354_v18 = vld [vmem:[%s7435_s25 + $0x148] sm:$0xff]  ;;  %v5373_v25 = vld [vmem:[%s7435_s25 + $0x140] sm:$0xff] }
  0x5a   :  { %594 = vmatmul.mubr.f32.gmra.mrb[4].mxu0 %v77_v41  ;;  %3804 = vmatprep.subr.bf16.mxu1 %v3803_v38  ;;  %v409_v38 = vld [vmem:[%s7434_s24 + $0x8a0] sm:$0xff]  ;;  %v3823_v44 = vpack.c.bf16 %v418_v36, %v412_v35  ;;  %v464_v24 = vld [vmem:[%s7434_s24 + $0xa58] sm:$0xff]  ;;  %v466_v29 = vld [vmem:[%s7434_s24 + $0xa68] sm:$0xff] }
  0x5b   :  { %916 = vmatmul.mubr.f32.gmra.mrb[4].mxu1 %v77_v41  ;;  %3678 = vmatpush1.bf16.msra.mxu0 %v3677_v42  ;;  %v3695_v41 = vpack.c.bf16 %v416_v32, %v410_v31  ;;  %v411_v42 = vld [vmem:[%s7434_s24 + $0x8b0] sm:$0xff]  ;;  %v457_v31 = vld [vmem:[%s7434_s24 + $0xa20] sm:$0xff] }
  0x5c   :  { %3806 = vmatpush1.bf16.msra.mxu1 %v3805_v45  ;;  %599 = vmatprep.mubr.f32.mxu0 %v82_v48  ;;  %v422_v45 = vld [vmem:[%s7434_s24 + $0x908] sm:$0xff]  ;;  %v3825_v51 = vpack.c.bf16 %v417_v43, %v411_v42  ;;  %v463_v32 = vld [vmem:[%s7434_s24 + $0xa50] sm:$0xff]  ;;  %v5411_v42 = vld [vmem:[%s7435_s25 + $0x160] sm:$0xff] }
  0x5d   :  { %921 = vmatprep.mubr.f32.mxu1 %v82_v48  ;;  %3680 = vmatprep.subr.bf16.mxu0 %v3679_v49  ;;  %v3697_v48 = vpack.c.bf16 %v415_v39, %v409_v38  ;;  %v424_v49 = vld [vmem:[%s7434_s24 + $0x918] sm:$0xff]  ;;  %v459_v36 = vld [vmem:[%s7434_s24 + $0xa30] sm:$0xff]  ;;  %v3839_v38 = vpack.c.bf16 %v466_v29, %v460_v28  ;;  %v470_v39 = vld [vmem:[%s7434_s24 + $0xa88] sm:$0xff]  ;;  %v3713_v43 = vpack.c.bf16 %v463_v32, %v457_v31 }
  0x5e   :  { %600 = vmatmul.mubr.f32.gmra.mrb[6].mxu0 %v81_v55  ;;  %3808 = vmatprep.subr.bf16.mxu1 %v3807_v52  ;;  %v421_v52 = vld [vmem:[%s7434_s24 + $0x900] sm:$0xff]  ;;  %v3827_v58 = vpack.c.bf16 %v430_v50, %v424_v49  ;;  %v475_v49 = vld [vmem:[%s7434_s24 + $0xab0] sm:$0xff]  ;;  %v5430_v50 = vld [vmem:[%s7435_s25 + $0x188] sm:$0xff] }
  0x5f   :  { %922 = vmatmul.mubr.f32.gmra.mrb[6].mxu1 %v81_v55  ;;  %3682 = vmatpush1.bf16.msra.mxu0 %v3681_v56  ;;  %v3699_v55 = vpack.c.bf16 %v428_v46, %v422_v45  ;;  %v423_v56 = vld [vmem:[%s7434_s24 + $0x910] sm:$0xff]  ;;  %v478_v45 = vld [vmem:[%s7434_s24 + $0xac8] sm:$0xff]  ;;  %v5525_v28 = vld [vmem:[%s7435_s25 + $0x1c0] sm:$0xff] }
  0x60   :  { %3810 = vmatpush1.bf16.msra.mxu1 %v3809_v59  ;;  %605 = vmatprep.mubr.f32.mxu0 %v86_v62  ;;  %v434_v59 = vld [vmem:[%s7434_s24 + $0x968] sm:$0xff]  ;;  %v3829_v1 = vpack.c.bf16 %v429_v57, %v423_v56  ;;  %v488_v57 = vld [vmem:[%s7434_s24 + $0xb18] sm:$0xff] }
  0x61   :  { %927 = vmatprep.mubr.f32.mxu1 %v86_v62  ;;  %3684 = vmatprep.subr.bf16.mxu0 %v3683_v63  ;;  %v3701_v62 = vpack.c.bf16 %v427_v53, %v421_v52  ;;  %v436_v63 = vld [vmem:[%s7434_s24 + $0x978] sm:$0xff]  ;;  %v471_v52 = vld [vmem:[%s7434_s24 + $0xa90] sm:$0xff]  ;;  %v477_v53 = vld [vmem:[%s7434_s24 + $0xac0] sm:$0xff] }
  0x62   :  { %606 = vmatmul.mubr.f32.gmra.mrb[8].mxu0 %v85_v5  ;;  %3812 = vmatprep.subr.bf16.mxu1 %v3811_v2  ;;  %v433_v2 = vld [vmem:[%s7434_s24 + $0x960] sm:$0xff]  ;;  %v3831_v8 = vpack.c.bf16 %v442_v0, %v436_v63  ;;  %v482_v56 = vld [vmem:[%s7434_s24 + $0xae8] sm:$0xff]  ;;  %v3845_v63 = vpack.c.bf16 %v477_v53, %v471_v52  ;;  %v143_v52 = vld [vmem:[%s7434_s24 + $0x50] sm:$0xff] }
  0x63   :  { %928 = vmatmul.mubr.f32.gmra.mrb[8].mxu1 %v85_v5  ;;  %3686 = vmatpush1.bf16.msra.mxu0 %v3685_v6  ;;  %v3703_v5 = vpack.c.bf16 %v440_v60, %v434_v59  ;;  %v435_v6 = vld [vmem:[%s7434_s24 + $0x970] sm:$0xff]  ;;  %v484_v60 = vld [vmem:[%s7434_s24 + $0xaf8] sm:$0xff]  ;;  %v481_v0 = vld [vmem:[%s7434_s24 + $0xae0] sm:$0xff] }
  0x64   :  { %3814 = vmatpush1.bf16.msra.mxu1 %v3813_v9  ;;  %611 = vmatprep.mubr.f32.mxu0 %v90_v12  ;;  %v446_v9 = vld [vmem:[%s7434_s24 + $0x9c8] sm:$0xff]  ;;  %v3833_v15 = vpack.c.bf16 %v441_v7, %v435_v6  ;;  %v489_v6 = vld [vmem:[%s7434_s24 + $0xb20] sm:$0xff]  ;;  %v5576_v53 = vld [vmem:[%s7435_s25 + $0x18] sm:$0xff] }
  0x65   :  { %933 = vmatprep.mubr.f32.mxu1 %v90_v12  ;;  %3688 = vmatprep.subr.bf16.mxu0 %v3687_v13  ;;  %v3705_v12 = vpack.c.bf16 %v439_v3, %v433_v2  ;;  %v448_v13 = vld [vmem:[%s7434_s24 + $0x9d8] sm:$0xff]  ;;  %v5468_v2 = vld [vmem:[%s7435_s25 + $0x1a8] sm:$0xff]  ;;  %v3719_v3 = vpack.c.bf16 %v488_v57, %v482_v56 }
  0x66   :  { %612 = vmatmul.mubr.f32.gmra.mrb[10].mxu0 %v89_v19  ;;  %3816 = vmatprep.subr.bf16.mxu1 %v3815_v16  ;;  %v445_v16 = vld [vmem:[%s7434_s24 + $0x9c0] sm:$0xff]  ;;  %v3835_v22 = vpack.c.bf16 %v454_v14, %v448_v13  ;;  %v496_v13 = vld [vmem:[%s7434_s24 + $0xb58] sm:$0xff]  ;;  %v502_v14 = vld [vmem:[%s7434_s24 + $0xb88] sm:$0xff] }
  0x67   :  { %934 = vmatmul.mubr.f32.gmra.mrb[10].mxu1 %v89_v19  ;;  %3690 = vmatpush1.bf16.msra.mxu0 %v3689_v20  ;;  %v3707_v19 = vpack.c.bf16 %v452_v10, %v446_v9  ;;  %v447_v20 = vld [vmem:[%s7434_s24 + $0x9d0] sm:$0xff]  ;;  %v500_v9 = vld [vmem:[%s7434_s24 + $0xb78] sm:$0xff]  ;;  %v5487_v10 = vld [vmem:[%s7435_s25 + $0x1a0] sm:$0xff] }
  0x68   :  { %3818 = vmatpush1.bf16.msra.mxu1 %v3817_v23  ;;  %617 = vmatprep.mubr.f32.mxu0 %v5204_v26  ;;  %v458_v23 = vld [vmem:[%s7434_s24 + $0xa28] sm:$0xff]  ;;  %v156_v57 = vld [vmem:[%s7434_s24 + $0xb8] sm:$0xff] }
  0x69   :  { %939 = vmatprep.mubr.f32.mxu1 %v5204_v26  ;;  %3692 = vmatprep.subr.bf16.mxu0 %v3691_v27  ;;  %v3709_v27 = vpack.c.bf16 %v451_v17, %v445_v16  ;;  %v3711_v35 = vpack.c.bf16 %v464_v24, %v458_v23  ;;  %v493_v16 = vld [vmem:[%s7434_s24 + $0xb40] sm:$0xff]  ;;  %v499_v17 = vld [vmem:[%s7434_s24 + $0xb70] sm:$0xff]  ;;  %v3851_v23 = vpack.c.bf16 %v502_v14, %v496_v13  ;;  %v506_v24 = vld [vmem:[%s7434_s24 + $0xba8] sm:$0xff] }
  0x6a   :  { %618 = vmatmul.mubr.f32.gmra.mrb[12].mxu0 %v5221_v33  ;;  %3820 = vmatprep.subr.bf16.mxu1 %v3819_v30  ;;  %v3837_v30 = vpack.c.bf16 %v453_v21, %v447_v20  ;;  %v495_v21 = vld [vmem:[%s7434_s24 + $0xb50] sm:$0xff]  ;;  %v3725_v29 = vpack.c.bf16 %v499_v17, %v493_v16  ;;  %v514_v31 = vld [vmem:[%s7434_s24 + $0xbe8] sm:$0xff] }
  0x6b   :  { %940 = vmatmul.mubr.f32.gmra.mrb[12].mxu1 %v5221_v33  ;;  %3694 = vmatpush1.bf16.msra.mxu0 %v3693_v34  ;;  %v5392_v34 = vld [vmem:[%s7435_s25 + $0x168] sm:$0xff]  ;;  %v5641_v16 = vld [vmem:[%s7435_s25 + $0x50] sm:$0xff] }
  0x6c   :  { %3822 = vmatpush1.bf16.msra.mxu1 %v3821_v37  ;;  %623 = vmatprep.mubr.f32.mxu0 %v5240_v40  ;;  %v465_v37 = vld [vmem:[%s7434_s24 + $0xa60] sm:$0xff]  ;;  %v150_v56 = vld [vmem:[%s7434_s24 + $0x88] sm:$0xff] }
  0x6d   :  { %945 = vmatprep.mubr.f32.mxu1 %v5240_v40  ;;  %3696 = vmatprep.subr.bf16.mxu0 %v3695_v41  ;;  %v476_v41 = vld [vmem:[%s7434_s24 + $0xab8] sm:$0xff]  ;;  %v3841_v46 = vpack.c.bf16 %v465_v37, %v459_v36  ;;  %v511_v36 = vld [vmem:[%s7434_s24 + $0xbd0] sm:$0xff]  ;;  %v5544_v37 = vld [vmem:[%s7435_s25 + $0x1e8] sm:$0xff] }
  0x6e   :  { %624 = vmatmul.mubr.f32.gmra.mrb[14].mxu0 %v5259_v47  ;;  %3824 = vmatprep.subr.bf16.mxu1 %v3823_v44  ;;  %v472_v44 = vld [vmem:[%s7434_s24 + $0xa98] sm:$0xff]  ;;  %v174_v14 = vld [vmem:[%s7434_s24 + $0x148] sm:$0xff] }
  0x6f   :  { %946 = vmatmul.mubr.f32.gmra.mrb[14].mxu1 %v5259_v47  ;;  %3698 = vmatpush1.bf16.msra.mxu0 %v3697_v48  ;;  %v469_v48 = vld [vmem:[%s7434_s24 + $0xa80] sm:$0xff] }
  0x70   :  { %3826 = vmatpush1.bf16.msra.mxu1 %v3825_v51  ;;  %629 = vmatprep.mubr.f32.mxu0 %v5278_v54  ;;  %v3715_v51 = vpack.c.bf16 %v476_v41, %v470_v39  ;;  %v3717_v59 = vpack.c.bf16 %v475_v49, %v469_v48  ;;  %v507_v39 = vld [vmem:[%s7434_s24 + $0xbb0] sm:$0xff]  ;;  %v513_v41 = vld [vmem:[%s7434_s24 + $0xbe0] sm:$0xff] }
  0x71   :  { %951 = vmatprep.mubr.f32.mxu1 %v5278_v54  ;;  %3700 = vmatprep.subr.bf16.mxu0 %v3699_v55  ;;  %v3843_v55 = vpack.c.bf16 %v478_v45, %v472_v44  ;;  %v138_v44 = vld [vmem:[%s7434_s24 + $0x28] sm:$0xff]  ;;  %v144_v45 = vld [vmem:[%s7434_s24 + $0x58] sm:$0xff]  ;;  %v3857_v49 = vpack.c.bf16 %v513_v41, %v507_v39  ;;  %v5693_v41 = vld [vmem:[%s7435_s25 + $0x90] sm:$0xff] }
  0x72   :  { %630 = vmatmul.mubr.f32.gmra.mrb[16].mxu0 %v5297_v61  ;;  %3828 = vmatprep.subr.bf16.mxu1 %v3827_v58  ;;  %v5449_v58 = vld [vmem:[%s7435_s25 + $0x180] sm:$0xff]  ;;  %v204_v39 = vld [vmem:[%s7434_s24 + $0x238] sm:$0xff] }
  0x73   :  { %952 = vmatmul.mubr.f32.gmra.mrb[16].mxu1 %v5297_v61  ;;  %3702 = vmatpush1.bf16.msra.mxu0 %v3701_v62  ;;  %v490_v62 = vld [vmem:[%s7434_s24 + $0xb28] sm:$0xff] }
  0x74   :  { %3830 = vmatpush1.bf16.msra.mxu1 %v3829_v1  ;;  %635 = vmatprep.mubr.f32.mxu0 %v5316_v4  ;;  %v487_v1 = vld [vmem:[%s7434_s24 + $0xb10] sm:$0xff]  ;;  %v3847_v7 = vpack.c.bf16 %v490_v62, %v484_v60  ;;  %v149_v62 = vld [vmem:[%s7434_s24 + $0x80] sm:$0xff] }
  0x75   :  { %957 = vmatprep.mubr.f32.mxu1 %v5316_v4  ;;  %3704 = vmatprep.subr.bf16.mxu0 %v3703_v5  ;;  %v483_v5 = vld [vmem:[%s7434_s24 + $0xaf0] sm:$0xff] }
  0x76   :  { %636 = vmatmul.mubr.f32.gmra.mrb[18].mxu0 %v5335_v11  ;;  %3832 = vmatprep.subr.bf16.mxu1 %v3831_v8  ;;  %v494_v8 = vld [vmem:[%s7434_s24 + $0xb48] sm:$0xff] }
  0x77   :  { %958 = vmatmul.mubr.f32.gmra.mrb[18].mxu1 %v5335_v11  ;;  %3706 = vmatpush1.bf16.msra.mxu0 %v3705_v12  ;;  %v3721_v12 = vpack.c.bf16 %v487_v1, %v481_v0  ;;  %v3723_v20 = vpack.c.bf16 %v500_v9, %v494_v8  ;;  %v5602_v0 = vld [vmem:[%s7435_s25 + $0x38] sm:$0xff]  ;;  %v3863_v1 = vpack.c.bf16 %v156_v57, %v150_v56  ;;  %v161_v8 = vld [vmem:[%s7434_s24 + $0xe0] sm:$0xff]  ;;  %v167_v9 = vld [vmem:[%s7434_s24 + $0x110] sm:$0xff] }
  0x78   :  { %3834 = vmatpush1.bf16.msra.mxu1 %v3833_v15  ;;  %641 = vmatprep.mubr.f32.mxu0 %v5354_v18  ;;  %v3849_v15 = vpack.c.bf16 %v489_v6, %v483_v5  ;;  %v168_v5 = vld [vmem:[%s7434_s24 + $0x118] sm:$0xff]  ;;  %v5615_v6 = vld [vmem:[%s7435_s25 + $0x30] sm:$0xff]  ;;  %v3869_v17 = vpack.c.bf16 %v167_v9, %v161_v8  ;;  %v209_v57 = vld [vmem:[%s7434_s24 + $0x260] sm:$0xff] }
  0x79   :  { %963 = vmatprep.mubr.f32.mxu1 %v5354_v18  ;;  %3708 = vmatprep.subr.bf16.mxu0 %v3707_v19  ;;  %v5506_v19 = vld [vmem:[%s7435_s25 + $0x1c8] sm:$0xff] }
  0x7a   :  { %642 = vmatmul.mubr.f32.gmra.mrb[20].mxu0 %v5373_v25  ;;  %3836 = vmatprep.subr.bf16.mxu1 %v3835_v22  ;;  %v501_v22 = vld [vmem:[%s7434_s24 + $0xb80] sm:$0xff] }
  0x7b   :  { %964 = vmatmul.mubr.f32.gmra.mrb[20].mxu1 %v5373_v25  ;;  %3710 = vmatpush1.bf16.msra.mxu0 %v3709_v27  ;;  %v512_v27 = vld [vmem:[%s7434_s24 + $0xbd8] sm:$0xff]  ;;  %v3853_v32 = vpack.c.bf16 %v501_v22, %v495_v21  ;;  %v179_v21 = vld [vmem:[%s7434_s24 + $0x170] sm:$0xff] }
  0x7c   :  { %3838 = vmatpush1.bf16.msra.mxu1 %v3837_v30  ;;  %647 = vmatprep.mubr.f32.mxu0 %v5392_v34  ;;  %v508_v30 = vld [vmem:[%s7434_s24 + $0xbb8] sm:$0xff] }
  0x7d   :  { %969 = vmatprep.mubr.f32.mxu1 %v5392_v34  ;;  %3712 = vmatprep.subr.bf16.mxu0 %v3711_v35  ;;  %v505_v35 = vld [vmem:[%s7434_s24 + $0xba0] sm:$0xff]  ;;  %v5654_v22 = vld [vmem:[%s7435_s25 + $0x78] sm:$0xff] }
  0x7e   :  { %648 = vmatmul.mubr.f32.gmra.mrb[22].mxu0 %v5411_v42  ;;  %3840 = vmatprep.subr.bf16.mxu1 %v3839_v38  ;;  %v3727_v38 = vpack.c.bf16 %v512_v27, %v506_v24  ;;  %v3729_v48 = vpack.c.bf16 %v511_v36, %v505_v35  ;;  %v186_v24 = vld [vmem:[%s7434_s24 + $0x1a8] sm:$0xff]  ;;  %v192_v27 = vld [vmem:[%s7434_s24 + $0x1d8] sm:$0xff] }
  0x7f   :  { %970 = vmatmul.mubr.f32.gmra.mrb[22].mxu1 %v5411_v42  ;;  %3714 = vmatpush1.bf16.msra.mxu0 %v3713_v43  ;;  %v3855_v43 = vpack.c.bf16 %v514_v31, %v508_v30  ;;  %v185_v31 = vld [vmem:[%s7434_s24 + $0x1a0] sm:$0xff]  ;;  %v5680_v35 = vld [vmem:[%s7435_s25 + $0x98] sm:$0xff]  ;;  %v3875_v36 = vpack.c.bf16 %v192_v27, %v186_v24 }
  0x80   :  { %3842 = vmatpush1.bf16.msra.mxu1 %v3841_v46  ;;  %653 = vmatprep.mubr.f32.mxu0 %v5430_v50  ;;  %v5563_v46 = vld [vmem:[%s7435_s25 + $0x1e0] sm:$0xff] }
  0x81   :  { %975 = vmatprep.mubr.f32.mxu1 %v5430_v50  ;;  %3716 = vmatprep.subr.bf16.mxu0 %v3715_v51  ;;  %v137_v51 = vld [vmem:[%s7434_s24 + $0x20] sm:$0xff] }
  0x82   :  { %654 = vmatmul.mubr.f32.gmra.mrb[24].mxu0 %v5449_v58  ;;  %3844 = vmatprep.subr.bf16.mxu1 %v3843_v55  ;;  %v3859_v55 = vpack.c.bf16 %v144_v45, %v138_v44  ;;  %v3861_v60 = vpack.c.bf16 %v143_v52, %v137_v51  ;;  %v197_v44 = vld [vmem:[%s7434_s24 + $0x200] sm:$0xff]  ;;  %v203_v45 = vld [vmem:[%s7434_s24 + $0x230] sm:$0xff]  ;;  %v210_v51 = vld [vmem:[%s7434_s24 + $0x268] sm:$0xff] }
  0x83   :  { %976 = vmatmul.mubr.f32.gmra.mrb[24].mxu1 %v5449_v58  ;;  %3718 = vmatpush1.bf16.msra.mxu0 %v3717_v59  ;;  %v5589_v59 = vld [vmem:[%s7435_s25 + $0x10] sm:$0xff]  ;;  %v216_v52 = vld [vmem:[%s7434_s24 + $0x298] sm:$0xff]  ;;  %v3881_v56 = vpack.c.bf16 %v203_v45, %v197_v44 }
  0x84   :  { %3846 = vmatpush1.bf16.msra.mxu1 %v3845_v63  ;;  %659 = vmatprep.mubr.f32.mxu0 %v5468_v2  ;;  %v155_v63 = vld [vmem:[%s7434_s24 + $0xb0] sm:$0xff] }
  0x85   :  { %981 = vmatprep.mubr.f32.mxu1 %v5468_v2  ;;  %3720 = vmatprep.subr.bf16.mxu0 %v3719_v3  ;;  %v162_v3 = vld [vmem:[%s7434_s24 + $0xe8] sm:$0xff] }
  0x86   :  { %660 = vmatmul.mubr.f32.gmra.mrb[26].mxu0 %v5487_v10  ;;  %3848 = vmatprep.subr.bf16.mxu1 %v3847_v7  ;;  %v3865_v7 = vpack.c.bf16 %v155_v63, %v149_v62  ;;  %v3867_v13 = vpack.c.bf16 %v168_v5, %v162_v3 }
  0x87   :  { %982 = vmatmul.mubr.f32.gmra.mrb[26].mxu1 %v5487_v10  ;;  %3722 = vmatpush1.bf16.msra.mxu0 %v3721_v12  ;;  %v5628_v12 = vld [vmem:[%s7435_s25 + $0x58] sm:$0xff] }
  0x88   :  { %3850 = vmatpush1.bf16.msra.mxu1 %v3849_v15  ;;  %665 = vmatprep.mubr.f32.mxu0 %v5506_v19  ;;  %v180_v15 = vld [vmem:[%s7434_s24 + $0x178] sm:$0xff] }
  0x89   :  { %987 = vmatprep.mubr.f32.mxu1 %v5506_v19  ;;  %3724 = vmatprep.subr.bf16.mxu0 %v3723_v20  ;;  %v173_v20 = vld [vmem:[%s7434_s24 + $0x140] sm:$0xff] }
  0x8a   :  { %666 = vmatmul.mubr.f32.gmra.mrb[28].mxu0 %v5525_v28  ;;  %3852 = vmatprep.subr.bf16.mxu1 %v3851_v23  ;;  %v3871_v23 = vpack.c.bf16 %v180_v15, %v174_v14  ;;  %v3873_v30 = vpack.c.bf16 %v179_v21, %v173_v20 }
  0x8b   :  { %988 = vmatmul.mubr.f32.gmra.mrb[28].mxu1 %v5525_v28  ;;  %3726 = vmatpush1.bf16.msra.mxu0 %v3725_v29  ;;  %v5667_v29 = vld [vmem:[%s7435_s25 + $0x70] sm:$0xff] }
  0x8c   :  { %3854 = vmatpush1.bf16.msra.mxu1 %v3853_v32  ;;  %671 = vmatprep.mubr.f32.mxu0 %v5544_v37  ;;  %v191_v32 = vld [vmem:[%s7434_s24 + $0x1d0] sm:$0xff] }
  0x8d   :  { %993 = vmatprep.mubr.f32.mxu1 %v5544_v37  ;;  %3728 = vmatprep.subr.bf16.mxu0 %v3727_v38  ;;  %v198_v38 = vld [vmem:[%s7434_s24 + $0x208] sm:$0xff] }
  0x8e   :  { %672 = vmatmul.mubr.f32.gmra.mrb[30].mxu0 %v5563_v46  ;;  %3856 = vmatprep.subr.bf16.mxu1 %v3855_v43  ;;  %v3877_v43 = vpack.c.bf16 %v191_v32, %v185_v31 }
  0x8f   :  { %994 = vmatmul.mubr.f32.gmra.mrb[30].mxu1 %v5563_v46  ;;  %3730 = vmatpush1.bf16.msra.mxu0 %v3729_v48  ;;  %v5706_v48 = vld [vmem:[%s7435_s25 + $0xb8] sm:$0xff] }
  0x90   :  { %3858 = vmatpush1.bf16.msra.mxu1 %v3857_v49  ;;  %742 = vmatprep.mubr.f32.mxu0 %v5576_v53  ;;  %v3879_v49 = vpack.c.bf16 %v204_v39, %v198_v38 }
  0x91   :  { %1064 = vmatprep.mubr.f32.mxu1 %v5576_v53  ;;  %3860 = vmatprep.subr.bf16.mxu0 %v3859_v55  ;;  %v5719_v55 = vld [vmem:[%s7435_s25 + $0xb0] sm:$0xff] }
  0x92   :  { %743 = vmatmul.mubr.f32.vlgmr.msra.gmra.mrb[0].mxu0 %v5589_v59 }
  0x93   :  { %1065 = vmatmul.mubr.f32.vlgmr.msra.gmra.mrb[0].mxu1 %v5589_v59  ;;  %3862 = vmatpush1.bf16.msra.mxu0 %v3861_v60  ;;  %v215_v60 = vld [vmem:[%s7434_s24 + $0x290] sm:$0xff] }
  0x94   :  { %748 = vmatprep.mubr.f32.mxu0 %v5602_v0  ;;  %1070 = vmatprep.mubr.f32.mxu1 %v5602_v0 }
  0x95   :  { %3864 = vmatprep.subr.bf16.mxu0 %v3863_v1 }
  0x96   :  { %749 = vmatmul.mubr.f32.gmra.mrb[2].mxu0 %v5615_v6 }
  0x97   :  { %1071 = vmatmul.mubr.f32.gmra.mrb[2].mxu1 %v5615_v6  ;;  %3866 = vmatpush1.bf16.msra.mxu0 %v3865_v7 }
  0x98   :  { %754 = vmatprep.mubr.f32.mxu0 %v5628_v12  ;;  %1076 = vmatprep.mubr.f32.mxu1 %v5628_v12 }
  0x99   :  { %3868 = vmatprep.subr.bf16.mxu0 %v3867_v13 }
  0x9a   :  { %755 = vmatmul.mubr.f32.gmra.mrb[4].mxu0 %v5641_v16 }
  0x9b   :  { %1077 = vmatmul.mubr.f32.gmra.mrb[4].mxu1 %v5641_v16  ;;  %3870 = vmatpush1.bf16.msra.mxu0 %v3869_v17 }
  0x9c   :  { %760 = vmatprep.mubr.f32.mxu0 %v5654_v22  ;;  %1082 = vmatprep.mubr.f32.mxu1 %v5654_v22 }
  0x9d   :  { %3872 = vmatprep.subr.bf16.mxu0 %v3871_v23 }
  0x9e   :  { %761 = vmatmul.mubr.f32.gmra.mrb[6].mxu0 %v5667_v29 }
  0x9f   :  { %1083 = vmatmul.mubr.f32.gmra.mrb[6].mxu1 %v5667_v29  ;;  %3874 = vmatpush1.bf16.msra.mxu0 %v3873_v30 }
  0xa0   :  { %766 = vmatprep.mubr.f32.mxu0 %v5680_v35  ;;  %1088 = vmatprep.mubr.f32.mxu1 %v5680_v35 }
  0xa1   :  { %3876 = vmatprep.subr.bf16.mxu0 %v3875_v36 }
  0xa2   :  { %767 = vmatmul.mubr.f32.gmra.mrb[8].mxu0 %v5693_v41 }
  0xa3   :  { %1089 = vmatmul.mubr.f32.gmra.mrb[8].mxu1 %v5693_v41  ;;  %3878 = vmatpush1.bf16.msra.mxu0 %v3877_v43 }
  0xa4   :  { %772 = vmatprep.mubr.f32.mxu0 %v5706_v48  ;;  %1094 = vmatprep.mubr.f32.mxu1 %v5706_v48 }
  0xa5   :  { %30 = vsyncpa [#allocation5], 0  ;;  %3880 = vmatprep.subr.bf16.mxu0 %v3879_v49  ;;  %v5732_v62 = vld [vmem:[%s7435_s25 + $0xd8] sm:$0xff]  ;;  %v3883_v63 = vpack.c.bf16 %v216_v52, %v210_v51  ;;  %v222_v1 = vld [vmem:[%s7434_s24 + $0x2c8] sm:$0xff]  ;;  %v3885_v7 = vpack.c.bf16 %v215_v60, %v209_v57  ;;  %s7436_s2 = sld [smem:[#allocation10_spill]]  ;;  %s7437_s1 = sld [smem:[#allocation14_spill]] }
  0xa6   :  { %773 = vmatmul.mubr.f32.gmra.mrb[10].mxu0 %v5719_v55  ;;  %v228_v3 = vld [vmem:[%s7434_s24 + $0x2f8] sm:$0xff]  ;;  %v5745_v5 = vld [vmem:[%s7435_s25 + $0xd0] sm:$0xff]  ;;  %v221_v8 = vld [vmem:[%s7434_s24 + $0x2c0] sm:$0xff]  ;;  %vm4495_vm0 = vmmov 0   ;;  %s7441_s28 = sld [smem:[#allocation13_spill]]  ;;  %vm3001_vm2 = vcmask 0  }
  0xa7   :  { %1095 = vmatmul.mubr.f32.gmra.mrb[10].mxu1 %v5719_v55  ;;  %3882 = vmatpush1.bf16.msra.mxu0 %v3881_v56  ;;  %v227_v9 = vld [vmem:[%s7434_s24 + $0x2f0] sm:$0xff]  ;;  %v5758_v13 = vld [vmem:[%s7435_s25 + $0xf8] sm:$0xff]  ;;  %v3887_v14 = vpack.c.bf16 %v228_v3, %v222_v1  ;;  %v234_v15 = vld [vmem:[%s7434_s24 + $0x328] sm:$0xff]  ;;  %s4498_s27 = smov [#allocation4]  }
  0xa8   :  { %778 = vmatprep.mubr.f32.mxu0 %v5732_v62  ;;  %1100 = vmatprep.mubr.f32.mxu1 %v5732_v62  ;;  %v240_v17 = vld [vmem:[%s7434_s24 + $0x358] sm:$0xff]  ;;  %v5771_v20 = vld [vmem:[%s7435_s25 + $0xf0] sm:$0xff]  ;;  %v3889_v21 = vpack.c.bf16 %v227_v9, %v221_v8  ;;  %v233_v23 = vld [vmem:[%s7434_s24 + $0x320] sm:$0xff] }
  0xa9   :  { %3884 = vmatprep.subr.bf16.mxu0 %v3883_v63  ;;  %v239_v24 = vld [vmem:[%s7434_s24 + $0x350] sm:$0xff]  ;;  %v5784_v27 = vld [vmem:[%s7435_s25 + $0x118] sm:$0xff]  ;;  %v3891_v30 = vpack.c.bf16 %v240_v17, %v234_v15  ;;  %v246_v31 = vld [vmem:[%s7434_s24 + $0x388] sm:$0xff] }
  0xaa   :  { %779 = vmatmul.mubr.f32.gmra.mrb[12].mxu0 %v5745_v5  ;;  %v252_v32 = vld [vmem:[%s7434_s24 + $0x3b8] sm:$0xff]  ;;  %v5797_v36 = vld [vmem:[%s7435_s25 + $0x110] sm:$0xff]  ;;  %v3893_v38 = vpack.c.bf16 %v239_v24, %v233_v23  ;;  %v245_v39 = vld [vmem:[%s7434_s24 + $0x380] sm:$0xff] }
  0xab   :  { %1101 = vmatmul.mubr.f32.gmra.mrb[12].mxu1 %v5745_v5  ;;  %3886 = vmatpush1.bf16.msra.mxu0 %v3885_v7  ;;  %v251_v43 = vld [vmem:[%s7434_s24 + $0x3b0] sm:$0xff]  ;;  %v5810_v44 = vld [vmem:[%s7435_s25 + $0x138] sm:$0xff]  ;;  %v3895_v45 = vpack.c.bf16 %v252_v32, %v246_v31  ;;  %v258_v49 = vld [vmem:[%s7434_s24 + $0x3e8] sm:$0xff] }
  0xac   :  { %784 = vmatprep.mubr.f32.mxu0 %v5758_v13  ;;  %1106 = vmatprep.mubr.f32.mxu1 %v5758_v13  ;;  %v264_v51 = vld [vmem:[%s7434_s24 + $0x418] sm:$0xff]  ;;  %v5823_v52 = vld [vmem:[%s7435_s25 + $0x130] sm:$0xff]  ;;  %v3897_v56 = vpack.c.bf16 %v251_v43, %v245_v39  ;;  %v257_v57 = vld [vmem:[%s7434_s24 + $0x3e0] sm:$0xff] }
  0xad   :  { %3888 = vmatprep.subr.bf16.mxu0 %v3887_v14  ;;  %v263_v60 = vld [vmem:[%s7434_s24 + $0x410] sm:$0xff]  ;;  %v5836_v63 = vld [vmem:[%s7435_s25 + $0x158] sm:$0xff]  ;;  %v3899_v1 = vpack.c.bf16 %v264_v51, %v258_v49  ;;  %v270_v3 = vld [vmem:[%s7434_s24 + $0x448] sm:$0xff] }
  0xae   :  { %785 = vmatmul.mubr.f32.gmra.mrb[14].mxu0 %v5771_v20  ;;  %v276_v7 = vld [vmem:[%s7434_s24 + $0x478] sm:$0xff]  ;;  %v5849_v8 = vld [vmem:[%s7435_s25 + $0x150] sm:$0xff]  ;;  %v3901_v9 = vpack.c.bf16 %v263_v60, %v257_v57  ;;  %v269_v14 = vld [vmem:[%s7434_s24 + $0x440] sm:$0xff] }
  0xaf   :  { %1107 = vmatmul.mubr.f32.gmra.mrb[14].mxu1 %v5771_v20  ;;  %3890 = vmatpush1.bf16.msra.mxu0 %v3889_v21  ;;  %v275_v15 = vld [vmem:[%s7434_s24 + $0x470] sm:$0xff]  ;;  %v5862_v17 = vld [vmem:[%s7435_s25 + $0x178] sm:$0xff]  ;;  %v3903_v21 = vpack.c.bf16 %v276_v7, %v270_v3  ;;  %v282_v23 = vld [vmem:[%s7434_s24 + $0x4a8] sm:$0xff] }
  0xb0   :  { %790 = vmatprep.mubr.f32.mxu0 %v5784_v27  ;;  %1112 = vmatprep.mubr.f32.mxu1 %v5784_v27  ;;  %v288_v24 = vld [vmem:[%s7434_s24 + $0x4d8] sm:$0xff]  ;;  %v3905_v31 = vpack.c.bf16 %v275_v15, %v269_v14  ;;  %v281_v32 = vld [vmem:[%s7434_s24 + $0x4a0] sm:$0xff]  ;;  %v5901_v51 = vld [vmem:[%s7435_s25 + $0x190] sm:$0xff] }
  0xb1   :  { %3892 = vmatprep.subr.bf16.mxu0 %v3891_v30  ;;  %v5875_v30 = vld [vmem:[%s7435_s25 + $0x170] sm:$0xff]  ;;  %v5888_v39 = vld [vmem:[%s7435_s25 + $0x198] sm:$0xff]  ;;  %v3907_v43 = vpack.c.bf16 %v288_v24, %v282_v23  ;;  %v293_v57 = vld [vmem:[%s7434_s24 + $0x500] sm:$0xff] }
  0xb2   :  { %791 = vmatmul.mubr.f32.gmra.mrb[16].mxu0 %v5797_v36  ;;  %v300_v49 = vld [vmem:[%s7434_s24 + $0x538] sm:$0xff]  ;;  %v299_v60 = vld [vmem:[%s7434_s24 + $0x530] sm:$0xff]  ;;  %v306_v7 = vld [vmem:[%s7434_s24 + $0x568] sm:$0xff] }
  0xb3   :  { %1113 = vmatmul.mubr.f32.gmra.mrb[16].mxu1 %v5797_v36  ;;  %3894 = vmatpush1.bf16.msra.mxu0 %v3893_v38  ;;  %v287_v38 = vld [vmem:[%s7434_s24 + $0x4d0] sm:$0xff]  ;;  %v3913_v15 = vpack.c.bf16 %v299_v60, %v293_v57  ;;  %v5940_v24 = vld [vmem:[%s7435_s25 + $0x1d8] sm:$0xff] }
  0xb4   :  { %796 = vmatprep.mubr.f32.mxu0 %v5810_v44  ;;  %1118 = vmatprep.mubr.f32.mxu1 %v5810_v44  ;;  %v5927_v14 = vld [vmem:[%s7435_s25 + $0x1b0] sm:$0xff]  ;;  %v5966_v57 = vld [vmem:[%s7435_s25 + $0x1f8] sm:$0xff] }
  0xb5   :  { %3896 = vmatprep.subr.bf16.mxu0 %v3895_v45  ;;  %v294_v45 = vld [vmem:[%s7434_s24 + $0x508] sm:$0xff]  ;;  %v311_v23 = vld [vmem:[%s7434_s24 + $0x590] sm:$0xff] }
  0xb6   :  { %797 = vmatmul.mubr.f32.gmra.mrb[18].mxu0 %v5823_v52  ;;  %v3911_v3 = vpack.c.bf16 %v300_v49, %v294_v45  ;;  %v317_v49 = vld [vmem:[%s7434_s24 + $0x5c0] sm:$0xff] }
  0xb7   :  { %1119 = vmatmul.mubr.f32.gmra.mrb[18].mxu1 %v5823_v52  ;;  %3898 = vmatpush1.bf16.msra.mxu0 %v3897_v56  ;;  %v3909_v56 = vpack.c.bf16 %v287_v38, %v281_v32  ;;  %v318_v32 = vld [vmem:[%s7434_s24 + $0x5c8] sm:$0xff]  ;;  %v324_v38 = vld [vmem:[%s7434_s24 + $0x5f8] sm:$0xff] }
  0xb8   :  { %802 = vmatprep.mubr.f32.mxu0 %v5836_v63  ;;  %1124 = vmatprep.mubr.f32.mxu1 %v5836_v63  ;;  %v3919_v60 = vpack.c.bf16 %v324_v38, %v318_v32  ;;  %v342_v32 = vld [vmem:[%s7434_s24 + $0x688] sm:$0xff]  ;;  %v348_v38 = vld [vmem:[%s7434_s24 + $0x6b8] sm:$0xff] }
  0xb9   :  { %3900 = vmatprep.subr.bf16.mxu0 %v3899_v1  ;;  %v5914_v1 = vld [vmem:[%s7435_s25 + $0x1b8] sm:$0xff] }
  0xba   :  { %803 = vmatmul.mubr.f32.gmra.mrb[20].mxu0 %v5849_v8 }
  0xbb   :  { %1125 = vmatmul.mubr.f32.gmra.mrb[20].mxu1 %v5849_v8  ;;  %3902 = vmatpush1.bf16.msra.mxu0 %v3901_v9  ;;  %v312_v9 = vld [vmem:[%s7434_s24 + $0x598] sm:$0xff] }
  0xbc   :  { %808 = vmatprep.mubr.f32.mxu0 %v5862_v17  ;;  %1130 = vmatprep.mubr.f32.mxu1 %v5862_v17 }
  0xbd   :  { %3904 = vmatprep.subr.bf16.mxu0 %v3903_v21  ;;  %v305_v21 = vld [vmem:[%s7434_s24 + $0x560] sm:$0xff] }
  0xbe   :  { %809 = vmatmul.mubr.f32.gmra.mrb[22].mxu0 %v5875_v30  ;;  %v3917_v45 = vpack.c.bf16 %v311_v23, %v305_v21  ;;  %v329_v23 = vld [vmem:[%s7434_s24 + $0x620] sm:$0xff] }
  0xbf   :  { %1131 = vmatmul.mubr.f32.gmra.mrb[22].mxu1 %v5875_v30  ;;  %3906 = vmatpush1.bf16.msra.mxu0 %v3905_v31  ;;  %v3915_v31 = vpack.c.bf16 %v312_v9, %v306_v7  ;;  %v336_v7 = vld [vmem:[%s7434_s24 + $0x658] sm:$0xff]  ;;  %v5979_v9 = vld [vmem:[%s7435_s25 + $0x1f0] sm:$0xff] }
  0xc0   :  { %814 = vmatprep.mubr.f32.mxu0 %v5888_v39  ;;  %1136 = vmatprep.mubr.f32.mxu1 %v5888_v39 }
  0xc1   :  { %3908 = vmatprep.subr.bf16.mxu0 %v3907_v43  ;;  %v5953_v43 = vld [vmem:[%s7435_s25 + $0x1d0] sm:$0xff] }
  0xc2   :  { %815 = vmatmul.mubr.f32.gmra.mrb[24].mxu0 %v5901_v51 }
  0xc3   :  { %1137 = vmatmul.mubr.f32.gmra.mrb[24].mxu1 %v5901_v51  ;;  %3910 = vmatpush1.bf16.msra.mxu0 %v3909_v56  ;;  %v323_v56 = vld [vmem:[%s7434_s24 + $0x5f0] sm:$0xff] }
  0xc4   :  { %820 = vmatprep.mubr.f32.mxu0 %v5914_v1  ;;  %1142 = vmatprep.mubr.f32.mxu1 %v5914_v1 }
  0xc5   :  { %3912 = vmatprep.subr.bf16.mxu0 %v3911_v3  ;;  %v330_v3 = vld [vmem:[%s7434_s24 + $0x628] sm:$0xff] }
  0xc6   :  { %821 = vmatmul.mubr.f32.gmra.mrb[26].mxu0 %v5927_v14  ;;  %v3923_v21 = vpack.c.bf16 %v336_v7, %v330_v3  ;;  %v347_v3 = vld [vmem:[%s7434_s24 + $0x6b0] sm:$0xff]  ;;  %v354_v7 = vld [vmem:[%s7434_s24 + $0x6e8] sm:$0xff] }
  0xc7   :  { %1143 = vmatmul.mubr.f32.gmra.mrb[26].mxu1 %v5927_v14  ;;  %3914 = vmatpush1.bf16.msra.mxu0 %v3913_v15  ;;  %v3921_v15 = vpack.c.bf16 %v323_v56, %v317_v49  ;;  %v4432_v49 = vld [vmem:[%s7435_s25 + $0x8] sm:$0xff]  ;;  %v3927_v56 = vpack.c.bf16 %v348_v38, %v342_v32  ;;  %v353_v38 = vld [vmem:[%s7434_s24 + $0x6e0] sm:$0xff] }
  0xc8   :  { %826 = vmatprep.mubr.f32.mxu0 %v5940_v24  ;;  %1148 = vmatprep.mubr.f32.mxu1 %v5940_v24 }
  0xc9   :  { %3916 = vmatprep.subr.bf16.mxu0 %v3915_v31  ;;  %v335_v31 = vld [vmem:[%s7434_s24 + $0x650] sm:$0xff] }
  0xca   :  { %827 = vmatmul.mubr.f32.gmra.mrb[28].mxu0 %v5953_v43 }
  0xcb   :  { %1149 = vmatmul.mubr.f32.gmra.mrb[28].mxu1 %v5953_v43  ;;  %3918 = vmatpush1.bf16.msra.mxu0 %v3917_v45  ;;  %v3925_v45 = vpack.c.bf16 %v335_v31, %v329_v23  ;;  %v4434_v23 = vld [vmem:[%s7435_s25 + $0x28] sm:$0xff] }
  0xcc   :  { %832 = vmatprep.mubr.f32.mxu0 %v5966_v57  ;;  %1154 = vmatprep.mubr.f32.mxu1 %v5966_v57 }
  0xcd   :  { %3920 = vmatprep.subr.bf16.mxu0 %v3919_v60  ;;  %v341_v60 = vld [vmem:[%s7434_s24 + $0x680] sm:$0xff] }
  0xce   :  { %833 = vmatmul.mubr.f32.gmra.mrb[30].mxu0 %v5979_v9  ;;  %v3929_v31 = vpack.c.bf16 %v347_v3, %v341_v60  ;;  %v4436_v60 = vld [vmem:[%s7435_s25 + $0x48] sm:$0xff] }
  0xcf   :  { %1155 = vmatmul.mubr.f32.gmra.mrb[30].mxu1 %v5979_v9  ;;  %3922 = vmatpush1.bf16.msra.mxu0 %v3921_v15  ;;  %v360_v15 = vld [vmem:[%s7434_s24 + $0x718] sm:$0xff] }
  0xd0   :  { %1225 = vmatprep.mubr.f32.mxu0 %v4432_v49  ;;  %3924 = vmatprep.subr.bf16.mxu0 %v3923_v21  ;;  %v4433_v21 = vld [vmem:[%s7435_s25] sm:$0xff]  ;;  %v3931_v32 = vpack.c.bf16 %v360_v15, %v354_v7  ;;  %v359_v49 = vld [vmem:[%s7434_s24 + $0x710] sm:$0xff] }
  0xd1   :  { %v3933_v3 = vpack.c.bf16 %v359_v49, %v353_v38  ;;  %v365_v15 = vld [vmem:[%s7434_s24 + $0x740] sm:$0xff]  ;;  %v4438_v38 = vld [vmem:[%s7435_s25 + $0x68] sm:$0xff] }
  0xd2   :  { %1226 = vmatmul.mubr.f32.vlgmr.msra.gmra.mrb[32].mxu0 %v4433_v21  ;;  %v372_v21 = vld [vmem:[%s7434_s24 + $0x778] sm:$0xff] }
  0xd3   :  { %3926 = vmatpush1.bf16.msra.mxu0 %v3925_v45  ;;  %1231 = vmatprep.mubr.f32.mxu0 %v4434_v23  ;;  %v366_v45 = vld [vmem:[%s7434_s24 + $0x748] sm:$0xff]  ;;  %v371_v23 = vld [vmem:[%s7434_s24 + $0x770] sm:$0xff] }
  0xd4   :  { %3928 = vmatprep.subr.bf16.mxu0 %v3927_v56  ;;  %v4435_v56 = vld [vmem:[%s7435_s25 + $0x20] sm:$0xff]  ;;  %v3935_v7 = vpack.c.bf16 %v372_v21, %v366_v45  ;;  %v3937_v49 = vpack.c.bf16 %v371_v23, %v365_v15  ;;  %v4440_v15 = vld [vmem:[%s7435_s25 + $0x88] sm:$0xff] }
  0xd5   :  { %v377_v21 = vld [vmem:[%s7434_s24 + $0x7a0] sm:$0xff] }
  0xd6   :  { %1232 = vmatmul.mubr.f32.gmra.mrb[34].mxu0 %v4435_v56  ;;  %v384_v56 = vld [vmem:[%s7434_s24 + $0x7d8] sm:$0xff] }
  0xd7   :  { %3930 = vmatpush1.bf16.msra.mxu0 %v3929_v31  ;;  %1237 = vmatprep.mubr.f32.mxu0 %v4436_v60  ;;  %v378_v31 = vld [vmem:[%s7434_s24 + $0x7a8] sm:$0xff]  ;;  %v383_v60 = vld [vmem:[%s7434_s24 + $0x7d0] sm:$0xff] }
  0xd8   :  { %3932 = vmatprep.subr.bf16.mxu0 %v3931_v32  ;;  %v4437_v32 = vld [vmem:[%s7435_s25 + $0x40] sm:$0xff]  ;;  %v3939_v45 = vpack.c.bf16 %v384_v56, %v378_v31  ;;  %v3941_v23 = vpack.c.bf16 %v383_v60, %v377_v21  ;;  %v4442_v21 = vld [vmem:[%s7435_s25 + $0xa8] sm:$0xff] }
  0xd9   :  { %v389_v56 = vld [vmem:[%s7434_s24 + $0x800] sm:$0xff] }
  0xda   :  { %1238 = vmatmul.mubr.f32.gmra.mrb[36].mxu0 %v4437_v32  ;;  %v396_v32 = vld [vmem:[%s7434_s24 + $0x838] sm:$0xff] }
  0xdb   :  { %3934 = vmatpush1.bf16.msra.mxu0 %v3933_v3  ;;  %1243 = vmatprep.mubr.f32.mxu0 %v4438_v38  ;;  %v390_v3 = vld [vmem:[%s7434_s24 + $0x808] sm:$0xff]  ;;  %v395_v38 = vld [vmem:[%s7434_s24 + $0x830] sm:$0xff] }
  0xdc   :  { %3936 = vmatprep.subr.bf16.mxu0 %v3935_v7  ;;  %v4439_v7 = vld [vmem:[%s7435_s25 + $0x60] sm:$0xff]  ;;  %v3943_v31 = vpack.c.bf16 %v396_v32, %v390_v3  ;;  %v3945_v60 = vpack.c.bf16 %v395_v38, %v389_v56 }
  0xdd   :  { %v401_v32 = vld [vmem:[%s7434_s24 + $0x860] sm:$0xff] }
  0xde   :  { %1244 = vmatmul.mubr.f32.gmra.mrb[38].mxu0 %v4439_v7  ;;  %v408_v7 = vld [vmem:[%s7434_s24 + $0x898] sm:$0xff] }
  0xdf   :  { %3938 = vmatpush1.bf16.msra.mxu0 %v3937_v49  ;;  %1249 = vmatprep.mubr.f32.mxu0 %v4440_v15  ;;  %v402_v49 = vld [vmem:[%s7434_s24 + $0x868] sm:$0xff]  ;;  %v407_v15 = vld [vmem:[%s7434_s24 + $0x890] sm:$0xff] }
  0xe0   :  { %3940 = vmatprep.subr.bf16.mxu0 %v3939_v45  ;;  %v4441_v45 = vld [vmem:[%s7435_s25 + $0x80] sm:$0xff]  ;;  %v3947_v3 = vpack.c.bf16 %v408_v7, %v402_v49  ;;  %v3949_v56 = vpack.c.bf16 %v407_v15, %v401_v32  ;;  %v419_v7 = vld [vmem:[%s7434_s24 + $0x8f0] sm:$0xff] }
  0xe1   :  { %v413_v49 = vld [vmem:[%s7434_s24 + $0x8c0] sm:$0xff]  ;;  %v431_v15 = vld [vmem:[%s7434_s24 + $0x950] sm:$0xff] }
  0xe2   :  { %1250 = vmatmul.mubr.f32.gmra.mrb[40].mxu0 %v4441_v45  ;;  %v420_v45 = vld [vmem:[%s7434_s24 + $0x8f8] sm:$0xff]  ;;  %v425_v32 = vld [vmem:[%s7434_s24 + $0x920] sm:$0xff] }
  0xe3   :  { %3942 = vmatpush1.bf16.msra.mxu0 %v3941_v23  ;;  %1255 = vmatprep.mubr.f32.mxu0 %v4442_v21  ;;  %v414_v23 = vld [vmem:[%s7434_s24 + $0x8c8] sm:$0xff] }
  0xe4   :  { %3944 = vmatprep.subr.bf16.mxu0 %v3943_v31  ;;  %v4443_v31 = vld [vmem:[%s7435_s25 + $0xa0] sm:$0xff]  ;;  %v3951_v38 = vpack.c.bf16 %v420_v45, %v414_v23  ;;  %v426_v21 = vld [vmem:[%s7434_s24 + $0x928] sm:$0xff]  ;;  %s7438_s25 = sld [smem:[#allocation12_spill]] }
  0xe5   :  { %v438_v23 = vld [vmem:[%s7434_s24 + $0x988] sm:$0xff] }
  0xe6   :  { %1256 = vmatmul.mubr.f32.gmra.mrb[42].mxu0 %v4443_v31  ;;  %v437_v31 = vld [vmem:[%s7434_s24 + $0x980] sm:$0xff] }
  0xe7   :  { %3946 = vmatpush1.bf16.msra.mxu0 %v3945_v60  ;;  %1261 = vmatprep.mubr.f32.mxu0 %v5204_v26  ;;  %v432_v60 = vld [vmem:[%s7434_s24 + $0x958] sm:$0xff]  ;;  %v3953_v26 = vpack.c.bf16 %v419_v7, %v413_v49  ;;  %v449_v7 = vld [vmem:[%s7434_s24 + $0x9e0] sm:$0xff] }
  0xe8   :  { %3948 = vmatprep.subr.bf16.mxu0 %v3947_v3  ;;  %v3955_v3 = vpack.c.bf16 %v432_v60, %v426_v21  ;;  %v455_v21 = vld [vmem:[%s7434_s24 + $0xa10] sm:$0xff]  ;;  %v462_v60 = vld [vmem:[%s7434_s24 + $0xa48] sm:$0xff] }
  0xea   :  { %1262 = vmatmul.mubr.f32.gmra.mrb[44].mxu0 %v5221_v33  ;;  %v444_v33 = vld [vmem:[%s7434_s24 + $0x9b8] sm:$0xff] }
  0xeb   :  { %3950 = vmatpush1.bf16.msra.mxu0 %v3949_v56  ;;  %1267 = vmatprep.mubr.f32.mxu0 %v5240_v40  ;;  %v3957_v40 = vpack.c.bf16 %v431_v15, %v425_v32  ;;  %v3959_v45 = vpack.c.bf16 %v444_v33, %v438_v23  ;;  %v443_v56 = vld [vmem:[%s7434_s24 + $0x9b0] sm:$0xff]  ;;  %v474_v15 = vld [vmem:[%s7434_s24 + $0xaa8] sm:$0xff]  ;;  %v473_v33 = vld [vmem:[%s7434_s24 + $0xaa0] sm:$0xff] }
  0xec   :  { %3952 = vmatprep.subr.bf16.mxu0 %v3951_v38  ;;  %v450_v38 = vld [vmem:[%s7434_s24 + $0x9e8] sm:$0xff]  ;;  %v467_v32 = vld [vmem:[%s7434_s24 + $0xa70] sm:$0xff] }
  0xee   :  { %1268 = vmatmul.mubr.f32.gmra.mrb[46].mxu0 %v5259_v47  ;;  %v456_v47 = vld [vmem:[%s7434_s24 + $0xa18] sm:$0xff] }
  0xef   :  { %3954 = vmatpush1.bf16.msra.mxu0 %v3953_v26  ;;  %1273 = vmatprep.mubr.f32.mxu0 %v5278_v54  ;;  %v3961_v54 = vpack.c.bf16 %v443_v56, %v437_v31  ;;  %v3963_v49 = vpack.c.bf16 %v456_v47, %v450_v38  ;;  %v485_v56 = vld [vmem:[%s7434_s24 + $0xb00] sm:$0xff]  ;;  %v491_v38 = vld [vmem:[%s7434_s24 + $0xb30] sm:$0xff]  ;;  %v498_v47 = vld [vmem:[%s7434_s24 + $0xb68] sm:$0xff] }
  0xf0   :  { %3956 = vmatprep.subr.bf16.mxu0 %v3955_v3  ;;  %v461_v3 = vld [vmem:[%s7434_s24 + $0xa40] sm:$0xff] }
  0xf2   :  { %1274 = vmatmul.mubr.f32.gmra.mrb[48].mxu0 %v5297_v61  ;;  %v468_v61 = vld [vmem:[%s7434_s24 + $0xa78] sm:$0xff] }
  0xf3   :  { %3958 = vmatpush1.bf16.msra.mxu0 %v3957_v40  ;;  %1279 = vmatprep.mubr.f32.mxu0 %v5316_v4  ;;  %v3965_v4 = vpack.c.bf16 %v455_v21, %v449_v7  ;;  %v3967_v26 = vpack.c.bf16 %v468_v61, %v462_v60  ;;  %v479_v40 = vld [vmem:[%s7434_s24 + $0xad0] sm:$0xff]  ;;  %v510_v21 = vld [vmem:[%s7434_s24 + $0xbc8] sm:$0xff]  ;;  %v509_v61 = vld [vmem:[%s7434_s24 + $0xbc0] sm:$0xff] }
  0xf4   :  { %3960 = vmatprep.subr.bf16.mxu0 %v3959_v45  ;;  %v486_v45 = vld [vmem:[%s7434_s24 + $0xb08] sm:$0xff]  ;;  %v503_v7 = vld [vmem:[%s7434_s24 + $0xb90] sm:$0xff] }
  0xf6   :  { %1280 = vmatmul.mubr.f32.gmra.mrb[50].mxu0 %v5335_v11  ;;  %v480_v11 = vld [vmem:[%s7434_s24 + $0xad8] sm:$0xff] }
  0xf7   :  { %3962 = vmatpush1.bf16.msra.mxu0 %v3961_v54  ;;  %1285 = vmatprep.mubr.f32.mxu0 %v5354_v18  ;;  %v3969_v18 = vpack.c.bf16 %v467_v32, %v461_v3  ;;  %v3971_v23 = vpack.c.bf16 %v480_v11, %v474_v15  ;;  %v1633_v32 = vld [vmem:[%s7436_s2 + $0x30] sm:$0xff]  ;;  %v1634_v15 = vld [vmem:[%s7436_s2 + $0x38] sm:$0xff]  ;;  %v1651_v11 = vld [vmem:[%s7436_s2 + $0xc0] sm:$0xff] }
  0xf8   :  { %3964 = vmatprep.subr.bf16.mxu0 %v3963_v49  ;;  %v497_v49 = vld [vmem:[%s7434_s24 + $0xb60] sm:$0xff] }
  0xfa   :  { %1286 = vmatmul.mubr.f32.gmra.mrb[52].mxu0 %v5373_v25  ;;  %v492_v25 = vld [vmem:[%s7434_s24 + $0xb38] sm:$0xff] }
  0xfb   :  { %3966 = vmatpush1.bf16.msra.mxu0 %v3965_v4  ;;  %1291 = vmatprep.mubr.f32.mxu0 %v5392_v34  ;;  %v3973_v34 = vpack.c.bf16 %v479_v40, %v473_v33  ;;  %v3975_v31 = vpack.c.bf16 %v492_v25, %v486_v45  ;;  %v515_v4 = vld [vmem:[%s7434_s24 + $0xbf0] sm:$0xff]  ;;  %v1636_v33 = vld [vmem:[%s7436_s2 + $0x48] sm:$0xff] }
  0xfc   :  { %3968 = vmatprep.subr.bf16.mxu0 %v3967_v26  ;;  %v1649_v26 = vld [vmem:[%s7436_s2 + $0xb0] sm:$0xff] }
  0xfd   :  { %v1653_v40 = vld [vmem:[%s7436_s2 + $0xd0] sm:$0xff] }
  0xfe   :  { %1292 = vmatmul.mubr.f32.gmra.mrb[54].mxu0 %v5411_v42  ;;  %v504_v42 = vld [vmem:[%s7434_s24 + $0xb98] sm:$0xff]  ;;  %v1637_v25 = vld [vmem:[%s7436_s2 + $0x50] sm:$0xff] }
  0xff   :  { %3970 = vmatpush1.bf16.msra.mxu0 %v3969_v18  ;;  %1297 = vmatprep.mubr.f32.mxu0 %v5430_v50  ;;  %v3977_v50 = vpack.c.bf16 %v491_v38, %v485_v56  ;;  %v3979_v54 = vpack.c.bf16 %v504_v42, %v498_v47  ;;  %v1639_v38 = vld [vmem:[%s7436_s2 + $0x60] sm:$0xff]  ;;  %v1640_v47 = vld [vmem:[%s7436_s2 + $0x68] sm:$0xff]  ;;  %v1657_v42 = vld [vmem:[%s7436_s2 + $0xf0] sm:$0xff] }
 0x100   :  { %3972 = vmatprep.subr.bf16.mxu0 %v3971_v23  ;;  %v1635_v23 = vld [vmem:[%s7436_s2 + $0x40] sm:$0xff] }
 0x102   :  { %1298 = vmatmul.mubr.f32.gmra.mrb[56].mxu0 %v5449_v58  ;;  %v516_v58 = vld [vmem:[%s7434_s24 + $0xbf8] sm:$0xff] }
 0x103   :  { %3974 = vmatpush1.bf16.msra.mxu0 %v3973_v34  ;;  %1303 = vmatprep.mubr.f32.mxu0 %v5468_v2  ;;  %v3981_v2 = vpack.c.bf16 %v503_v7, %v497_v49  ;;  %v3983_v60 = vpack.c.bf16 %v516_v58, %v510_v21  ;;  %v1638_v34 = vld [vmem:[%s7436_s2 + $0x58] sm:$0xff] }
 0x104   :  { %3976 = vmatprep.subr.bf16.mxu0 %v3975_v31  ;;  %v1655_v31 = vld [vmem:[%s7436_s2 + $0xe0] sm:$0xff]  ;;  %v1642_v49 = vld [vmem:[%s7436_s2 + $0x78] sm:$0xff] }
 0x106   :  { %1304 = vmatmul.mubr.f32.gmra.mrb[58].mxu0 %v5487_v10  ;;  %v3985_v10 = vpack.c.bf16 %v515_v4, %v509_v61 }
 0x107   :  { %3978 = vmatpush1.bf16.msra.mxu0 %v3977_v50  ;;  %1309 = vmatprep.mubr.f32.mxu0 %v5506_v19  ;;  %v1643_v19 = vld [vmem:[%s7436_s2 + $0x80] sm:$0xff] }
 0x108   :  { %3980 = vmatprep.subr.bf16.mxu0 %v3979_v54  ;;  %v1641_v54 = vld [vmem:[%s7436_s2 + $0x70] sm:$0xff] }
 0x109   :  { %v4017_v7 = vpack.c.bf16 %v1642_v49, %v1641_v54 }
 0x10a   :  { %1310 = vmatmul.mubr.f32.gmra.mrb[60].mxu0 %v5525_v28  ;;  %v1644_v28 = vld [vmem:[%s7436_s2 + $0x88] sm:$0xff] }
 0x10b   :  { %3982 = vmatpush1.bf16.msra.mxu0 %v3981_v2  ;;  %1315 = vmatprep.mubr.f32.mxu0 %v5544_v37  ;;  %v1627_v37 = vld [vmem:[%s7436_s2] sm:$0xff] }
 0x10c   :  { %3984 = vmatprep.subr.bf16.mxu0 %v3983_v60 }
 0x10e   :  { %1316 = vmatmul.mubr.f32.gmra.mrb[62].mxu0 %v5563_v46  ;;  %v3987_v46 = vpack.c.bf16 %v1644_v28, %v1643_v19 }
 0x10f   :  { %3986 = vmatpush1.bf16.msra.mxu0 %v3985_v10  ;;  %1386 = vmatprep.mubr.f32.mxu0 %v5576_v53  ;;  %v1628_v53 = vld [vmem:[%s7436_s2 + $0x8] sm:$0xff] }
 0x110   :  { %3988 = vmatprep.subr.bf16.mxu1 %v3987_v46  ;;  %v1660_v10 = vld [vmem:[%s7436_s2 + $0x108] sm:$0xff] }
 0x112   :  { %1387 = vmatmul.mubr.f32.vlgmr.msra.gmra.mrb[32].mxu0 %v5589_v59  ;;  %v1645_v59 = vld [vmem:[%s7436_s2 + $0x90] sm:$0xff] }
 0x113   :  { %1392 = vmatprep.mubr.f32.mxu0 %v5602_v0  ;;  %v1646_v0 = vld [vmem:[%s7436_s2 + $0x98] sm:$0xff] }
 0x116   :  { %1393 = vmatmul.mubr.f32.gmra.mrb[34].mxu0 %v5615_v6  ;;  %v3989_v6 = vpack.c.bf16 %v1628_v53, %v1627_v37 }
 0x117   :  { %1398 = vmatprep.mubr.f32.mxu0 %v5628_v12  ;;  %v3991_v12 = vpack.c.bf16 %v1646_v0, %v1645_v59 }
 0x118   :  { %3990 = vmatpush3.bf16.msra.mxu1 %v3989_v6 }
 0x119   :  { %3992 = vmatprep.subr.bf16.mxu1 %v3991_v12 }
 0x11a   :  { %1399 = vmatmul.mubr.f32.gmra.mrb[36].mxu0 %v5641_v16  ;;  %v1629_v16 = vld [vmem:[%s7436_s2 + $0x10] sm:$0xff] }
 0x11b   :  { %1404 = vmatprep.mubr.f32.mxu0 %v5654_v22  ;;  %v1630_v22 = vld [vmem:[%s7436_s2 + $0x18] sm:$0xff] }
 0x11e   :  { %1405 = vmatmul.mubr.f32.gmra.mrb[38].mxu0 %v5667_v29  ;;  %v1647_v29 = vld [vmem:[%s7436_s2 + $0xa0] sm:$0xff] }
 0x11f   :  { %1410 = vmatprep.mubr.f32.mxu0 %v5680_v35  ;;  %v1648_v35 = vld [vmem:[%s7436_s2 + $0xa8] sm:$0xff] }
 0x122   :  { %1411 = vmatmul.mubr.f32.gmra.mrb[40].mxu0 %v5693_v41  ;;  %v3993_v41 = vpack.c.bf16 %v1630_v22, %v1629_v16 }
 0x123   :  { %1416 = vmatprep.mubr.f32.mxu0 %v5706_v48  ;;  %v3995_v48 = vpack.c.bf16 %v1648_v35, %v1647_v29 }
 0x124   :  { %3994 = vmatpush3.bf16.msra.mxu1 %v3993_v41 }
 0x125   :  { %3996 = vmatprep.subr.bf16.mxu1 %v3995_v48 }
 0x126   :  { %1417 = vmatmul.mubr.f32.gmra.mrb[42].mxu0 %v5719_v55  ;;  %v1631_v55 = vld [vmem:[%s7436_s2 + $0x20] sm:$0xff] }
 0x127   :  { %1422 = vmatprep.mubr.f32.mxu0 %v5732_v62  ;;  %v1632_v62 = vld [vmem:[%s7436_s2 + $0x28] sm:$0xff] }
 0x12a   :  { %1423 = vmatmul.mubr.f32.gmra.mrb[44].mxu0 %v5745_v5  ;;  %v1650_v5 = vld [vmem:[%s7436_s2 + $0xb8] sm:$0xff] }
 0x12b   :  { %1428 = vmatprep.mubr.f32.mxu0 %v5758_v13  ;;  %v3997_v13 = vpack.c.bf16 %v1632_v62, %v1631_v55  ;;  %v3999_v3 = vpack.c.bf16 %v1650_v5, %v1649_v26 }
 0x12d   :  { %3998 = vmatpush3.bf16.msra.mxu1 %v3997_v13 }
 0x12e   :  { %1429 = vmatmul.mubr.f32.gmra.mrb[46].mxu0 %v5771_v20  ;;  %v1652_v20 = vld [vmem:[%s7436_s2 + $0xc8] sm:$0xff]  ;;  %4000 = vmatprep.subr.bf16.mxu1 %v3999_v3 }
 0x12f   :  { %1434 = vmatprep.mubr.f32.mxu0 %v5784_v27  ;;  %v4001_v27 = vpack.c.bf16 %v1634_v15, %v1633_v32  ;;  %v4003_v18 = vpack.c.bf16 %v1652_v20, %v1651_v11 }
 0x131   :  { %4002 = vmatpush3.bf16.msra.mxu1 %v4001_v27 }
 0x132   :  { %1435 = vmatmul.mubr.f32.gmra.mrb[48].mxu0 %v5797_v36  ;;  %v1654_v36 = vld [vmem:[%s7436_s2 + $0xd8] sm:$0xff]  ;;  %4004 = vmatprep.subr.bf16.mxu1 %v4003_v18 }
 0x133   :  { %1440 = vmatprep.mubr.f32.mxu0 %v5810_v44  ;;  %v4005_v44 = vpack.c.bf16 %v1636_v33, %v1635_v23  ;;  %v4007_v45 = vpack.c.bf16 %v1654_v36, %v1653_v40 }
 0x135   :  { %4006 = vmatpush3.bf16.msra.mxu1 %v4005_v44 }
 0x136   :  { %1441 = vmatmul.mubr.f32.gmra.mrb[50].mxu0 %v5823_v52  ;;  %v1656_v52 = vld [vmem:[%s7436_s2 + $0xe8] sm:$0xff]  ;;  %4008 = vmatprep.subr.bf16.mxu1 %v4007_v45 }
 0x137   :  { %1446 = vmatprep.mubr.f32.mxu0 %v5836_v63  ;;  %v4009_v63 = vpack.c.bf16 %v1638_v34, %v1637_v25  ;;  %v4011_v56 = vpack.c.bf16 %v1656_v52, %v1655_v31 }
 0x139   :  { %4010 = vmatpush3.bf16.msra.mxu1 %v4009_v63 }
 0x13a   :  { %1447 = vmatmul.mubr.f32.gmra.mrb[52].mxu0 %v5849_v8  ;;  %v1658_v8 = vld [vmem:[%s7436_s2 + $0xf8] sm:$0xff]  ;;  %4012 = vmatprep.subr.bf16.mxu1 %v4011_v56 }
 0x13b   :  { %1452 = vmatprep.mubr.f32.mxu0 %v5862_v17  ;;  %v4013_v17 = vpack.c.bf16 %v1640_v47, %v1639_v38  ;;  %v4015_v50 = vpack.c.bf16 %v1658_v8, %v1657_v42 }
 0x13d   :  { %4014 = vmatpush3.bf16.msra.mxu1 %v4013_v17 }
 0x13e   :  { %1453 = vmatmul.mubr.f32.gmra.mrb[54].mxu0 %v5875_v30  ;;  %4016 = vmatprep.subr.bf16.mxu1 %v4015_v50 }
 0x13f   :  { %1458 = vmatprep.mubr.f32.mxu0 %v5888_v39 }
 0x141   :  { %4018 = vmatpush3.bf16.msra.mxu1 %v4017_v7 }
 0x142   :  { %1459 = vmatmul.mubr.f32.gmra.mrb[56].mxu0 %v5901_v51 }
 0x143   :  { %1464 = vmatprep.mubr.f32.mxu0 %v5914_v1 }
 0x146   :  { %1465 = vmatmul.mubr.f32.gmra.mrb[58].mxu0 %v5927_v14 }
 0x147   :  { %1470 = vmatprep.mubr.f32.mxu0 %v5940_v24 }
 0x14a   :  { %1471 = vmatmul.mubr.f32.gmra.mrb[60].mxu0 %v5953_v43 }
 0x14b   :  { %1476 = vmatprep.mubr.f32.mxu0 %v5966_v57 }
 0x14e   :  { %1477 = vmatmul.mubr.f32.gmra.mrb[62].mxu0 %v5979_v9  ;;  %v1659_v9 = vld [vmem:[%s7436_s2 + $0x100] sm:$0xff] }
 0x14f   :  { %v6377_v53 = vpack.c.bf16 %v1660_v10, %v1659_v9 }
 0x151   :  { %4020 = vmatprep.subr.bf16.mxu1 %v6377_v53 }
 0x165   :  { %v744_v30 = vpop.f32.mrb[0].mxu0 }
 0x166   :  { %v1483_v39 = vmul.f32 %v744_v30, %v744_v30  ;;  %v6355_v21 = vpop.f32.mrb[0].mxu1  ;;  %v6357_v51 = vpop.f32.mrb[1].mxu0 }
 0x167   :  { %v1068_v58 = vpop.f32.mrb[1].mxu1 }
 0x168   :  { %v1531_v1 = vmul.f32 %v1068_v58, %v1068_v58 }
 0x169   :  { %v750_v2 = vpop.f32.mrb[2].mxu0 }
 0x16a   :  { %v6359_v60 = vadd.f32 %v1531_v1, %v1483_v39  ;;  %v1486_v14 = vmul.f32 %v750_v2, %v750_v2  ;;  %v6361_v61 = vpop.f32.mrb[2].mxu1  ;;  %v6363_v24 = vpop.f32.mrb[3].mxu0 }
 0x16b   :  { %v1074_v43 = vpop.f32.mrb[3].mxu1 }
 0x16c   :  { %v1534_v57 = vmul.f32 %v1074_v43, %v1074_v43 }
 0x16d   :  { %v756_v4 = vpop.f32.mrb[4].mxu0 }
 0x16e   :  { %v6371_v19 = vadd.f32 %v1534_v57, %v1486_v14  ;;  %v1489_v28 = vmul.f32 %v756_v4, %v756_v4  ;;  %v6373_v37 = vpop.f32.mrb[4].mxu1  ;;  %v6375_v46 = vpop.f32.mrb[5].mxu0 }
 0x16f   :  { %v1080_v59 = vpop.f32.mrb[5].mxu1 }
 0x170   :  { %v1537_v0 = vmul.f32 %v1080_v59, %v1080_v59 }
 0x171   :  { %v762_v6 = vpop.f32.mrb[6].mxu0 }
 0x172   :  { %v6380_v12 = vadd.f32 %v1537_v0, %v1489_v28  ;;  %v1492_v16 = vmul.f32 %v762_v6, %v762_v6  ;;  %v6382_v22 = vpop.f32.mrb[6].mxu1  ;;  %v6384_v29 = vpop.f32.mrb[7].mxu0 }
 0x173   :  { %v1086_v35 = vpop.f32.mrb[7].mxu1 }
 0x174   :  { %v1540_v41 = vmul.f32 %v1086_v35, %v1086_v35 }
 0x175   :  { %v768_v48 = vpop.f32.mrb[8].mxu0 }
 0x176   :  { %v6386_v55 = vadd.f32 %v1540_v41, %v1492_v16  ;;  %v1495_v62 = vmul.f32 %v768_v48, %v768_v48  ;;  %v6388_v26 = vpop.f32.mrb[8].mxu1  ;;  %v6390_v5 = vpop.f32.mrb[9].mxu0 }
 0x177   :  { %v1092_v13 = vpop.f32.mrb[9].mxu1 }
 0x178   :  { %v1543_v3 = vmul.f32 %v1092_v13, %v1092_v13 }
 0x179   :  { %v774_v32 = vpop.f32.mrb[10].mxu0 }
 0x17a   :  { %v6392_v15 = vadd.f32 %v1543_v3, %v1495_v62  ;;  %v1498_v11 = vmul.f32 %v774_v32, %v774_v32  ;;  %v6394_v20 = vpop.f32.mrb[10].mxu1  ;;  %v6396_v27 = vpop.f32.mrb[11].mxu0 }
 0x17b   :  { %v1098_v18 = vpop.f32.mrb[11].mxu1 }
 0x17c   :  { %v1546_v23 = vmul.f32 %v1098_v18, %v1098_v18 }
 0x17d   :  { %v780_v33 = vpop.f32.mrb[12].mxu0 }
 0x17e   :  { %v6398_v40 = vadd.f32 %v1546_v23, %v1498_v11  ;;  %v1501_v36 = vmul.f32 %v780_v33, %v780_v33  ;;  %v6400_v44 = vpop.f32.mrb[12].mxu1  ;;  %v6402_v45 = vpop.f32.mrb[13].mxu0 }
 0x17f   :  { %v1104_v25 = vpop.f32.mrb[13].mxu1 }
 0x180   :  { %v1549_v34 = vmul.f32 %v1104_v25, %v1104_v25 }
 0x181   :  { %v786_v31 = vpop.f32.mrb[14].mxu0 }
 0x182   :  { %v6404_v52 = vadd.f32 %v1549_v34, %v1501_v36  ;;  %v1504_v63 = vmul.f32 %v786_v31, %v786_v31  ;;  %v6406_v56 = vpop.f32.mrb[14].mxu1  ;;  %v6408_v38 = vpop.f32.mrb[15].mxu0 }
 0x183   :  { %v1110_v47 = vpop.f32.mrb[15].mxu1 }
 0x184   :  { %v1552_v42 = vmul.f32 %v1110_v47, %v1110_v47 }
 0x185   :  { %v792_v8 = vpop.f32.mrb[16].mxu0 }
 0x186   :  { %v6410_v17 = vadd.f32 %v1552_v42, %v1504_v63  ;;  %v1507_v50 = vmul.f32 %v792_v8, %v792_v8  ;;  %v6412_v54 = vpop.f32.mrb[16].mxu1  ;;  %v6414_v49 = vpop.f32.mrb[17].mxu0 }
 0x187   :  { %v1116_v7 = vpop.f32.mrb[17].mxu1 }
 0x188   :  { %v1555_v30 = vmul.f32 %v1116_v7, %v1116_v7 }
 0x189   :  { %v798_v39 = vpop.f32.mrb[18].mxu0 }
 0x18a   :  { %v6416_v58 = vadd.f32 %v1555_v30, %v1507_v50  ;;  %v1510_v1 = vmul.f32 %v798_v39, %v798_v39  ;;  %v6418_v2 = vpop.f32.mrb[18].mxu1  ;;  %v6420_v14 = vpop.f32.mrb[19].mxu0 }
 0x18b   :  { %v1122_v43 = vpop.f32.mrb[19].mxu1 }
 0x18c   :  { %v1558_v57 = vmul.f32 %v1122_v43, %v1122_v43 }
 0x18d   :  { %v804_v4 = vpop.f32.mrb[20].mxu0 }
 0x18e   :  { %v6422_v9 = vadd.f32 %v1558_v57, %v1510_v1  ;;  %v1513_v10 = vmul.f32 %v804_v4, %v804_v4  ;;  %v6424_v28 = vpop.f32.mrb[20].mxu1  ;;  %v6426_v59 = vpop.f32.mrb[21].mxu0 }
 0x18f   :  { %v1128_v0 = vpop.f32.mrb[21].mxu1 }
 0x190   :  { %v1561_v6 = vmul.f32 %v1128_v0, %v1128_v0 }
 0x191   :  { %v810_v16 = vpop.f32.mrb[22].mxu0 }
 0x192   :  { %v6428_v35 = vadd.f32 %v1561_v6, %v1513_v10  ;;  %v1516_v41 = vmul.f32 %v810_v16, %v810_v16  ;;  %v6430_v48 = vpop.f32.mrb[22].mxu1  ;;  %v6432_v62 = vpop.f32.mrb[23].mxu0 }
 0x193   :  { %v1134_v13 = vpop.f32.mrb[23].mxu1 }
 0x194   :  { %v1564_v3 = vmul.f32 %v1134_v13, %v1134_v13 }
 0x195   :  { %v816_v32 = vpop.f32.mrb[24].mxu0 }
 0x196   :  { %v6434_v11 = vadd.f32 %v1564_v3, %v1516_v41  ;;  %v1519_v18 = vmul.f32 %v816_v32, %v816_v32  ;;  %v6436_v23 = vpop.f32.mrb[24].mxu1  ;;  %v6438_v33 = vpop.f32.mrb[25].mxu0 }
 0x197   :  { %v1140_v36 = vpop.f32.mrb[25].mxu1 }
 0x198   :  { %v1567_v25 = vmul.f32 %v1140_v36, %v1140_v36  ;;  %v1484_v36 = vmul.f32 %v6357_v51, %v6357_v51  ;;  %v1487_v51 = vmul.f32 %v6363_v24, %v6363_v24 }
 0x199   :  { %v822_v34 = vpop.f32.mrb[26].mxu0 }
 0x19a   :  { %v6440_v31 = vadd.f32 %v1567_v25, %v1519_v18  ;;  %v1522_v63 = vmul.f32 %v822_v34, %v822_v34  ;;  %v6442_v47 = vpop.f32.mrb[26].mxu1  ;;  %v6444_v42 = vpop.f32.mrb[27].mxu0 }
 0x19b   :  { %v1146_v8 = vpop.f32.mrb[27].mxu1 }
 0x19c   :  { %v1570_v50 = vmul.f32 %v1146_v8, %v1146_v8  ;;  %v1662_v8 = vld [vmem:[%s7436_s2 + $0x118] sm:$0xff] }
 0x19d   :  { %v828_v7 = vpop.f32.mrb[28].mxu0 }
 0x19e   :  { %v6446_v30 = vadd.f32 %v1570_v50, %v1522_v63  ;;  %v1525_v39 = vmul.f32 %v828_v7, %v828_v7  ;;  %v6448_v1 = vpop.f32.mrb[28].mxu1  ;;  %v6450_v43 = vpop.f32.mrb[29].mxu0  ;;  %v1661_v63 = vld [vmem:[%s7436_s2 + $0x110] sm:$0xff]  ;;  %v1485_v50 = vmul.f32 %v6355_v21, %v6355_v21  ;;  %v1664_v21 = vld [vmem:[%s7436_s2 + $0x128] sm:$0xff] }
 0x19f   :  { %v1152_v57 = vpop.f32.mrb[29].mxu1 }
 0x1a0   :  { %v1573_v4 = vmul.f32 %v1152_v57, %v1152_v57 }
 0x1a1   :  { %v834_v10 = vpop.f32.mrb[30].mxu0 }
 0x1a2   :  { %v6452_v0 = vadd.f32 %v1573_v4, %v1525_v39  ;;  %v1528_v6 = vmul.f32 %v834_v10, %v834_v10  ;;  %v6454_v16 = vpop.f32.mrb[30].mxu1  ;;  %v6456_v41 = vpop.f32.mrb[31].mxu0  ;;  %v4023_v10 = vpack.c.bf16 %v1662_v8, %v1661_v63  ;;  %v1490_v8 = vmul.f32 %v6375_v46, %v6375_v46 }
 0x1a3   :  { %v1158_v13 = vpop.f32.mrb[31].mxu1 }
 0x1a4   :  { %v1576_v3 = vmul.f32 %v1158_v13, %v1158_v13 }
 0x1a6   :  { %v6458_v32 = vadd.f32 %v1576_v3, %v1528_v6  ;;  %v1663_v3 = vld [vmem:[%s7436_s2 + $0x120] sm:$0xff] }
 0x1a7   :  { %v4027_v63 = vpack.c.bf16 %v1664_v21, %v1663_v3 }
 0x1e5   :  { %v1388_v18 = vpop.f32.mrb[32].mxu0 }
 0x1e6   :  { %v1532_v25 = vmul.f32 %v1388_v18, %v1388_v18  ;;  %v1390_v34 = vpop.f32.mrb[33].mxu0  ;;  %v1488_v18 = vmul.f32 %v6361_v61, %v6361_v61  ;;  %v1665_v61 = vld [vmem:[%s7436_s2 + $0x130] sm:$0xff] }
 0x1e7   :  { %v1533_v7 = vmul.f32 %v1390_v34, %v1390_v34 }
 0x1e8   :  { %v1580_v39 = vadd.f32 %v1532_v25, %v1484_v36 }
 0x1e9   :  { %v6470_v57 = vadd.f32 %v1533_v7, %v1485_v50  ;;  %v1394_v4 = vpop.f32.mrb[34].mxu0 }
 0x1ea   :  { %v1535_v6 = vmul.f32 %v1394_v4, %v1394_v4  ;;  %v1396_v13 = vpop.f32.mrb[35].mxu0  ;;  %1739 = vmatprep.mubr.f32.mxu1 %v1580_v39 }
 0x1eb   :  { %v1536_v36 = vmul.f32 %v1396_v13, %v1396_v13  ;;  %1740 = vmatmul.mubr.f32.vlgmr.msra.gmra.mrb[32].mxu1 %v6359_v60  ;;  %v1666_v60 = vld [vmem:[%s7436_s2 + $0x138] sm:$0xff]  ;;  %v1493_v13 = vmul.f32 %v6384_v29, %v6384_v29 }
 0x1ec   :  { %v1583_v25 = vadd.f32 %v1535_v6, %v1487_v51  ;;  %4022 = vmatpush3.bf16.msra.mxu1 %v6377_v53  ;;  %v1491_v53 = vmul.f32 %v6373_v37, %v6373_v37  ;;  %v4031_v6 = vpack.c.bf16 %v1666_v60, %v1665_v61  ;;  %v1667_v37 = vld [vmem:[%s7436_s2 + $0x140] sm:$0xff] }
 0x1ed   :  { %v6484_v24 = vadd.f32 %v1536_v36, %v1488_v18  ;;  %v1400_v34 = vpop.f32.mrb[36].mxu0  ;;  %4024 = vmatprep.subr.bf16.mxu1 %v4023_v10 }
 0x1ee   :  { %v1538_v50 = vmul.f32 %v1400_v34, %v1400_v34  ;;  %v1402_v7 = vpop.f32.mrb[37].mxu0  ;;  %1744 = vmatprep.mubr.f32.mxu1 %v1583_v25 }
 0x1ef   :  { %v1539_v39 = vmul.f32 %v1402_v7, %v1402_v7  ;;  %1745 = vmatmul.mubr.f32.gmra.mrb[34].mxu1 %v6371_v19  ;;  %v1668_v19 = vld [vmem:[%s7436_s2 + $0x148] sm:$0xff] }
 0x1f0   :  { %v1586_v4 = vadd.f32 %v1538_v50, %v1490_v8  ;;  %4026 = vmatpush3.bf16.msra.mxu1 %v4023_v10  ;;  %v1494_v10 = vmul.f32 %v6382_v22, %v6382_v22  ;;  %v4035_v34 = vpack.c.bf16 %v1668_v19, %v1667_v37  ;;  %v1496_v8 = vmul.f32 %v6390_v5, %v6390_v5  ;;  %v1669_v22 = vld [vmem:[%s7436_s2 + $0x150] sm:$0xff] }
 0x1f1   :  { %v6497_v46 = vadd.f32 %v1539_v39, %v1491_v53  ;;  %v1406_v51 = vpop.f32.mrb[38].mxu0  ;;  %4028 = vmatprep.subr.bf16.mxu1 %v4027_v63 }
 0x1f2   :  { %v1541_v3 = vmul.f32 %v1406_v51, %v1406_v51  ;;  %v1408_v21 = vpop.f32.mrb[39].mxu0  ;;  %1749 = vmatprep.mubr.f32.mxu1 %v1586_v4  ;;  %v1499_v4 = vmul.f32 %v6396_v27, %v6396_v27 }
 0x1f3   :  { %v1542_v18 = vmul.f32 %v1408_v21, %v1408_v21  ;;  %1750 = vmatmul.mubr.f32.gmra.mrb[36].mxu1 %v6380_v12  ;;  %v1670_v12 = vld [vmem:[%s7436_s2 + $0x158] sm:$0xff] }
 0x1f4   :  { %v1589_v36 = vadd.f32 %v1541_v3, %v1493_v13  ;;  %4030 = vmatpush3.bf16.msra.mxu1 %v4027_v63  ;;  %v1497_v63 = vmul.f32 %v6388_v26, %v6388_v26  ;;  %v4039_v39 = vpack.c.bf16 %v1670_v12, %v1669_v22  ;;  %v1671_v26 = vld [vmem:[%s7436_s2 + $0x160] sm:$0xff]  ;;  %v1505_v22 = vmul.f32 %v6408_v38, %v6408_v38 }
 0x1f5   :  { %v6510_v29 = vadd.f32 %v1542_v18, %v1494_v10  ;;  %v1412_v25 = vpop.f32.mrb[40].mxu0  ;;  %4032 = vmatprep.subr.bf16.mxu1 %v4031_v6  ;;  %v1502_v10 = vmul.f32 %v6402_v45, %v6402_v45 }
 0x1f6   :  { %v1544_v50 = vmul.f32 %v1412_v25, %v1412_v25  ;;  %v1414_v7 = vpop.f32.mrb[41].mxu0  ;;  %1754 = vmatprep.mubr.f32.mxu1 %v1589_v36  ;;  %v1503_v25 = vmul.f32 %v6400_v44, %v6400_v44 }
 0x1f7   :  { %v1545_v61 = vmul.f32 %v1414_v7, %v1414_v7  ;;  %1755 = vmatmul.mubr.f32.gmra.mrb[38].mxu1 %v6386_v55  ;;  %v1672_v55 = vld [vmem:[%s7436_s2 + $0x168] sm:$0xff] }
 0x1f8   :  { %v1592_v60 = vadd.f32 %v1544_v50, %v1496_v8  ;;  %4034 = vmatpush3.bf16.msra.mxu1 %v4031_v6  ;;  %v1500_v6 = vmul.f32 %v6394_v20, %v6394_v20  ;;  %v4043_v19 = vpack.c.bf16 %v1672_v55, %v1671_v26  ;;  %v1673_v20 = vld [vmem:[%s7436_s2 + $0x170] sm:$0xff]  ;;  %v1511_v55 = vmul.f32 %v6420_v14, %v6420_v14 }
 0x1f9   :  { %v6523_v5 = vadd.f32 %v1545_v61, %v1497_v63  ;;  %v1418_v53 = vpop.f32.mrb[42].mxu0  ;;  %4036 = vmatprep.subr.bf16.mxu1 %v4035_v34  ;;  %v1506_v61 = vmul.f32 %v6406_v56, %v6406_v56  ;;  %v1515_v14 = vmul.f32 %v6424_v28, %v6424_v28 }
 0x1fa   :  { %v1547_v51 = vmul.f32 %v1418_v53, %v1418_v53  ;;  %v1420_v13 = vpop.f32.mrb[43].mxu0  ;;  %1759 = vmatprep.mubr.f32.mxu1 %v1592_v60 }
 0x1fb   :  { %v1548_v3 = vmul.f32 %v1420_v13, %v1420_v13  ;;  %1760 = vmatmul.mubr.f32.gmra.mrb[40].mxu1 %v6392_v15  ;;  %v1674_v15 = vld [vmem:[%s7436_s2 + $0x178] sm:$0xff]  ;;  %s7439_s2 = sld [smem:[#allocation11_spill]] }
 0x1fc   :  { %v1595_v21 = vadd.f32 %v1547_v51, %v1499_v4  ;;  %4038 = vmatpush3.bf16.msra.mxu1 %v4035_v34  ;;  %v4047_v7 = vpack.c.bf16 %v1674_v15, %v1673_v20  ;;  %v1509_v51 = vmul.f32 %v6412_v54, %v6412_v54 }
 0x1fd   :  { %v6536_v27 = vadd.f32 %v1548_v3, %v1500_v6  ;;  %v1424_v37 = vpop.f32.mrb[44].mxu0  ;;  %4040 = vmatprep.subr.bf16.mxu1 %v4039_v39 }
 0x1fe   :  { %v1550_v18 = vmul.f32 %v1424_v37, %v1424_v37  ;;  %v1426_v36 = vpop.f32.mrb[45].mxu0  ;;  %1764 = vmatprep.mubr.f32.mxu1 %v1595_v21 }
 0x1ff   :  { %v1551_v34 = vmul.f32 %v1426_v36, %v1426_v36  ;;  %1765 = vmatmul.mubr.f32.gmra.mrb[42].mxu1 %v6398_v40 }
 0x200   :  { %v1598_v8 = vadd.f32 %v1550_v18, %v1502_v10  ;;  %4042 = vmatpush3.bf16.msra.mxu1 %v4039_v39  ;;  %v1508_v39 = vmul.f32 %v6414_v49, %v6414_v49  ;;  %v1512_v49 = vmul.f32 %v6418_v2, %v6418_v2 }
 0x201   :  { %v6549_v45 = vadd.f32 %v1551_v34, %v1503_v25  ;;  %v1430_v50 = vpop.f32.mrb[46].mxu0  ;;  %4044 = vmatprep.subr.bf16.mxu1 %v4043_v19 }
 0x202   :  { %v1553_v12 = vmul.f32 %v1430_v50, %v1430_v50  ;;  %v1432_v63 = vpop.f32.mrb[47].mxu0  ;;  %1769 = vmatprep.mubr.f32.mxu1 %v1598_v8 }
 0x203   :  { %v1554_v44 = vmul.f32 %v1432_v63, %v1432_v63  ;;  %1770 = vmatmul.mubr.f32.gmra.mrb[44].mxu1 %v6404_v52 }
 0x204   :  { %v1601_v40 = vadd.f32 %v1553_v12, %v1505_v22  ;;  %4046 = vmatpush3.bf16.msra.mxu1 %v4043_v19  ;;  %v1514_v19 = vmul.f32 %v6426_v59, %v6426_v59  ;;  %v1518_v59 = vmul.f32 %v6430_v48, %v6430_v48 }
 0x205   :  { %v6556_v60 = vadd.f32 %v1554_v44, %v1506_v61  ;;  %v1436_v53 = vpop.f32.mrb[48].mxu0  ;;  %4048 = vmatprep.subr.bf16.mxu1 %v4047_v7 }
 0x206   :  { %v1556_v4 = vmul.f32 %v1436_v53, %v1436_v53  ;;  %v1438_v38 = vpop.f32.mrb[49].mxu0  ;;  %1774 = vmatprep.mubr.f32.mxu1 %v1601_v40 }
 0x207   :  { %v1557_v13 = vmul.f32 %v1438_v38, %v1438_v38  ;;  %1775 = vmatmul.mubr.f32.gmra.mrb[46].mxu1 %v6410_v17 }
 0x208   :  { %v1604_v56 = vadd.f32 %v1556_v4, %v1508_v39  ;;  %4050 = vmatpush3.bf16.msra.mxu1 %v4047_v7 }
 0x209   :  { %v6563_v52 = vadd.f32 %v1557_v13, %v1509_v51  ;;  %v1442_v26 = vpop.f32.mrb[50].mxu0 }
 0x20a   :  { %v1559_v6 = vmul.f32 %v1442_v26, %v1442_v26  ;;  %v1444_v3 = vpop.f32.mrb[51].mxu0  ;;  %1779 = vmatprep.mubr.f32.mxu1 %v1604_v56 }
 0x20b   :  { %v1560_v21 = vmul.f32 %v1444_v3, %v1444_v3  ;;  %1780 = vmatmul.mubr.f32.gmra.mrb[48].mxu1 %v6416_v58  ;;  %v1517_v58 = vmul.f32 %v6432_v62, %v6432_v62  ;;  %v1521_v62 = vmul.f32 %v6436_v23, %v6436_v23 }
 0x20c   :  { %v1607_v54 = vadd.f32 %v1559_v6, %v1511_v55 }
 0x20d   :  { %v6570_v37 = vadd.f32 %v1560_v21, %v1512_v49  ;;  %v1448_v17 = vpop.f32.mrb[52].mxu0 }
 0x20e   :  { %v1562_v10 = vmul.f32 %v1448_v17, %v1448_v17  ;;  %v1450_v18 = vpop.f32.mrb[53].mxu0  ;;  %1784 = vmatprep.mubr.f32.mxu1 %v1607_v54  ;;  %v2061_v54 = vld [vmem:[%s7437_s1 + $0xa8] sm:$0xff]  ;;  %v2044_v17 = vld [vmem:[%s7437_s1 + $0x20] sm:$0xff] }
 0x20f   :  { %v1563_v36 = vmul.f32 %v1450_v18, %v1450_v18  ;;  %1785 = vmatmul.mubr.f32.gmra.mrb[50].mxu1 %v6422_v9  ;;  %v1520_v9 = vmul.f32 %v6438_v33, %v6438_v33  ;;  %v1524_v33 = vmul.f32 %v6442_v47, %v6442_v47  ;;  %v2062_v18 = vld [vmem:[%s7437_s1 + $0xb0] sm:$0xff] }
 0x210   :  { %v1610_v2 = vadd.f32 %v1562_v10, %v1514_v19  ;;  %v2045_v19 = vld [vmem:[%s7437_s1 + $0x28] sm:$0xff] }
 0x211   :  { %v1611_v20 = vadd.f32 %v1563_v36, %v1515_v14  ;;  %v1454_v15 = vpop.f32.mrb[54].mxu0  ;;  %v4085_v10 = vpack.c.bf16 %v2045_v19, %v2044_v17  ;;  %v2063_v14 = vld [vmem:[%s7437_s1 + $0xb8] sm:$0xff] }
 0x212   :  { %v1565_v25 = vmul.f32 %v1454_v15, %v1454_v15  ;;  %v1456_v34 = vpop.f32.mrb[55].mxu0  ;;  %1789 = vmatprep.mubr.f32.mxu1 %v1610_v2  ;;  %v4087_v36 = vpack.c.bf16 %v2063_v14, %v2062_v18  ;;  %v2046_v2 = vld [vmem:[%s7437_s1 + $0x30] sm:$0xff] }
 0x213   :  { %v1566_v8 = vmul.f32 %v1456_v34, %v1456_v34  ;;  %1790 = vmatmul.mubr.f32.gmra.mrb[52].mxu1 %v6428_v35  ;;  %v1523_v35 = vmul.f32 %v6444_v42, %v6444_v42  ;;  %v1527_v42 = vmul.f32 %v6448_v1, %v6448_v1  ;;  %v2048_v34 = vld [vmem:[%s7437_s1 + $0x40] sm:$0xff] }
 0x214   :  { %v1613_v50 = vadd.f32 %v1565_v25, %v1517_v58  ;;  %v2064_v58 = vld [vmem:[%s7437_s1 + $0xc0] sm:$0xff]  ;;  %v2065_v25 = vld [vmem:[%s7437_s1 + $0xc8] sm:$0xff] }
 0x215   :  { %v1614_v28 = vadd.f32 %v1566_v8, %v1518_v59  ;;  %v1460_v7 = vpop.f32.mrb[56].mxu0  ;;  %v4091_v59 = vpack.c.bf16 %v2065_v25, %v2064_v58  ;;  %v2049_v8 = vld [vmem:[%s7437_s1 + $0x48] sm:$0xff] }
 0x216   :  { %v1568_v22 = vmul.f32 %v1460_v7, %v1460_v7  ;;  %v1462_v12 = vpop.f32.mrb[57].mxu0  ;;  %1794 = vmatprep.mubr.f32.mxu1 %v1613_v50  ;;  %v4496_v50 = vmov 0.0   ;;  %v2066_v7 = vld [vmem:[%s7437_s1 + $0xd0] sm:$0xff] }
 0x217   :  { %v1569_v63 = vmul.f32 %v1462_v12, %v1462_v12  ;;  %1795 = vmatmul.mubr.f32.gmra.mrb[54].mxu1 %v6434_v11  ;;  %v1526_v11 = vmul.f32 %v6450_v43, %v6450_v43  ;;  %v1530_v43 = vmul.f32 %v6454_v16, %v6454_v16 }
 0x218   :  { %v1616_v61 = vadd.f32 %v1568_v22, %v1520_v9  ;;  %v2067_v9 = vld [vmem:[%s7437_s1 + $0xd8] sm:$0xff]  ;;  %v2050_v22 = vld [vmem:[%s7437_s1 + $0x50] sm:$0xff] }
 0x219   :  { %v1617_v48 = vadd.f32 %v1569_v63, %v1521_v62  ;;  %v1466_v44 = vpop.f32.mrb[58].mxu0  ;;  %v4095_v12 = vpack.c.bf16 %v2067_v9, %v2066_v7  ;;  %v2051_v62 = vld [vmem:[%s7437_s1 + $0x58] sm:$0xff] }
 0x21a   :  { %v1571_v40 = vmul.f32 %v1466_v44, %v1466_v44  ;;  %v1468_v53 = vpop.f32.mrb[59].mxu0  ;;  %1799 = vmatprep.mubr.f32.mxu1 %v1616_v61  ;;  %v4097_v63 = vpack.c.bf16 %v2051_v62, %v2050_v22  ;;  %v2068_v61 = vld [vmem:[%s7437_s1 + $0xe0] sm:$0xff] }
 0x21b   :  { %v1572_v39 = vmul.f32 %v1468_v53, %v1468_v53  ;;  %1800 = vmatmul.mubr.f32.gmra.mrb[56].mxu1 %v6440_v31  ;;  %v1529_v31 = vmul.f32 %v6456_v41, %v6456_v41  ;;  %v2040_v41 = vld [vmem:[%s7437_s1] sm:$0xff] }
 0x21c   :  { %v1619_v4 = vadd.f32 %v1571_v40, %v1523_v35  ;;  %v2052_v44 = vld [vmem:[%s7437_s1 + $0x60] sm:$0xff]  ;;  %v2053_v40 = vld [vmem:[%s7437_s1 + $0x68] sm:$0xff] }
 0x21d   :  { %v1620_v23 = vadd.f32 %v1572_v39, %v1524_v33  ;;  %v1472_v38 = vpop.f32.mrb[60].mxu0  ;;  %v4101_v53 = vpack.c.bf16 %v2053_v40, %v2052_v44  ;;  %v2070_v33 = vld [vmem:[%s7437_s1 + $0xf0] sm:$0xff]  ;;  %v2071_v39 = vld [vmem:[%s7437_s1 + $0xf8] sm:$0xff] }
 0x21e   :  { %v1574_v51 = vmul.f32 %v1472_v38, %v1472_v38  ;;  %v1474_v13 = vpop.f32.mrb[61].mxu0  ;;  %1804 = vmatprep.mubr.f32.mxu1 %v1619_v4  ;;  %v2054_v4 = vld [vmem:[%s7437_s1 + $0x70] sm:$0xff]  ;;  %v2055_v38 = vld [vmem:[%s7437_s1 + $0x78] sm:$0xff] }
 0x21f   :  { %v1575_v56 = vmul.f32 %v1474_v13, %v1474_v13  ;;  %1805 = vmatmul.mubr.f32.gmra.mrb[58].mxu1 %v6446_v30  ;;  %v2056_v30 = vld [vmem:[%s7437_s1 + $0x80] sm:$0xff] }
 0x220   :  { %v1622_v26 = vadd.f32 %v1574_v51, %v1526_v11  ;;  %v4105_v11 = vpack.c.bf16 %v2055_v38, %v2054_v4  ;;  %v2037_v51 = vld [vmem:[%s7438_s25 + $0x8] sm:$0xff] }
 0x221   :  { %v1623_v47 = vadd.f32 %v1575_v56, %v1527_v42  ;;  %v1478_v55 = vpop.f32.mrb[62].mxu0  ;;  %2175 = vmatprep.mubr.f32.mxu0 %v2037_v51 }
 0x222   :  { %v1577_v6 = vmul.f32 %v1478_v55, %v1478_v55  ;;  %v1480_v3 = vpop.f32.mrb[63].mxu0  ;;  %1809 = vmatprep.mubr.f32.mxu1 %v1622_v26  ;;  %v2036_v26 = vld [vmem:[%s7438_s25] sm:$0xff] }
 0x223   :  { %v1578_v49 = vmul.f32 %v1480_v3, %v1480_v3  ;;  %1810 = vmatmul.mubr.f32.gmra.mrb[60].mxu1 %v6452_v0  ;;  %v2057_v0 = vld [vmem:[%s7437_s1 + $0x88] sm:$0xff] }
 0x224   :  { %v1625_v21 = vadd.f32 %v1577_v6, %v1529_v31  ;;  %v4075_v16 = vpack.c.bf16 %v2057_v0, %v2056_v30 }
 0x225   :  { %v1626_v1 = vadd.f32 %v1578_v49, %v1530_v43 }
 0x226   :  { %1814 = vmatprep.mubr.f32.mxu1 %v1625_v21  ;;  %4076 = vmatprep.subr.bf16.mxu0 %v4075_v16 }
 0x227   :  { %1815 = vmatmul.mubr.f32.gmra.mrb[62].mxu1 %v6458_v32  ;;  %v2041_v32 = vld [vmem:[%s7437_s1 + $0x8] sm:$0xff] }
 0x228   :  { %3369 = vmatprep.mubr.f32.mxu1 %v6470_v57  ;;  %v4077_v57 = vpack.c.bf16 %v2041_v32, %v2040_v41 }
 0x22a   :  { %4078 = vmatpush3.bf16.msra.mxu0 %v4077_v57 }
 0x22b   :  { %3370 = vmatmul.mubr.f32.vlgmr.msra.gmra.mrb[64].mxu1 %v6484_v24  ;;  %v4494_v24 = vmov 0.0|0.0  }
 0x22c   :  { %3372 = vmatprep.mubr.f32.mxu1 %v6497_v46  ;;  %4051 = vmatprep.subr.bf16.mxu1 %v4494_v24  ;;  %v2058_v46 = vld [vmem:[%s7437_s1 + $0x90] sm:$0xff] }
 0x22f   :  { %3373 = vmatmul.mubr.f32.gmra.mrb[66].mxu1 %v6510_v29  ;;  %v2059_v29 = vld [vmem:[%s7437_s1 + $0x98] sm:$0xff] }
 0x230   :  { %3375 = vmatprep.mubr.f32.mxu1 %v6523_v5  ;;  %v4079_v5 = vpack.c.bf16 %v2059_v29, %v2058_v46 }
 0x232   :  { %4080 = vmatprep.subr.bf16.mxu0 %v4079_v5 }
 0x233   :  { %3376 = vmatmul.mubr.f32.gmra.mrb[68].mxu1 %v6536_v27  ;;  %v2042_v27 = vld [vmem:[%s7437_s1 + $0x10] sm:$0xff] }
 0x234   :  { %3378 = vmatprep.mubr.f32.mxu1 %v6549_v45  ;;  %v2043_v45 = vld [vmem:[%s7437_s1 + $0x18] sm:$0xff] }
 0x237   :  { %3379 = vmatmul.mubr.f32.gmra.mrb[70].mxu1 %v6556_v60  ;;  %v4081_v60 = vpack.c.bf16 %v2043_v45, %v2042_v27 }
 0x238   :  { %3381 = vmatprep.mubr.f32.mxu1 %v6563_v52  ;;  %v2060_v52 = vld [vmem:[%s7437_s1 + $0xa0] sm:$0xff] }
 0x239   :  { %4082 = vmatpush3.bf16.msra.mxu0 %v4081_v60 }
 0x23b   :  { %3382 = vmatmul.mubr.f32.gmra.mrb[72].mxu1 %v6570_v37  ;;  %v4083_v37 = vpack.c.bf16 %v2061_v54, %v2060_v52 }
 0x23c   :  { %3384 = vmatprep.mubr.f32.mxu1 %v1611_v20  ;;  %v2047_v20 = vld [vmem:[%s7437_s1 + $0x38] sm:$0xff] }
 0x23d   :  { %4084 = vmatprep.subr.bf16.mxu0 %v4083_v37  ;;  %v4089_v15 = vpack.c.bf16 %v2047_v20, %v2046_v2 }
 0x23e   :  { %4086 = vmatpush3.bf16.msra.mxu0 %v4085_v10 }
 0x23f   :  { %3385 = vmatmul.mubr.f32.gmra.mrb[74].mxu1 %v1614_v28  ;;  %4088 = vmatprep.subr.bf16.mxu0 %v4087_v36  ;;  %v4093_v28 = vpack.c.bf16 %v2049_v8, %v2048_v34 }
 0x240   :  { %3387 = vmatprep.mubr.f32.mxu1 %v1617_v48  ;;  %v2069_v48 = vld [vmem:[%s7437_s1 + $0xe8] sm:$0xff] }
 0x241   :  { %v4099_v35 = vpack.c.bf16 %v2069_v48, %v2068_v61 }
 0x242   :  { %4090 = vmatpush3.bf16.msra.mxu0 %v4089_v15 }
 0x243   :  { %3388 = vmatmul.mubr.f32.gmra.mrb[76].mxu1 %v1620_v23  ;;  %4092 = vmatprep.subr.bf16.mxu0 %v4091_v59  ;;  %v4103_v23 = vpack.c.bf16 %v2071_v39, %v2070_v33 }
 0x244   :  { %3390 = vmatprep.mubr.f32.mxu1 %v1623_v47 }
 0x246   :  { %4094 = vmatpush3.bf16.msra.mxu0 %v4093_v28 }
 0x247   :  { %3391 = vmatmul.mubr.f32.gmra.mrb[78].mxu1 %v1626_v1  ;;  %4096 = vmatprep.subr.bf16.mxu0 %v4095_v12 }
 0x248   :  { %3425 = vmatprep.mubr.msk.f32.mxu1 %vm4495_vm0, %v4496_v50 }
 0x24a   :  { %4098 = vmatpush3.bf16.msra.mxu0 %v4097_v63 }
 0x24b   :  { %4100 = vmatprep.subr.bf16.mxu0 %v4099_v35 }
 0x24e   :  { %4102 = vmatpush3.bf16.msra.mxu0 %v4101_v53 }
 0x24f   :  { %4104 = vmatprep.subr.bf16.mxu0 %v4103_v23 }
 0x252   :  { %4106 = vmatpush3.bf16.msra.mxu0 %v4105_v11 }
 0x253   :  { %4139 = vmatprep.subr.bf16.mxu0 %v4494_v24 }
 0x255   :  { %2176 = vmatmul.mubr.f32.vlgmr.msra.gmra.mrb[64].mxu0 %v2036_v26 }
 0x256   :  { %3460 = vmatprep.mubr.msk.f32.mxu0 %vm4495_vm0, %v4496_v50 }
 0x2be   :  { %v3085_v13 = vpop.f32.mrb[32].mxu1 }
 0x2bf   :  { %v3086_v42 = vpop.f32.mrb[33].mxu1 }
 0x2c0   :  { %v3087_v56 = vadd.f32 %v3086_v42, %v3085_v13 }
 0x2c2   :  { %v3088_v47 = vpop.f32.mrb[34].mxu1 }
 0x2c3   :  { %v3089_v55 = vpop.f32.mrb[35].mxu1 }
 0x2c4   :  { %v3090_v31 = vadd.f32 %v3089_v55, %v3088_v47 }
 0x2c6   :  { %v3091_v6 = vpop.f32.mrb[36].mxu1 }
 0x2c7   :  { %v3092_v3 = vpop.f32.mrb[37].mxu1 }
 0x2c8   :  { %v3093_v43 = vadd.f32 %v3092_v3, %v3091_v6 }
 0x2ca   :  { %v3094_v49 = vpop.f32.mrb[38].mxu1 }
 0x2cb   :  { %v3095_v21 = vpop.f32.mrb[39].mxu1 }
 0x2cc   :  { %v3096_v1 = vadd.f32 %v3095_v21, %v3094_v49 }
 0x2ce   :  { %v3097_v30 = vpop.f32.mrb[40].mxu1 }
 0x2cf   :  { %v3098_v0 = vpop.f32.mrb[41].mxu1 }
 0x2d0   :  { %v3099_v16 = vadd.f32 %v3098_v0, %v3097_v30 }
 0x2d2   :  { %v3100_v41 = vpop.f32.mrb[42].mxu1 }
 0x2d3   :  { %v3101_v32 = vpop.f32.mrb[43].mxu1 }
 0x2d4   :  { %v3102_v57 = vadd.f32 %v3101_v32, %v3100_v41 }
 0x2d6   :  { %v3103_v46 = vpop.f32.mrb[44].mxu1 }
 0x2d7   :  { %v3104_v29 = vpop.f32.mrb[45].mxu1 }
 0x2d8   :  { %v3105_v5 = vadd.f32 %v3104_v29, %v3103_v46 }
 0x2da   :  { %v3106_v27 = vpop.f32.mrb[46].mxu1 }
 0x2db   :  { %v3107_v45 = vpop.f32.mrb[47].mxu1 }
 0x2dc   :  { %v3108_v60 = vadd.f32 %v3107_v45, %v3106_v27  ;;  %v2088_v45 = vld [vmem:[%s7437_s1 + $0x180] sm:$0xff] }
 0x2de   :  { %v3109_v52 = vpop.f32.mrb[48].mxu1 }
 0x2df   :  { %v3110_v54 = vpop.f32.mrb[49].mxu1 }
 0x2e0   :  { %v3111_v37 = vadd.f32 %v3110_v54, %v3109_v52 }
 0x2e2   :  { %v3112_v17 = vpop.f32.mrb[50].mxu1 }
 0x2e3   :  { %v3113_v19 = vpop.f32.mrb[51].mxu1 }
 0x2e4   :  { %v3114_v10 = vadd.f32 %v3113_v19, %v3112_v17  ;;  %v2072_v19 = vld [vmem:[%s7437_s1 + $0x100] sm:$0xff] }
 0x2e6   :  { %v3115_v18 = vpop.f32.mrb[52].mxu1 }
 0x2e7   :  { %v3116_v14 = vpop.f32.mrb[53].mxu1 }
 0x2e8   :  { %v3117_v36 = vadd.f32 %v3116_v14, %v3115_v18  ;;  %v2090_v14 = vld [vmem:[%s7437_s1 + $0x190] sm:$0xff] }
 0x2ea   :  { %v3118_v2 = vpop.f32.mrb[54].mxu1 }
 0x2eb   :  { %v3119_v20 = vpop.f32.mrb[55].mxu1 }
 0x2ec   :  { %v3120_v15 = vadd.f32 %v3119_v20, %v3118_v2  ;;  %v1965_v2 = vld [vmem:[%s7439_s2] sm:$0xff]  ;;  %s7440_s2 = sld [smem:[#allocation15_spill]] }
 0x2ee   :  { %v3121_v58 = vpop.f32.mrb[56].mxu1 }
 0x2ef   :  { %v3122_v25 = vpop.f32.mrb[57].mxu1 }
 0x2f0   :  { %v3123_v34 = vadd.f32 %v3122_v25, %v3121_v58  ;;  %v2074_v58 = vld [vmem:[%s7437_s1 + $0x110] sm:$0xff]  ;;  %v2075_v25 = vld [vmem:[%s7437_s1 + $0x118] sm:$0xff] }
 0x2f2   :  { %v3124_v59 = vpop.f32.mrb[58].mxu1 }
 0x2f3   :  { %v3125_v8 = vpop.f32.mrb[59].mxu1 }
 0x2f4   :  { %v3126_v28 = vadd.f32 %v3125_v8, %v3124_v59  ;;  %v2092_v59 = vld [vmem:[%s7437_s1 + $0x1a0] sm:$0xff]  ;;  %v2093_v8 = vld [vmem:[%s7437_s1 + $0x1a8] sm:$0xff] }
 0x2f6   :  { %v3127_v7 = vpop.f32.mrb[60].mxu1 }
 0x2f7   :  { %v3128_v9 = vpop.f32.mrb[61].mxu1 }
 0x2f8   :  { %v3129_v22 = vadd.f32 %v3128_v9, %v3127_v7  ;;  %v4115_v7 = vpack.c.bf16 %v2093_v8, %v2092_v59  ;;  %v2076_v9 = vld [vmem:[%s7437_s1 + $0x120] sm:$0xff] }
 0x2f9   :  { %v2260_v8 = vld [vmem:[%s7405_s8 + $0x40] sm:$0xff] }
 0x2fa   :  { %v3130_v12 = vpop.f32.mrb[62].mxu1 }
 0x2fb   :  { %v3131_v62 = vpop.f32.mrb[63].mxu1 }
 0x2fc   :  { %v3132_v63 = vadd.f32 %v3131_v62, %v3130_v12  ;;  %v2094_v12 = vld [vmem:[%s7437_s1 + $0x1b0] sm:$0xff]  ;;  %v2095_v62 = vld [vmem:[%s7437_s1 + $0x1b8] sm:$0xff] }
 0x2fe   :  { %v3371_v61 = vpop.f32.mrb[64].mxu1 }
 0x2ff   :  { %v1892_v48 = vadd.f32 %v3371_v61, %v3090_v31  ;;  %v1886_v44 = vpop.f32.mrb[65].mxu1  ;;  %v4119_v61 = vpack.c.bf16 %v2095_v62, %v2094_v12  ;;  %v2262_v62 = vld [vmem:[%s7405_s8 + $0x50] sm:$0xff] }
 0x300   :  { %v1887_v35 = vadd.f32 %v3087_v56, %v1886_v44  ;;  %v2079_v44 = vld [vmem:[%s7437_s1 + $0x138] sm:$0xff] }
 0x302   :  { %v4052_v40 = vpack.c.bf16 %v1892_v48, %v1887_v35  ;;  %v3374_v53 = vpop.f32.mrb[66].mxu1  ;;  %v2078_v48 = vld [vmem:[%s7437_s1 + $0x130] sm:$0xff]  ;;  %v2096_v35 = vld [vmem:[%s7437_s1 + $0x1c0] sm:$0xff] }
 0x303   :  { %v1902_v33 = vadd.f32 %v3374_v53, %v3096_v1  ;;  %v1896_v39 = vpop.f32.mrb[67].mxu1  ;;  %v4121_v53 = vpack.c.bf16 %v2079_v44, %v2078_v48  ;;  %v2356_v48 = vld [vmem:[%s7407_s10 + $0x58] sm:$0xff] }
 0x304   :  { %v1897_v4 = vadd.f32 %v3093_v43, %v1896_v39  ;;  %4053 = vmatpush3.bf16.msra.mxu1 %v4052_v40  ;;  %v2097_v40 = vld [vmem:[%s7437_s1 + $0x1c8] sm:$0xff]  ;;  %v2080_v39 = vld [vmem:[%s7437_s1 + $0x140] sm:$0xff] }
 0x305   :  { %4054 = vmatprep.subr.bf16.mxu1 %v4494_v24 }
 0x306   :  { %v4055_v23 = vpack.c.bf16 %v1902_v33, %v1897_v4  ;;  %v3377_v38 = vpop.f32.mrb[68].mxu1  ;;  %v4123_v33 = vpack.c.bf16 %v2097_v40, %v2096_v35  ;;  %v2081_v4 = vld [vmem:[%s7437_s1 + $0x148] sm:$0xff] }
 0x307   :  { %v1912_v11 = vadd.f32 %v3377_v38, %v3102_v57  ;;  %v1906_v51 = vpop.f32.mrb[69].mxu1  ;;  %v2099_v38 = vld [vmem:[%s7437_s1 + $0x1d8] sm:$0xff] }
 0x308   :  { %v1907_v13 = vadd.f32 %v3099_v16, %v1906_v51  ;;  %4056 = vmatpush3.bf16.msra.mxu1 %v4055_v23  ;;  %v2098_v23 = vld [vmem:[%s7437_s1 + $0x1d0] sm:$0xff] }
 0x309   :  { %4057 = vmatprep.subr.bf16.mxu1 %v4494_v24  ;;  %v4127_v51 = vpack.c.bf16 %v2099_v38, %v2098_v23  ;;  %v2357_v23 = vld [vmem:[%s7407_s10 + $0x60] sm:$0xff]  ;;  %v2358_v38 = vld [vmem:[%s7407_s10 + $0x68] sm:$0xff] }
 0x30a   :  { %v4058_v42 = vpack.c.bf16 %v1912_v11, %v1907_v13  ;;  %v3380_v26 = vpop.f32.mrb[70].mxu1  ;;  %v4125_v11 = vpack.c.bf16 %v2081_v4, %v2080_v39  ;;  %v2082_v13 = vld [vmem:[%s7437_s1 + $0x150] sm:$0xff] }
 0x30b   :  { %v1922_v47 = vadd.f32 %v3380_v26, %v3108_v60  ;;  %v1916_v56 = vpop.f32.mrb[71].mxu1  ;;  %v2089_v60 = vld [vmem:[%s7437_s1 + $0x188] sm:$0xff]  ;;  %v2100_v26 = vld [vmem:[%s7437_s1 + $0x1e0] sm:$0xff] }
 0x30c   :  { %v1917_v55 = vadd.f32 %v3105_v5, %v1916_v56  ;;  %4059 = vmatpush3.bf16.msra.mxu1 %v4058_v42  ;;  %v4107_v17 = vpack.c.bf16 %v2089_v60, %v2088_v45  ;;  %v2083_v42 = vld [vmem:[%s7437_s1 + $0x158] sm:$0xff]  ;;  %v2347_v60 = vld [vmem:[%s7407_s10 + $0x10] sm:$0xff] }
 0x30d   :  { %4060 = vmatprep.subr.bf16.mxu1 %v4494_v24  ;;  %v4129_v56 = vpack.c.bf16 %v2083_v42, %v2082_v13  ;;  %v2266_v13 = vld [vmem:[%s7405_s8 + $0x70] sm:$0xff]  ;;  %v2267_v42 = vld [vmem:[%s7405_s8 + $0x78] sm:$0xff] }
 0x30e   :  { %v4061_v31 = vpack.c.bf16 %v1922_v47, %v1917_v55  ;;  %v3383_v6 = vpop.f32.mrb[72].mxu1  ;;  %v2101_v47 = vld [vmem:[%s7437_s1 + $0x1e8] sm:$0xff] }
 0x30f   :  { %v1932_v3 = vadd.f32 %v3383_v6, %v3114_v10  ;;  %v1926_v43 = vpop.f32.mrb[73].mxu1  ;;  %v2073_v10 = vld [vmem:[%s7437_s1 + $0x108] sm:$0xff]  ;;  %v4131_v55 = vpack.c.bf16 %v2101_v47, %v2100_v26  ;;  %v4161_v26 = vpack.c.bf16 %v2267_v42, %v2266_v13  ;;  %v2359_v47 = vld [vmem:[%s7407_s10 + $0x70] sm:$0xff]  ;;  %v2549_v42 = vld [vmem:[%s7411_s14 + $0x58] sm:$0xff] }
 0x310   :  { %v1927_v49 = vadd.f32 %v3111_v37, %v1926_v43  ;;  %4062 = vmatpush3.bf16.msra.mxu1 %v4061_v31  ;;  %v4109_v20 = vpack.c.bf16 %v2073_v10, %v2072_v19  ;;  %v2084_v31 = vld [vmem:[%s7437_s1 + $0x160] sm:$0xff]  ;;  %v2085_v6 = vld [vmem:[%s7437_s1 + $0x168] sm:$0xff]  ;;  %v2103_v43 = vld [vmem:[%s7437_s1 + $0x1f8] sm:$0xff] }
 0x311   :  { %4063 = vmatprep.subr.bf16.mxu1 %v4494_v24  ;;  %v2257_v19 = vld [vmem:[%s7405_s8 + $0x28] sm:$0xff]  ;;  %v2349_v10 = vld [vmem:[%s7407_s10 + $0x20] sm:$0xff] }
 0x312   :  { %v4064_v21 = vpack.c.bf16 %v1932_v3, %v1927_v49  ;;  %v3386_v1 = vpop.f32.mrb[74].mxu1  ;;  %v2102_v3 = vld [vmem:[%s7437_s1 + $0x1f0] sm:$0xff]  ;;  %v4133_v49 = vpack.c.bf16 %v2085_v6, %v2084_v31 }
 0x313   :  { %v1942_v30 = vadd.f32 %v3386_v1, %v3120_v15  ;;  %v1936_v0 = vpop.f32.mrb[75].mxu1  ;;  %v2086_v1 = vld [vmem:[%s7437_s1 + $0x170] sm:$0xff] }
 0x314   :  { %v1937_v16 = vadd.f32 %v3117_v36, %v1936_v0  ;;  %4065 = vmatpush3.bf16.msra.mxu1 %v4064_v21  ;;  %v2091_v36 = vld [vmem:[%s7437_s1 + $0x198] sm:$0xff]  ;;  %v4135_v21 = vpack.c.bf16 %v2103_v43, %v2102_v3  ;;  %v3046_v3 = vld [vmem:[%s7440_s2] ss:$0 sm:$0xff] }
 0x315   :  { %4066 = vmatprep.subr.bf16.mxu1 %v4494_v24  ;;  %v4111_v15 = vpack.c.bf16 %v2091_v36, %v2090_v14 }
 0x316   :  { %v4067_v41 = vpack.c.bf16 %v1942_v30, %v1937_v16  ;;  %v3389_v32 = vpop.f32.mrb[76].mxu1  ;;  %v2087_v30 = vld [vmem:[%s7437_s1 + $0x178] sm:$0xff]  ;;  %v6836_v16 = vld [vmem:[%s7438_s25 + $0x10] sm:$0xff] }
 0x317   :  { %v1952_v57 = vadd.f32 %v3389_v32, %v3126_v28  ;;  %v1946_v46 = vpop.f32.mrb[77].mxu1  ;;  %v4113_v28 = vpack.c.bf16 %v2075_v25, %v2074_v58  ;;  %v4137_v0 = vpack.c.bf16 %v2087_v30, %v2086_v1  ;;  %v2253_v32 = vld [vmem:[%s7405_s8 + $0x8] sm:$0xff]  ;;  %v2352_v58 = vld [vmem:[%s7407_s10 + $0x38] sm:$0xff]  ;;  %v2438_v30 = vld [vmem:[%s7409_s12] sm:$0xff] }
 0x318   :  { %v1947_v29 = vadd.f32 %v3123_v34, %v1946_v46  ;;  %4068 = vmatpush3.bf16.msra.mxu1 %v4067_v41  ;;  %v6758_v34 = vld [vmem:[%s7438_s25 + $0x18] sm:$0xff]  ;;  %v2252_v41 = vld [vmem:[%s7405_s8] sm:$0xff] }
 0x319   :  { %4069 = vmatprep.subr.bf16.mxu1 %v4494_v24  ;;  %v4140_v46 = vpack.c.bf16 %v2253_v32, %v2252_v41 }
 0x31a   :  { %v4070_v5 = vpack.c.bf16 %v1952_v57, %v1947_v29  ;;  %v3392_v27 = vpop.f32.mrb[78].mxu1  ;;  %v2345_v57 = vld [vmem:[%s7407_s10] sm:$0xff]  ;;  %v2346_v29 = vld [vmem:[%s7407_s10 + $0x8] sm:$0xff] }
 0x31b   :  { %v1962_v52 = vadd.f32 %v3392_v27, %v3132_v63  ;;  %v1956_v54 = vpop.f32.mrb[79].mxu1  ;;  %v2255_v27 = vld [vmem:[%s7405_s8 + $0x18] sm:$0xff]  ;;  %v4164_v45 = vpack.c.bf16 %v2346_v29, %v2345_v57  ;;  %4141 = vmatpush3.bf16.msra.mxu0 %v4140_v46  ;;  %v2440_v46 = vld [vmem:[%s7409_s12 + $0x10] sm:$0xff] }
 0x31c   :  { %v1957_v37 = vadd.f32 %v3129_v22, %v1956_v54  ;;  %4071 = vmatpush3.bf16.msra.mxu1 %v4070_v5  ;;  %v2077_v22 = vld [vmem:[%s7437_s1 + $0x128] sm:$0xff]  ;;  %v2254_v5 = vld [vmem:[%s7405_s8 + $0x10] sm:$0xff]  ;;  %4142 = vmatprep.subr.bf16.mxu0 %v4494_v24  ;;  %v2441_v29 = vld [vmem:[%s7409_s12 + $0x18] sm:$0xff] }
 0x31d   :  { %4072 = vmatprep.subr.bf16.mxu1 %v4494_v24  ;;  %v4117_v63 = vpack.c.bf16 %v2077_v22, %v2076_v9  ;;  %v4143_v54 = vpack.c.bf16 %v2255_v27, %v2254_v5  ;;  %v2354_v9 = vld [vmem:[%s7407_s10 + $0x48] sm:$0xff]  ;;  %v4191_v5 = vpack.c.bf16 %v2441_v29, %v2440_v46  ;;  %v2442_v27 = vld [vmem:[%s7409_s12 + $0x20] sm:$0xff]  ;;  %v2564_v46 = vld [vmem:[%s7412_s15 + $0x50] sm:$0xff] }
 0x31e   :  { %v4073_v18 = vpack.c.bf16 %v1962_v52, %v1957_v37  ;;  %v2348_v52 = vld [vmem:[%s7407_s10 + $0x18] sm:$0xff] }
 0x31f   :  { %v4167_v37 = vpack.c.bf16 %v2348_v52, %v2347_v60  ;;  %4144 = vmatpush3.bf16.msra.mxu0 %v4143_v54  ;;  %v2444_v52 = vld [vmem:[%s7409_s12 + $0x30] sm:$0xff]  ;;  %v2445_v54 = vld [vmem:[%s7409_s12 + $0x38] sm:$0xff] }
 0x320   :  { %4074 = vmatpush3.bf16.msra.mxu1 %v4073_v18  ;;  %v2350_v18 = vld [vmem:[%s7407_s10 + $0x28] sm:$0xff]  ;;  %4145 = vmatprep.subr.bf16.mxu0 %v4494_v24  ;;  %v2565_v29 = vld [vmem:[%s7412_s15 + $0x58] sm:$0xff] }
 0x321   :  { %4108 = vmatprep.subr.bf16.mxu1 %v4107_v17  ;;  %v2256_v17 = vld [vmem:[%s7405_s8 + $0x20] sm:$0xff]  ;;  %v4170_v36 = vpack.c.bf16 %v2350_v18, %v2349_v10  ;;  %v2448_v18 = vld [vmem:[%s7409_s12 + $0x50] sm:$0xff] }
 0x322   :  { %v4146_v14 = vpack.c.bf16 %v2257_v19, %v2256_v17  ;;  %v2446_v17 = vld [vmem:[%s7409_s12 + $0x40] sm:$0xff]  ;;  %v2447_v19 = vld [vmem:[%s7409_s12 + $0x48] sm:$0xff] }
 0x323   :  { %3426 = vmatmul.mubr.f32.vlgmr.msra.gmra.mrb[80].mxu1 %v1965_v2  ;;  %v2258_v2 = vld [vmem:[%s7405_s8 + $0x30] sm:$0xff]  ;;  %v4200_v10 = vpack.c.bf16 %v2447_v19, %v2446_v17  ;;  %v2720_v17 = vld [vmem:[%s7414_s17 + $0x8] sm:$0xff] }
 0x324   :  { %4110 = vmatpush3.bf16.msra.mxu1 %v4109_v20  ;;  %2245 = vmatprep.mubr.f32.mxu1 %v6758_v34  ;;  %v2259_v20 = vld [vmem:[%s7405_s8 + $0x38] sm:$0xff]  ;;  %v2724_v19 = vld [vmem:[%s7414_s17 + $0x28] sm:$0xff] }
 0x325   :  { %4112 = vmatprep.subr.bf16.mxu1 %v4111_v15  ;;  %v2351_v15 = vld [vmem:[%s7407_s10 + $0x30] sm:$0xff]  ;;  %4147 = vmatpush3.bf16.msra.mxu0 %v4146_v14  ;;  %v4149_v25 = vpack.c.bf16 %v2259_v20, %v2258_v2  ;;  %v2449_v14 = vld [vmem:[%s7409_s12 + $0x58] sm:$0xff]  ;;  %v2450_v2 = vld [vmem:[%s7409_s12 + $0x60] sm:$0xff] }
 0x326   :  { %4148 = vmatprep.subr.bf16.mxu0 %v4494_v24  ;;  %v4173_v59 = vpack.c.bf16 %v2352_v58, %v2351_v15  ;;  %v2451_v20 = vld [vmem:[%s7409_s12 + $0x68] sm:$0xff]  ;;  %v2452_v58 = vld [vmem:[%s7409_s12 + $0x70] sm:$0xff] }
 0x327   :  { %v4206_v15 = vpack.c.bf16 %v2451_v20, %v2450_v2  ;;  %v3048_v2 = vld [vmem:[%s7408_s11] ss:$0 sm:$0xff] }
 0x328   :  { %4114 = vmatpush3.bf16.msra.mxu1 %v4113_v28  ;;  %v2261_v28 = vld [vmem:[%s7405_s8 + $0x48] sm:$0xff]  ;;  %v3214_v40 = vpop.f32.mrb[64].mxu0 }
 0x329   :  { %4116 = vmatprep.subr.bf16.mxu1 %v4115_v7  ;;  %v2353_v7 = vld [vmem:[%s7407_s10 + $0x40] sm:$0xff]  ;;  %4150 = vmatpush3.bf16.msra.mxu0 %v4149_v25  ;;  %v4152_v22 = vpack.c.bf16 %v2261_v28, %v2260_v8  ;;  %v3215_v39 = vpop.f32.mrb[65].mxu0  ;;  %v2453_v25 = vld [vmem:[%s7409_s12 + $0x78] sm:$0xff]  ;;  %v2539_v28 = vld [vmem:[%s7411_s14 + $0x8] sm:$0xff] }
 0x32a   :  { %4151 = vmatprep.subr.bf16.mxu0 %v4494_v24  ;;  %v4176_v12 = vpack.c.bf16 %v2354_v9, %v2353_v7  ;;  %v2538_v8 = vld [vmem:[%s7411_s14] sm:$0xff]  ;;  %v2540_v9 = vld [vmem:[%s7411_s14 + $0x10] sm:$0xff] }
 0x32b   :  { %v4236_v7 = vpack.c.bf16 %v2539_v28, %v2538_v8 }
 0x32c   :  { %4118 = vmatpush3.bf16.msra.mxu1 %v4117_v63  ;;  %v2263_v63 = vld [vmem:[%s7405_s8 + $0x58] sm:$0xff] }
 0x32d   :  { %4120 = vmatprep.subr.bf16.mxu1 %v4119_v61  ;;  %v2355_v61 = vld [vmem:[%s7407_s10 + $0x50] sm:$0xff]  ;;  %4153 = vmatpush3.bf16.msra.mxu0 %v4152_v22  ;;  %v4155_v44 = vpack.c.bf16 %v2263_v63, %v2262_v62  ;;  %v2541_v22 = vld [vmem:[%s7411_s14 + $0x18] sm:$0xff]  ;;  %v2542_v62 = vld [vmem:[%s7411_s14 + $0x20] sm:$0xff] }
 0x32e   :  { %4154 = vmatprep.subr.bf16.mxu0 %v4494_v24  ;;  %v4179_v35 = vpack.c.bf16 %v2356_v48, %v2355_v61  ;;  %v2543_v63 = vld [vmem:[%s7411_s14 + $0x28] sm:$0xff]  ;;  %v2544_v48 = vld [vmem:[%s7411_s14 + $0x30] sm:$0xff] }
 0x32f   :  { %v4242_v61 = vpack.c.bf16 %v2543_v63, %v2542_v62 }
 0x330   :  { %4122 = vmatpush3.bf16.msra.mxu1 %v4121_v53  ;;  %v2264_v53 = vld [vmem:[%s7405_s8 + $0x60] sm:$0xff] }
 0x331   :  { %4124 = vmatprep.subr.bf16.mxu1 %v4123_v33  ;;  %4156 = vmatpush3.bf16.msra.mxu0 %v4155_v44  ;;  %v2265_v33 = vld [vmem:[%s7405_s8 + $0x68] sm:$0xff]  ;;  %v2545_v44 = vld [vmem:[%s7411_s14 + $0x38] sm:$0xff] }
 0x332   :  { %4157 = vmatprep.subr.bf16.mxu0 %v4494_v24  ;;  %v4158_v4 = vpack.c.bf16 %v2265_v33, %v2264_v53  ;;  %v2555_v53 = vld [vmem:[%s7412_s15 + $0x8] sm:$0xff] }
 0x334   :  { %4126 = vmatpush3.bf16.msra.mxu1 %v4125_v11  ;;  %v3216_v11 = vadd.f32 %v3215_v39, %v3214_v40  ;;  %v2554_v40 = vld [vmem:[%s7412_s15] sm:$0xff] }
 0x335   :  { %4128 = vmatprep.subr.bf16.mxu1 %v4127_v51  ;;  %v4182_v51 = vpack.c.bf16 %v2358_v38, %v2357_v23  ;;  %4159 = vmatpush3.bf16.msra.mxu0 %v4158_v4  ;;  %v4212_v33 = vpack.c.bf16 %v2555_v53, %v2554_v40  ;;  %v2546_v39 = vld [vmem:[%s7411_s14 + $0x40] sm:$0xff]  ;;  %v2547_v4 = vld [vmem:[%s7411_s14 + $0x48] sm:$0xff]  ;;  %v2556_v38 = vld [vmem:[%s7412_s15 + $0x10] sm:$0xff] }
 0x336   :  { %4160 = vmatprep.subr.bf16.mxu0 %v4494_v24  ;;  %v2178_v43 = vadd.f32 %v3216_v11, %v3046_v3  ;;  %v4248_v23 = vpack.c.bf16 %v2547_v4, %v2546_v39  ;;  %v2557_v11 = vld [vmem:[%s7412_s15 + $0x18] sm:$0xff]  ;;  %v2560_v3 = vld [vmem:[%s7412_s15 + $0x30] sm:$0xff] }
 0x337   :  { %v4215_v13 = vpack.c.bf16 %v2557_v11, %v2556_v38  ;;  %v2730_v53 = vld [vmem:[%s7414_s17 + $0x58] sm:$0xff]  ;;  %v2729_v11 = vld [vmem:[%s7414_s17 + $0x50] sm:$0xff] }
 0x338   :  { %4130 = vmatpush3.bf16.msra.mxu1 %v4129_v56  ;;  %v2360_v56 = vld [vmem:[%s7407_s10 + $0x78] sm:$0xff] }
 0x339   :  { %4132 = vmatprep.subr.bf16.mxu1 %v4131_v55  ;;  %v4185_v55 = vpack.c.bf16 %v2360_v56, %v2359_v47  ;;  %4162 = vmatpush3.bf16.msra.mxu0 %v4161_v26  ;;  %v2558_v26 = vld [vmem:[%s7412_s15 + $0x20] sm:$0xff]  ;;  %v2559_v47 = vld [vmem:[%s7412_s15 + $0x28] sm:$0xff] }
 0x33a   :  { %4187 = vmatprep.subr.bf16.mxu0 %v4494_v24 }
 0x33c   :  { %4134 = vmatpush3.bf16.msra.mxu1 %v4133_v49 }
 0x33d   :  { %4136 = vmatprep.subr.bf16.mxu1 %v4135_v21 }
 0x340   :  { %4138 = vmatpush3.bf16.msra.mxu1 %v4137_v0  ;;  %v2439_v0 = vld [vmem:[%s7409_s12 + $0x8] sm:$0xff] }
 0x341   :  { %4163 = vmatprep.subr.bf16.mxu1 %v4494_v24  ;;  %v4188_v32 = vpack.c.bf16 %v2439_v0, %v2438_v30  ;;  %v2562_v0 = vld [vmem:[%s7412_s15 + $0x40] sm:$0xff] }
 0x343   :  { %2246 = vmatmul.mubr.f32.vlgmr.msra.gmra.mrb[82].mxu1 %v6836_v16 }
 0x344   :  { %3495 = vmatprep.mubr.msk.f32.mxu1 %vm4495_vm0, %v4496_v50  ;;  %4165 = vmatpush3.bf16.msra.mxu1 %v4164_v45  ;;  %v2443_v45 = vld [vmem:[%s7409_s12 + $0x28] sm:$0xff]  ;;  %s3028_s12 = sshll.u32 %s4498_s27, 4  ;;  %s3029_s12 = int_to_ptr.vmem [resolvable:$true] %s3028_s12 }
 0x345   :  { %4166 = vmatprep.subr.bf16.mxu1 %v4494_v24  ;;  %v4194_v60 = vpack.c.bf16 %v2443_v45, %v2442_v27  ;;  %v2566_v27 = vld [vmem:[%s7412_s15 + $0x60] sm:$0xff]  ;;  %v2567_v45 = vld [vmem:[%s7412_s15 + $0x68] sm:$0xff] }
 0x348   :  { %4168 = vmatpush3.bf16.msra.mxu1 %v4167_v37  ;;  %v4197_v37 = vpack.c.bf16 %v2445_v54, %v2444_v52  ;;  %v2568_v52 = vld [vmem:[%s7412_s15 + $0x70] sm:$0xff]  ;;  %v2569_v54 = vld [vmem:[%s7412_s15 + $0x78] sm:$0xff] }
 0x349   :  { %4169 = vmatprep.subr.bf16.mxu1 %v4494_v24 }
 0x34c   :  { %4171 = vmatpush3.bf16.msra.mxu1 %v4170_v36  ;;  %v4203_v36 = vpack.c.bf16 %v2449_v14, %v2448_v18  ;;  %v2726_v18 = vld [vmem:[%s7414_s17 + $0x38] sm:$0xff] }
 0x34d   :  { %4172 = vmatprep.subr.bf16.mxu1 %v4494_v24 }
 0x350   :  { %4174 = vmatpush3.bf16.msra.mxu1 %v4173_v59  ;;  %v4209_v59 = vpack.c.bf16 %v2453_v25, %v2452_v58 }
 0x351   :  { %4175 = vmatprep.subr.bf16.mxu1 %v4494_v24 }
 0x354   :  { %4177 = vmatpush3.bf16.msra.mxu1 %v4176_v12  ;;  %v4239_v12 = vpack.c.bf16 %v2541_v22, %v2540_v9 }
 0x355   :  { %4178 = vmatprep.subr.bf16.mxu1 %v4494_v24 }
 0x358   :  { %4180 = vmatpush3.bf16.msra.mxu1 %v4179_v35  ;;  %v4245_v35 = vpack.c.bf16 %v2545_v44, %v2544_v48  ;;  %v2721_v48 = vld [vmem:[%s7414_s17 + $0x10] sm:$0xff] }
 0x359   :  { %4181 = vmatprep.subr.bf16.mxu1 %v4494_v24  ;;  %v2725_v44 = vld [vmem:[%s7414_s17 + $0x30] sm:$0xff] }
 0x35a   :  { %v4293_v4 = vpack.c.bf16 %v2725_v44, %v2721_v48  ;;  %v2757_v48 = vld [vmem:[%s7414_s17 + $0x130] sm:$0xff]  ;;  %v2760_v44 = vld [vmem:[%s7414_s17 + $0x148] sm:$0xff] }
 0x35c   :  { %4183 = vmatpush3.bf16.msra.mxu1 %v4182_v51  ;;  %v2548_v51 = vld [vmem:[%s7411_s14 + $0x50] sm:$0xff] }
 0x35d   :  { %4184 = vmatprep.subr.bf16.mxu1 %v4494_v24  ;;  %v4251_v56 = vpack.c.bf16 %v2549_v42, %v2548_v51  ;;  %v2733_v51 = vld [vmem:[%s7414_s17 + $0x70] sm:$0xff]  ;;  %v2742_v42 = vld [vmem:[%s7414_s17 + $0xb8] sm:$0xff] }
 0x360   :  { %4186 = vmatpush3.bf16.msra.mxu1 %v4185_v55  ;;  %v2550_v55 = vld [vmem:[%s7411_s14 + $0x60] sm:$0xff] }
 0x361   :  { %4211 = vmatprep.subr.bf16.mxu1 %v4494_v24 }
 0x3f6   :  { %v2032_v31 = vpop.f32.mrb[80].mxu1 }
 0x3f7   :  { %v3427_v6 = vpop.f32.mrb[81].mxu1 }
 0x3f8   :  { %v4218_v6 = vpack.c.bf16 %v2559_v47, %v2558_v26  ;;  %v4297_v26 = vpack.c.bf16 %v2733_v51, %v2729_v11  ;;  %v2763_v11 = vld [vmem:[%s7414_s17 + $0x160] sm:$0xff]  ;;  %v2761_v51 = vld [vmem:[%s7414_s17 + $0x150] sm:$0xff] }
 0x416   :  { %v3249_v49 = vpop.f32.mrb[82].mxu1 }
 0x417   :  { %v3250_v21 = vpop.f32.mrb[83].mxu1 }
 0x418   :  { %v3251_v1 = vadd.f32 %v3250_v21, %v3249_v49  ;;  %v2552_v21 = vld [vmem:[%s7411_s14 + $0x70] sm:$0xff] }
 0x41a   :  { %v2248_v41 = vadd.f32 %v3251_v1, %v2178_v43  ;;  %v2561_v43 = vld [vmem:[%s7412_s15 + $0x38] sm:$0xff] }
 0x41b   :  { %v2553_v1 = vld [vmem:[%s7411_s14 + $0x78] sm:$0xff]  ;;  %v4221_v30 = vpack.c.bf16 %v2561_v43, %v2560_v3  ;;  %v2719_v3 = vld [vmem:[%s7414_s17] sm:$0xff] }
 0x41c   :  { %v2251_v57 = vmax.f32 %v2248_v41, 0.0  ;;  %v2563_v41 = vld [vmem:[%s7412_s15 + $0x48] sm:$0xff]  ;;  %v2723_v43 = vld [vmem:[%s7414_s17 + $0x20] sm:$0xff] }
 0x41e   :  { %3461 = vmatmul.mubr.f32.vlgmr.msra.gmra.mrb[66].mxu0 %v2251_v57  ;;  %3496 = vmatmul.mubr.f32.vlgmr.msra.gmra.mrb[84].mxu1 %v2251_v57  ;;  %v4224_v57 = vpack.c.bf16 %v2563_v41, %v2562_v0  ;;  %v4261_v41 = vpack.c.bf16 %v2723_v43, %v2719_v3  ;;  %v2767_v43 = vld [vmem:[%s7414_s17 + $0x180] sm:$0xff] }
 0x41f   :  { %4189 = vmatpush3.bf16.msra.mxu0 %v4188_v32  ;;  %3530 = vmatprep.mubr.msk.f32.mxu0 %vm4495_vm0, %v4496_v50  ;;  %v4257_v32 = vpack.c.bf16 %v2553_v1, %v2552_v21  ;;  %v2728_v21 = vld [vmem:[%s7414_s17 + $0x48] sm:$0xff] }
 0x420   :  { %4190 = vmatprep.subr.bf16.mxu0 %v4494_v24  ;;  %3565 = vmatprep.mubr.msk.f32.mxu1 %vm4495_vm0, %v4496_v50  ;;  %v2732_v1 = vld [vmem:[%s7414_s17 + $0x68] sm:$0xff] }
 0x421   :  { %4213 = vmatpush3.bf16.msra.mxu1 %v4212_v33  ;;  %v2734_v33 = vld [vmem:[%s7414_s17 + $0x78] sm:$0xff] }
 0x422   :  { %4214 = vmatprep.subr.bf16.mxu1 %v4494_v24  ;;  %v4295_v38 = vpack.c.bf16 %v2734_v33, %v2730_v53 }
 0x423   :  { %4192 = vmatpush3.bf16.msra.mxu0 %v4191_v5  ;;  %v4227_v5 = vpack.c.bf16 %v2565_v29, %v2564_v46  ;;  %v2727_v46 = vld [vmem:[%s7414_s17 + $0x40] sm:$0xff] }
 0x424   :  { %4193 = vmatprep.subr.bf16.mxu0 %v4494_v24  ;;  %v2731_v29 = vld [vmem:[%s7414_s17 + $0x60] sm:$0xff] }
 0x425   :  { %4216 = vmatpush3.bf16.msra.mxu1 %v4215_v13  ;;  %v2738_v13 = vld [vmem:[%s7414_s17 + $0x98] sm:$0xff] }
 0x426   :  { %4217 = vmatprep.subr.bf16.mxu1 %v4494_v24  ;;  %v4299_v47 = vpack.c.bf16 %v2742_v42, %v2738_v13  ;;  %v2765_v13 = vld [vmem:[%s7414_s17 + $0x170] sm:$0xff] }
 0x427   :  { %4195 = vmatpush3.bf16.msra.mxu0 %v4194_v60  ;;  %v4230_v60 = vpack.c.bf16 %v2567_v45, %v2566_v27  ;;  %v2740_v27 = vld [vmem:[%s7414_s17 + $0xa8] sm:$0xff]  ;;  %v4265_v45 = vpack.c.bf16 %v2731_v29, %v2727_v46  ;;  %v2782_v29 = vld [vmem:[%s7414_s17 + $0x1f8] sm:$0xff] }
 0x428   :  { %4196 = vmatprep.subr.bf16.mxu0 %v4494_v24 }
 0x429   :  { %4219 = vmatpush3.bf16.msra.mxu1 %v4218_v6  ;;  %v3049_v6 = vld [vmem:[%s7410_s13] ss:$0 sm:$0xff] }
 0x42a   :  { %4220 = vmatprep.subr.bf16.mxu1 %v4494_v24 }
 0x42b   :  { %4198 = vmatpush3.bf16.msra.mxu0 %v4197_v37  ;;  %v4233_v37 = vpack.c.bf16 %v2569_v54, %v2568_v52  ;;  %v2735_v52 = vld [vmem:[%s7414_s17 + $0x80] sm:$0xff] }
 0x42c   :  { %4199 = vmatprep.subr.bf16.mxu0 %v4494_v24  ;;  %v2739_v54 = vld [vmem:[%s7414_s17 + $0xa0] sm:$0xff] }
 0x42d   :  { %4222 = vmatpush3.bf16.msra.mxu1 %v4221_v30 }
 0x42e   :  { %4223 = vmatprep.subr.bf16.mxu1 %v4494_v24 }
 0x42f   :  { %4201 = vmatpush3.bf16.msra.mxu0 %v4200_v10  ;;  %v4259_v10 = vpack.c.bf16 %v2724_v19, %v2720_v17  ;;  %v2744_v17 = vld [vmem:[%s7414_s17 + $0xc8] sm:$0xff] }
 0x430   :  { %4202 = vmatprep.subr.bf16.mxu0 %v4494_v24  ;;  %v2748_v19 = vld [vmem:[%s7414_s17 + $0xe8] sm:$0xff] }
 0x431   :  { %4225 = vmatpush3.bf16.msra.mxu1 %v4224_v57  ;;  %v4263_v57 = vpack.c.bf16 %v2732_v1, %v2728_v21  ;;  %v2769_v21 = vld [vmem:[%s7414_s17 + $0x190] sm:$0xff] }
 0x432   :  { %4226 = vmatprep.subr.bf16.mxu1 %v4494_v24 }
 0x433   :  { %4204 = vmatpush3.bf16.msra.mxu0 %v4203_v36  ;;  %v3047_v36 = vld [vmem:[%s7406_s9] ss:$0 sm:$0xff] }
 0x434   :  { %4205 = vmatprep.subr.bf16.mxu0 %v4494_v24 }
 0x435   :  { %4228 = vmatpush3.bf16.msra.mxu1 %v4227_v5  ;;  %v2736_v5 = vld [vmem:[%s7414_s17 + $0x88] sm:$0xff] }
 0x436   :  { %4229 = vmatprep.subr.bf16.mxu1 %v4494_v24 }
 0x437   :  { %4207 = vmatpush3.bf16.msra.mxu0 %v4206_v15 }
 0x438   :  { %4208 = vmatprep.subr.bf16.mxu0 %v4494_v24 }
 0x439   :  { %4231 = vmatpush3.bf16.msra.mxu1 %v4230_v60  ;;  %v4267_v60 = vpack.c.bf16 %v2740_v27, %v2736_v5  ;;  %v2775_v5 = vld [vmem:[%s7414_s17 + $0x1c0] sm:$0xff] }
 0x43a   :  { %4232 = vmatprep.subr.bf16.mxu1 %v4494_v24 }
 0x43b   :  { %4210 = vmatpush3.bf16.msra.mxu0 %v4209_v59 }
 0x43c   :  { %4235 = vmatprep.subr.bf16.mxu0 %v4494_v24 }
 0x43d   :  { %4234 = vmatpush3.bf16.msra.mxu1 %v4233_v37  ;;  %v4269_v37 = vpack.c.bf16 %v2739_v54, %v2735_v52  ;;  %v2781_v52 = vld [vmem:[%s7414_s17 + $0x1f0] sm:$0xff] }
 0x43e   :  { %3531 = vmatmul.mubr.f32.vlgmr.msra.gmra.mrb[68].mxu0 %v2032_v31  ;;  %v2551_v31 = vld [vmem:[%s7411_s14 + $0x68] sm:$0xff]  ;;  %4260 = vmatprep.subr.bf16.mxu1 %v4259_v10  ;;  %v4271_v10 = vpack.c.bf16 %v2748_v19, %v2744_v17 }
 0x43f   :  { %4237 = vmatpush3.bf16.msra.mxu0 %v4236_v7  ;;  %3600 = vmatprep.mubr.msk.f32.mxu0 %vm4495_vm0, %v4496_v50  ;;  %v4254_v49 = vpack.c.bf16 %v2551_v31, %v2550_v55  ;;  %v2741_v55 = vld [vmem:[%s7414_s17 + $0xb0] sm:$0xff] }
 0x440   :  { %4238 = vmatprep.subr.bf16.mxu0 %v4494_v24 }
 0x443   :  { %4240 = vmatpush3.bf16.msra.mxu0 %v4239_v12 }
 0x444   :  { %4241 = vmatprep.subr.bf16.mxu0 %v4494_v24 }
 0x447   :  { %4243 = vmatpush3.bf16.msra.mxu0 %v4242_v61  ;;  %v2535_v61 = vld [vmem:[%s7441_s28] sm:$0xff] }
 0x448   :  { %4244 = vmatprep.subr.bf16.mxu0 %v4494_v24 }
 0x44b   :  { %4246 = vmatpush3.bf16.msra.mxu0 %v4245_v35 }
 0x44c   :  { %4247 = vmatprep.subr.bf16.mxu0 %v4494_v24 }
 0x44f   :  { %4249 = vmatpush3.bf16.msra.mxu0 %v4248_v23 }
 0x450   :  { %4250 = vmatprep.subr.bf16.mxu0 %v4494_v24 }
 0x453   :  { %4252 = vmatpush3.bf16.msra.mxu0 %v4251_v56  ;;  %v2737_v56 = vld [vmem:[%s7414_s17 + $0x90] sm:$0xff] }
 0x454   :  { %4253 = vmatprep.subr.bf16.mxu0 %v4494_v24  ;;  %v4301_v31 = vpack.c.bf16 %v2741_v55, %v2737_v56  ;;  %v2770_v56 = vld [vmem:[%s7414_s17 + $0x198] sm:$0xff]  ;;  %v4313_v55 = vpack.c.bf16 %v2765_v13, %v2761_v51 }
 0x457   :  { %4255 = vmatpush3.bf16.msra.mxu0 %v4254_v49 }
 0x458   :  { %4256 = vmatprep.subr.bf16.mxu0 %v4494_v24  ;;  %v2722_v24 = vld [vmem:[%s7414_s17 + $0x18] sm:$0xff] }
 0x459   :  { %v4291_v14 = vpack.c.bf16 %v2726_v18, %v2722_v24  ;;  %v2746_v24 = vld [vmem:[%s7414_s17 + $0xd8] sm:$0xff] }
 0x45a   :  { %v2750_v18 = vld [vmem:[%s7414_s17 + $0xf8] sm:$0xff] }
 0x45b   :  { %4258 = vmatpush3.bf16.msra.mxu0 %v4257_v32 }
 0x45c   :  { %4292 = vmatprep.subr.bf16.mxu0 %v4291_v14  ;;  %v2743_v14 = vld [vmem:[%s7414_s17 + $0xc0] sm:$0xff] }
 0x4f1   :  { %v2341_v20 = vpop.f32.mrb[66].mxu0  ;;  %v2434_v15 = vpop.f32.mrb[84].mxu1 }
 0x4f2   :  { %v2342_v58 = vadd.f32 %v3047_v36, %v2341_v20  ;;  %v2435_v25 = vadd.f32 %v3048_v2, %v2434_v15  ;;  %v3462_v59 = vpop.f32.mrb[67].mxu0  ;;  %v3497_v8 = vpop.f32.mrb[85].mxu1  ;;  %v2747_v36 = vld [vmem:[%s7414_s17 + $0xe0] sm:$0xff]  ;;  %v4303_v2 = vpack.c.bf16 %v2750_v18, %v2746_v24  ;;  %v2745_v15 = vld [vmem:[%s7414_s17 + $0xd0] sm:$0xff] }
 0x4f3   :  { %v4273_v20 = vpack.c.bf16 %v2747_v36, %v2743_v14  ;;  %v2756_v8 = vld [vmem:[%s7414_s17 + $0x128] sm:$0xff] }
 0x4f4   :  { %2951 = vst [vmem:[%s7417_s20] sm:$0xff] %v2342_v58  ;;  %v2983_v28 = vmul.f32 %v2342_v58, %v2342_v58  ;;  %v2532_v7 = vmul.f32 0.5, %v2435_v25  ;;  %2952 = vst [vmem:[%s7418_s21] sm:$0xff] %v2435_v25  ;;  %v2985_v9 = vmul.f32 1.442695, %v2435_v25  ;;  %v2982_v22 = vsub.f32 0.0, %v2435_v25  ;;  %v2752_v25 = vld [vmem:[%s7414_s17 + $0x108] sm:$0xff] }
 0x4f6   :  { %v2533_v12 = vmul.f32 1.442695, %v2532_v7  ;;  %4428 = vpow2.f32 %v2985_v9  ;;  %v2984_v62 = vadd.f32 %v2983_v28, %v2982_v22  ;;  %v2754_v28 = vld [vmem:[%s7414_s17 + $0x118] sm:$0xff]  ;;  %v4275_v9 = vpack.c.bf16 %v2756_v8, %v2752_v25 }
 0x4f7   :  { %v2758_v7 = vld [vmem:[%s7414_s17 + $0x138] sm:$0xff] }
 0x4f8   :  { %4430 = vpow2.f32 %v2533_v12  ;;  %v4307_v22 = vpack.c.bf16 %v2758_v7, %v2754_v28  ;;  %v2751_v12 = vld [vmem:[%s7414_s17 + $0x100] sm:$0xff] }
 0x500   :  { %v4429_v63 = vpop.eup %4428 }
 0x501   :  { %v7162_v35 = vadd.f32 %v4429_v63, %v2984_v62  ;;  %v2755_v62 = vld [vmem:[%s7414_s17 + $0x120] sm:$0xff]  ;;  %v2753_v63 = vld [vmem:[%s7414_s17 + $0x110] sm:$0xff] }
 0x502   :  { %v4431_v40 = vpop.eup %4430  ;;  %v4309_v53 = vpack.c.bf16 %v2757_v48, %v2753_v63 }
 0x503   :  { %v2536_v39 = vmul.f32 %v4431_v40, %v2535_v61  ;;  %v4277_v61 = vpack.c.bf16 %v2755_v62, %v2751_v12  ;;  %v2764_v40 = vld [vmem:[%s7414_s17 + $0x168] sm:$0xff] }
 0x504   :  { %v4279_v33 = vpack.c.bf16 %v2764_v40, %v2760_v44 }
 0x505   :  { %v2537_v23 = vadd.f32 %v2536_v39, %v2342_v58  ;;  %v2749_v58 = vld [vmem:[%s7414_s17 + $0xf0] sm:$0xff]  ;;  %v2762_v39 = vld [vmem:[%s7414_s17 + $0x158] sm:$0xff] }
 0x506   :  { %v4305_v59 = vpack.c.bf16 %v2749_v58, %v2745_v15 }
 0x507   :  { %3601 = vmatmul.mubr.f32.vlgmr.msra.gmra.mrb[70].mxu0 %v2537_v23  ;;  %v2759_v23 = vld [vmem:[%s7414_s17 + $0x140] sm:$0xff] }
 0x508   :  { %4294 = vmatpush1.bf16.msra.mxu0 %v4293_v4  ;;  %2940 = vmatprep.mubr.f32.mxu0 %v4496_v50  ;;  %v2766_v4 = vld [vmem:[%s7414_s17 + $0x178] sm:$0xff]  ;;  %v4281_v42 = vpack.c.bf16 %v2763_v11, %v2759_v23 }
 0x509   :  { %4296 = vmatprep.subr.bf16.mxu0 %v4295_v38  ;;  %v4311_v38 = vpack.c.bf16 %v2766_v4, %v2762_v39  ;;  %v4444_v39 = vld [vmem:[%s7438_s25] sm:$0xff] }
 0x50c   :  { %4298 = vmatpush1.bf16.msra.mxu0 %v4297_v26  ;;  %v2768_v26 = vld [vmem:[%s7414_s17 + $0x188] sm:$0xff] }
 0x50d   :  { %4300 = vmatprep.subr.bf16.mxu0 %v4299_v47  ;;  %v2772_v47 = vld [vmem:[%s7414_s17 + $0x1a8] sm:$0xff] }
 0x510   :  { %4302 = vmatpush1.bf16.msra.mxu0 %v4301_v31  ;;  %v4283_v31 = vpack.c.bf16 %v2772_v47, %v2768_v26 }
 0x511   :  { %v2527_v49 = vpop.f32.mrb[68].mxu0  ;;  %4304 = vmatprep.subr.bf16.mxu0 %v4303_v2 }
 0x512   :  { %v2528_v30 = vadd.f32 %v3049_v6, %v2527_v49  ;;  %v3532_v0 = vpop.f32.mrb[69].mxu0  ;;  %v2774_v6 = vld [vmem:[%s7414_s17 + $0x1b8] sm:$0xff]  ;;  %v2771_v49 = vld [vmem:[%s7414_s17 + $0x1a0] sm:$0xff] }
 0x513   :  { %v4315_v3 = vpack.c.bf16 %v2774_v6, %v2770_v56  ;;  %v4285_v1 = vpack.c.bf16 %v2771_v49, %v2767_v43 }
 0x514   :  { %v2531_v32 = vmax.f32 %v2528_v30, 0.0  ;;  %4306 = vmatpush1.bf16.msra.mxu0 %v4305_v59  ;;  %v2773_v30 = vld [vmem:[%s7414_s17 + $0x1b0] sm:$0xff]  ;;  %v2783_v59 = vld [vmem:[%s7415_s18] sm:$0xf] }
 0x515   :  { %4308 = vmatprep.subr.bf16.mxu0 %v4307_v22  ;;  %v4317_v0 = vpack.c.bf16 %v2773_v30, %v2769_v21  ;;  %v3052_v21 = vadd.f32 -1.0, %v7162_v35 }
 0x516   :  { %3566 = vmatmul.mubr.f32.vlgmr.msra.gmra.mrb[86].mxu1 %v2531_v32  ;;  %v2780_v32 = vld [vmem:[%s7414_s17 + $0x1e8] sm:$0xff] }
 0x517   :  { %4262 = vmatpush1.bf16.msra.mxu1 %v4261_v41  ;;  %2869 = vmatprep.mubr.f32.mxu1 %v4496_v50  ;;  %v2776_v41 = vld [vmem:[%s7414_s17 + $0x1c8] sm:$0xff] }
 0x518   :  { %4264 = vmatprep.subr.bf16.mxu1 %v4263_v57  ;;  %4310 = vmatpush1.bf16.msra.mxu0 %v4309_v53  ;;  %v2778_v57 = vld [vmem:[%s7414_s17 + $0x1d8] sm:$0xff]  ;;  %v4287_v46 = vpack.c.bf16 %v2780_v32, %v2776_v41 }
 0x519   :  { %4312 = vmatprep.subr.bf16.mxu0 %v4311_v38  ;;  %v4319_v27 = vpack.c.bf16 %v2782_v29, %v2778_v57  ;;  %v4445_v38 = vld [vmem:[%s7438_s25 + $0x8] sm:$0xff] }
 0x51b   :  { %4266 = vmatpush1.bf16.msra.mxu1 %v4265_v45  ;;  %v2779_v45 = vld [vmem:[%s7414_s17 + $0x1e0] sm:$0xff] }
 0x51c   :  { %4268 = vmatprep.subr.bf16.mxu1 %v4267_v60  ;;  %4314 = vmatpush1.bf16.msra.mxu0 %v4313_v55  ;;  %v2777_v60 = vld [vmem:[%s7414_s17 + $0x1d0] sm:$0xff]  ;;  %v4289_v54 = vpack.c.bf16 %v2779_v45, %v2775_v5 }
 0x51d   :  { %4316 = vmatprep.subr.bf16.mxu0 %v4315_v3 }
 0x51f   :  { %4270 = vmatpush1.bf16.msra.mxu1 %v4269_v37  ;;  %v4321_v37 = vpack.c.bf16 %v2781_v52, %v2777_v60 }
 0x520   :  { %4272 = vmatprep.subr.bf16.mxu1 %v4271_v10  ;;  %4318 = vmatpush1.bf16.msra.mxu0 %v4317_v0  ;;  %v3050_v10 = vld [vmem:[%s7413_s16] ss:$0 sm:$0xff] }
 0x521   :  { %4320 = vmatprep.subr.bf16.mxu0 %v4319_v27 }
 0x523   :  { %4274 = vmatpush1.bf16.msra.mxu1 %v4273_v20  ;;  %v2785_v20 = vlaneseq }
 0x524   :  { %4276 = vmatprep.subr.bf16.mxu1 %v4275_v9  ;;  %4322 = vmatpush1.bf16.msra.mxu0 %v4321_v37 }
 0x525   :  { %v2786_v15 = vshrl.u32 %v2785_v20, 7 }
 0x527   :  { %4278 = vmatpush1.bf16.msra.mxu1 %v4277_v61  ;;  %v2787_v58 = vsub.s32 0, %v2786_v15  ;;  %v2795_v25 = vsub.s32 2, %v2786_v15  ;;  %v2791_v8 = vsub.s32 1, %v2786_v15  ;;  %v2799_v28 = vsub.s32 3, %v2786_v15 }
 0x528   :  { %4280 = vmatprep.subr.bf16.mxu1 %v4279_v33  ;;  %vm2955_vm1 = vcmp.lt.s32.totalorder %v2786_v15, 2 }
 0x529   :  { %v2788_v7 = vrot.slane %v2783_v59, %v2787_v58  ;;  %v2796_v9 = vrot.slane %v2783_v59, %v2795_v25  ;;  %v2792_v22 = vrot.slane %v2783_v59, %v2791_v8  ;;  %v2800_v12 = vrot.slane %v2783_v59, %v2799_v28 }
 0x52b   :  { %4282 = vmatpush1.bf16.msra.mxu1 %v4281_v42  ;;  %v3051_v42 = vsel %vm2955_vm1, 1.0, %v4496_v50 }
 0x52c   :  { %4284 = vmatprep.subr.bf16.mxu1 %v4283_v31 }
 0x52f   :  { %4286 = vmatpush1.bf16.msra.mxu1 %v4285_v1  ;;  %v2989_v1 = vmul.f32 %v3052_v21, %v3051_v42 }
 0x530   :  { %4288 = vmatprep.subr.bf16.mxu1 %v4287_v46 }
 0x533   :  { %4290 = vmatpush1.bf16.msra.mxu1 %v4289_v54 }
 0x5da   :  { %v2706_v17 = vpop.f32.mrb[70].mxu0 }
 0x5db   :  { %v3602_v19 = vpop.f32.mrb[71].mxu0 }
 0x5e9   :  { %v2636_v24 = vpop.f32.mrb[86].mxu1 }
 0x5ea   :  { %v2707_v18 = vadd.f32 %v2706_v17, %v2636_v24  ;;  %v3567_v14 = vpop.f32.mrb[87].mxu1 }
 0x5ec   :  { %v2717_v36 = vadd.f32 %v3050_v10, %v2707_v18 }
 0x5ee   :  { %v2718_v2 = vmax.f32 %v2717_v36, 0.0 }
 0x5f0   :  { %2870 = vmatmul.mubr.f32.vlgmr.msra.gmra.mrb[88].mxu1 %v2718_v2  ;;  %2941 = vmatmul.mubr.f32.vlgmr.msra.gmra.mrb[72].mxu0 %v2718_v2 }
 0x6c3   :  { %v2871_v62 = vpop.f32.mrb[88].mxu1  ;;  %v2942_v63 = vpop.f32.mrb[72].mxu0 }
 0x6c4   :  { %v2872_v61 = vadd.f32 %v2871_v62, %v2788_v7  ;;  %v2943_v48 = vadd.f32 %v2942_v63, %v2796_v9  ;;  %v2873_v44 = vpop.f32.mrb[89].mxu1  ;;  %v2944_v40 = vpop.f32.mrb[73].mxu0 }
 0x6c5   :  { %v2874_v53 = vadd.f32 %v2873_v44, %v2792_v22  ;;  %v2945_v33 = vadd.f32 %v2944_v40, %v2800_v12 }
 0x6c6   :  { %2947 = vst [vmem:[%s7416_s19] sm:$0xff] %v2872_v61  ;;  %v2958_v4 = vsub.f32 %v2872_v61, %v4444_v39  ;;  %2949 = vst [vmem:[%s7416_s19 + $0x10] sm:$0xff] %v2943_v48  ;;  %v2960_v23 = vsub.f32 %v2943_v48, %v6836_v16 }
 0x6c7   :  { %2948 = vst [vmem:[%s7416_s19 + $0x8] sm:$0xff] %v2874_v53  ;;  %v2959_v11 = vsub.f32 %v2874_v53, %v4445_v38  ;;  %2950 = vst [vmem:[%s7416_s19 + $0x18] sm:$0xff] %v2945_v33  ;;  %v2961_v51 = vsub.f32 %v2945_v33, %v6758_v34  ;;  %s4497_s19 = smov [#allocation2]  }
 0x6c8   :  { %v2962_v13 = vand.u32 2147483647, %v2958_v4  ;;  %v2964_v26 = vand.u32 2147483647, %v2960_v23  ;;  %s3018_s25 = sshll.u32 %s4497_s19, 4  ;;  %s3019_s25 = int_to_ptr.vmem [resolvable:$true] %s3018_s25 }
 0x6c9   :  { %v2963_v16 = vand.u32 2147483647, %v2959_v11  ;;  %v2965_v55 = vand.u32 2147483647, %v2961_v51  ;;  %s4446_s7 = scalar_lea.vmem %s3019_s25, 16  ;;  %s4450_s1 = scalar_lea.vmem %s3019_s25, 32 }
 0x6ca   :  { %v2966_v47 = vmul.f32 %v3051_v42, %v2962_v13  ;;  %v2968_v31 = vmul.f32 %v3051_v42, %v2964_v26  ;;  %p4447_p0 = scmp.ne.s32.totalorder %s3019_s25, %s4446_s7  ;;  %p4451_p1 = scmp.lt.s32.totalorder %s3019_s25, %s3019_s25 }
 0x6cb   :  { %v2967_v56 = vmul.f32 %v3051_v42, %v2963_v16  ;;  %v2969_v3 = vmul.f32 %v3051_v42, %v2965_v55  ;;  %p4452_p2 = scmp.lt.s32.totalorder %s4450_s1, %s4446_s7 }
 0x6cd   :  { %v2970_v6 = vadd.f32 %v2967_v56, %v2966_v47  ;;  %p4453_p3 = por %p4452_p2, %p4451_p1 }
 0x6cf   :  { %v2971_v43 = vadd.f32 %v2970_v6, %v2968_v31  ;;  %p4454_p4 = pnand %p4453_p3, %p4447_p0 }
 0x6d1   :  { %v2972_v49 = vadd.f32 %v2971_v43, %v2969_v3 }
 0x6d3   :  { %2973 = vadd.xlane.f32.xlu0 %v2972_v49 }
 0x6d7   :  { %2990 = vadd.xlane.f32.xlu0 %v2989_v1 }
 0x760   :  { %v2974_v30 = vpop.xlane.xlu0 %2973 }
 0x761   :  { %v2975_v34 = vrot.slane %v2974_v30, 4 }
 0x763   :  { %v2976_v0 = vadd.f32 %v2975_v34, %v2974_v30 }
 0x764   :  { %v2991_v41 = vpop.xlane.xlu0 %2990 }
 0x765   :  { %v2977_v50 = vrot.slane %v2976_v0, 2  ;;  %v2992_v32 = vrot.slane %v2991_v41, 4 }
 0x767   :  { %v2993_v57 = vadd.f32 %v2992_v32, %v2991_v41  ;;  %v2978_v46 = vadd.f32 %v2977_v50, %v2976_v0 }
 0x769   :  { %v2994_v29 = vrot.slane %v2993_v57, 2  ;;  %v2979_v5 = vrot.slane %v2978_v46, 1 }
 0x76b   :  { %v2995_v27 = vadd.f32 %v2994_v29, %v2993_v57  ;;  %v2980_v45 = vadd.f32 %v2979_v5, %v2978_v46 }
 0x76d   :  { %4419 = vpush %v2980_v45  ;;  %v2996_v60 = vrot.slane %v2995_v27, 1 }
 0x76f   :  { %v2997_v52 = vadd.f32 %v2996_v60, %v2995_v27 }
 0x771   :  { %4421 = vpush %v2997_v52 }
 0x79e   :  { %s4420_s6 = spop %4419 }
 0x79f   :  { %v2999_v35 = vstv %s4420_s6 }
 0x7a0   :  { %3002 = vst.msk [vmem:[#allocation2] sm:$0x1] %vm3001_vm2, %v2999_v35 }
 0x7a1   :  { %4457 = shalt.err (!%p4454_p4)
}
 0x7a2   :  { %s4458_s28 = scalar_lea.hbm %s7419_s22, 16 }
 0x7a3   :  { %p4459_p5 = scmp.ne.s32.totalorder %s7419_s22, %s4458_s28  ;;  %p4462_p6 = scmp.lt.u32.totalorder %s4458_s28, %s7419_s22 }
 0x7a5   :  { %p4464_p7 = pnand %p4462_p6, %p4459_p5 }
 0x7a7   :  { %4467 = shalt.err (!%p4464_p7)
}
 0x7a8   :  { %3021 = dma.vmem_to_hbm [thread:$0]  %s3019_s25, 16, %s7419_s22, [#allocation3]  }
 0x7a9   :  { %s4422_s4 = spop %4421  ;;  %s4468_s16 = scalar_lea.vmem %s3029_s12, 16 }
 0x7aa   :  { %v3003_v54 = vstv %s4422_s4  ;;  %p4469_p8 = scmp.ne.s32.totalorder %s3029_s12, %s4468_s16  ;;  %s4472_s8 = scalar_lea.vmem %s3029_s12, 32 }
 0x7ab   :  { %3005 = vst.msk [vmem:[#allocation4] sm:$0x1] %vm3001_vm2, %v3003_v54  ;;  %p4473_p9 = scmp.lt.s32.totalorder %s3029_s12, %s3029_s12  ;;  %p4474_p10 = scmp.lt.s32.totalorder %s4472_s8, %s4468_s16 }
 0x7ad   :  { %p4475_p11 = por %p4474_p10, %p4473_p9 }
 0x7af   :  { %p4476_p12 = pnand %p4475_p11, %p4469_p8 }
 0x7b1   :  { %4479 = shalt.err (!%p4476_p12)
}
 0x7b2   :  { %s4480_s30 = scalar_lea.hbm %s7420_s23, 16 }
 0x7b3   :  { %p4481_p13 = scmp.ne.s32.totalorder %s7420_s23, %s4480_s30  ;;  %p4484_p0 = scmp.lt.u32.totalorder %s4480_s30, %s7420_s23 }
 0x7b5   :  { %p4486_p1 = pnand %p4484_p0, %p4481_p13 }
 0x7b7   :  { %4489 = shalt.err (!%p4486_p1)
}
 0x7b8   :  { %3031 = dma.vmem_to_hbm [thread:$0]  %s3029_s12, 16, %s7420_s23, [#allocation5]  }
 0x7b9   :  { %4490 = dma.done.wait [#allocation3], 16  }
 0x7ba   :  { %4491 = vsyncadd [#allocation3], 4294967280 }
 0x7bb   :  { %4492 = dma.done.wait [#allocation5], 16  }
 0x7bc   :  { %4493 = vsyncadd [#allocation5], 4294967280 }
 0x7bd   :  { %3044 = vsyncpa [#allocation3], 1 }
 0x7be   :  { %3045 = vsyncpa [#allocation5], 1 }

</bundles_post_ra>
